<compile_context>
chip_gen: v7x
topology: tpu7x:2x2x1
jax: 0.10.0
libtpu: 0.0.40
codegen_flags: <defaults>
</compile_context>

<pallas_src>
import functools

import jax
import jax.numpy as jnp
from jax import lax
from jax.experimental import pallas as pl
from jax.experimental.pallas import tpu as pltpu


_NEG = -1e30                       # "minus infinity" that stays finite in f32
                                   # (plain Python float: never a captured const)
_VMEM_LIMIT = 32 * 1024 * 1024     # fits v5e/v6e/v7x scoped VMEM


def _round_up(v, m):
    return (v + m - 1) // m * m


def _choose_node_tile(n, e_pad, max_tile=512, vmem_budget=16 * 1024 * 1024):
    """Node-row tile: multiple of 8, sized so ~5 live [tn, e_pad] f32 slabs
    (double-buffered H tile + softmax temporaries) fit the budget on every TPU
    generation, including v7x's smaller (64 MiB physical) VMEM."""
    tn = vmem_budget // (5 * 4 * e_pad)
    tn = max(8, min(max_tile, (tn // 8) * 8))
    return min(tn, _round_up(n, 8))


def _masked_alpha(head, scores, edge_scores_t, mask_bias):
    """alpha[n, e] = softmax over hyperedges incident to node n of
    leaky_relu(a_node[n, head] + a_edge[head, e]); rows with no incident
    hyperedge (and padded nodes) get an all-zero row, matching PyG."""
    a_n = scores[:, head:head + 1]              # [tn, 1]
    a_e = edge_scores_t[head:head + 1, :]       # [1, E_pad]
    logits = a_n + a_e                          # [tn, E_pad]
    logits = jnp.where(logits > 0.0, logits, 0.2 * logits)   # leaky_relu(0.2)
    logits = logits + mask_bias                 # -1e30 at non-incident entries
    row_max = jnp.max(logits, axis=1, keepdims=True)
    p = jnp.exp(logits - row_max)               # exp of *masked* logits (safe)
    denom = jnp.sum(p, axis=1, keepdims=True)   # >= 1 always
    inv = pl.reciprocal(denom, approx=True)     # EUP slot
    inv = inv * (2.0 - denom * inv)             # one Newton step -> f32 accuracy
    inv = jnp.where(row_max > 0.5 * _NEG, inv, 0.0)   # zero rows with no edges
    return p * inv                              # divide replaced by a multiply


# ---------------- kernel 1: x1 = x @ W1, fused attention projections ----------
def _feature_kernel(x_ref, w1_ref, attp_ref, x1_ref, sc_ref):
    x1 = jnp.dot(x_ref[...], w1_ref[...], preferred_element_type=jnp.float32)
    x1_ref[...] = x1
    # one [tn, HD] x [HD, 2*heads] matmul instead of 2*heads tiny GEMVs
    sc_ref[...] = jnp.dot(x1, attp_ref[...], preferred_element_type=jnp.float32)


# ---------------- kernel 2: layer-1 edge aggregation (reduction over nodes) ----
def _edge_agg1_kernel(h_ref, x1_ref, sc_ref, est_ref, m1_ref, binv_ref,
                      *, heads, hid):
    i = pl.program_id(0)

    @pl.when(i == 0)
    def _init():
        m1_ref[...] = jnp.zeros_like(m1_ref)
        binv_ref[...] = jnp.zeros_like(binv_ref)

    H = h_ref[...]                                    # [tn, E_pad]
    x1 = x1_ref[...]                                  # [tn, HD]
    sc = sc_ref[...]                                  # [tn, 2*heads]
    est = est_ref[...]                                # [heads, E_pad]
    bias = jnp.where(H > 0.0, 0.0, _NEG)              # shared across heads

    # hyperedge degrees: contract the node axis of H (no explicit H^T input)
    ones = jnp.ones((H.shape[0], 1), jnp.float32)
    binv_ref[...] += lax.dot_general(H, ones, (((0,), (0,)), ((), ())),
                                     preferred_element_type=jnp.float32)

    contribs = []
    for h in range(heads):                            # heads is small & static
        alpha = _masked_alpha(h, sc, est, bias)       # [tn, E_pad]
        x1h = x1[:, h * hid:(h + 1) * hid]            # [tn, hid]
        contribs.append(lax.dot_general(alpha, x1h, (((0,), (0,)), ((), ())),
                                        preferred_element_type=jnp.float32))
    m1_ref[...] += jnp.concatenate(contribs, axis=1)  # one full-width accumulate

    @pl.when(i == pl.num_programs(0) - 1)
    def _finalize():
        deg_e = binv_ref[...]
        binv = jnp.where(deg_e > 0.0, 1.0 / deg_e, 0.0)
        binv_ref[...] = binv
        m1_ref[...] = m1_ref[...] * binv              # apply B^-1 once


# ---------------- kernel 3: layer-1 node update + ELU + x2 = h1 @ W2 -----------
def _node_update1_kernel(h_ref, sc_ref, est_ref, m1_ref, b1_ref, w2_ref, x2_ref,
                         *, heads, hid):
    H = h_ref[...]
    sc = sc_ref[...]
    est = est_ref[...]
    m1 = m1_ref[...]                                  # [E_pad, HD], B^-1-scaled
    bias = jnp.where(H > 0.0, 0.0, _NEG)

    deg_n = jnp.sum(H, axis=1, keepdims=True)
    dinv = jnp.where(deg_n > 0.0, 1.0 / deg_n, 0.0)

    outs = []
    for h in range(heads):
        alpha = _masked_alpha(h, sc, est, bias)
        outs.append(jnp.dot(alpha, m1[:, h * hid:(h + 1) * hid],
                            preferred_element_type=jnp.float32))
    # heads stay in vregs; single full-width concat (no VMEM scratch round trip)
    o1 = jnp.concatenate(outs, axis=1) * dinv + b1_ref[...]
    # ELU with clamped exp (no overflow in the discarded branch)
    h1 = jnp.where(o1 > 0.0, o1, jnp.exp(jnp.minimum(o1, 0.0)) - 1.0)
    x2_ref[...] = jnp.dot(h1, w2_ref[...], preferred_element_type=jnp.float32)


# ---------------- kernel 4: layer-2 edge aggregation (reduction over nodes) ----
def _edge_agg2_kernel(h_ref, x2_ref, binv_ref, m2_ref):
    i = pl.program_id(0)

    @pl.when(i == 0)
    def _init():
        m2_ref[...] = jnp.zeros_like(m2_ref)

    m2_ref[...] += lax.dot_general(h_ref[...], x2_ref[...],
                                   (((0,), (0,)), ((), ())),
                                   preferred_element_type=jnp.float32)

    @pl.when(i == pl.num_programs(0) - 1)
    def _finalize():
        m2_ref[...] = m2_ref[...] * binv_ref[...]


# ---------------- kernel 5: layer-2 node update + log_softmax ------------------
def _node_update2_kernel(h_ref, m2_ref, b2_ref, out_ref):
    H = h_ref[...]
    deg_n = jnp.sum(H, axis=1, keepdims=True)
    dinv = jnp.where(deg_n > 0.0, 1.0 / deg_n, 0.0)
    # padded class columns carry a -1e30 bias so the lane-padded log_softmax is exact
    o2 = dinv * jnp.dot(H, m2_ref[...], preferred_element_type=jnp.float32) + b2_ref[...]
    row_max = jnp.max(o2, axis=1, keepdims=True)
    z = o2 - row_max
    lse = jnp.log(jnp.sum(jnp.exp(z), axis=1, keepdims=True))
    out_ref[...] = z - lse


def hyper_attention_forward(x, H, w1, att, b1, w2, b2, *, heads, hid,
                            max_node_tile=512):
    N, F = x.shape
    E = H.shape[1]
    C = w2.shape[1]
    HD = heads * hid
    if E > N:
        # pre-2.0 PyG attention indexes node features by hyperedge id
        raise ValueError("attention indexing requires num_hyperedges <= num_nodes")

    f32 = jnp.float32
    E_pad = _round_up(E, 128)                 # lane-dense hyperedge axis
    C_pad = _round_up(C, 128)                 # lane-dense class axis
    tn = _choose_node_tile(N, E_pad, max_tile=max_node_tile)
    N_pad = _round_up(N, tn)
    n_tiles = N_pad // tn

    x_p = jnp.pad(x.astype(f32), ((0, N_pad - N), (0, 0)))
    H_p = jnp.pad(H.astype(f32), ((0, N_pad - N), (0, E_pad - E)))

    # block-diagonal attention projection:
    #   scores[:, h]         = <x1_h, att[h, :hid]>   (node side)
    #   scores[:, heads + h] = <x1_h, att[h, hid:]>   (edge side)
    attp = jnp.zeros((HD, 2 * heads), f32)
    for h in range(heads):
        attp = attp.at[h * hid:(h + 1) * hid, h].set(att[h, :hid])
        attp = attp.at[h * hid:(h + 1) * hid, heads + h].set(att[h, hid:])

    b1r = b1.reshape(1, HD).astype(f32)
    w2p = jnp.pad(w2.astype(f32), ((0, 0), (0, C_pad - C)))
    b2p = jnp.pad(b2.reshape(1, C).astype(f32), ((0, 0), (0, C_pad - C)),
                  constant_values=float(_NEG))

    rows = lambda width: pl.BlockSpec((tn, width), lambda i: (i, 0))
    full = lambda a: pl.BlockSpec(a.shape, lambda i: (0, 0))
    params_par = pltpu.CompilerParams(dimension_semantics=("parallel",),
                                      vmem_limit_bytes=_VMEM_LIMIT)
    params_red = pltpu.CompilerParams(dimension_semantics=("arbitrary",),
                                      vmem_limit_bytes=_VMEM_LIMIT)

    # ---- K1: features + fused attention scores ----
    w1f = w1.astype(f32)
    x1, scores = pl.pallas_call(
        _feature_kernel,
        grid=(n_tiles,),
        in_specs=[rows(F), full(w1f), full(attp)],
        out_specs=(rows(HD), rows(2 * heads)),
        out_shape=(jax.ShapeDtypeStruct((N_pad, HD), f32),
                   jax.ShapeDtypeStruct((N_pad, 2 * heads), f32)),
        compiler_params=params_par,
        cost_estimate=pl.CostEstimate(
            flops=2 * N_pad * F * HD + 2 * N_pad * HD * 2 * heads,
            transcendentals=0,
            bytes_accessed=4 * (N_pad * F + N_pad * (HD + 2 * heads) + F * HD)),
    )(x_p, w1f, attp)

    # edge-side attention scores, transposed to [heads, E_pad] (glue)
    est = jnp.pad(scores[:E, heads:].T, ((0, 0), (0, E_pad - E)))

    # ---- K2: layer-1 edge messages M1 = B^-1 * (alpha^T @ x1), edge degrees ----
    m1, binv = pl.pallas_call(
        functools.partial(_edge_agg1_kernel, heads=heads, hid=hid),
        grid=(n_tiles,),
        in_specs=[rows(E_pad), rows(HD), rows(2 * heads), full(est)],
        out_specs=(pl.BlockSpec((E_pad, HD), lambda i: (0, 0)),
                   pl.BlockSpec((E_pad, 1), lambda i: (0, 0))),
        out_shape=(jax.ShapeDtypeStruct((E_pad, HD), f32),
                   jax.ShapeDtypeStruct((E_pad, 1), f32)),
        compiler_params=params_red,
        cost_estimate=pl.CostEstimate(
            flops=2 * heads * N_pad * E_pad * (hid + 4),
            transcendentals=heads * N_pad * E_pad,
            bytes_accessed=4 * (N_pad * (E_pad + HD + 2 * heads) + E_pad * HD)),
    )(H_p, x1, scores, est)

    # ---- K3: layer-1 node update, ELU, x2 = h1 @ W2 ----
    x2 = pl.pallas_call(
        functools.partial(_node_update1_kernel, heads=heads, hid=hid),
        grid=(n_tiles,),
        in_specs=[rows(E_pad), rows(2 * heads), full(est),
                  pl.BlockSpec((E_pad, HD), lambda i: (0, 0)),
                  full(b1r), full(w2p)],
        out_specs=rows(C_pad),
        out_shape=jax.ShapeDtypeStruct((N_pad, C_pad), f32),
        compiler_params=params_par,
        cost_estimate=pl.CostEstimate(
            flops=2 * heads * N_pad * E_pad * (hid + 4) + 2 * N_pad * HD * C_pad,
            transcendentals=heads * N_pad * E_pad + N_pad * HD,
            bytes_accessed=4 * (N_pad * (E_pad + C_pad + 2 * heads) + E_pad * HD)),
    )(H_p, scores, est, m1, b1r, w2p)

    # ---- K4: layer-2 edge messages M2 = B^-1 * (H^T @ x2) ----
    m2 = pl.pallas_call(
        _edge_agg2_kernel,
        grid=(n_tiles,),
        in_specs=[rows(E_pad), rows(C_pad),
                  pl.BlockSpec((E_pad, 1), lambda i: (0, 0))],
        out_specs=pl.BlockSpec((E_pad, C_pad), lambda i: (0, 0)),
        out_shape=jax.ShapeDtypeStruct((E_pad, C_pad), f32),
        compiler_params=params_red,
        cost_estimate=pl.CostEstimate(
            flops=2 * N_pad * E_pad * C_pad,
            transcendentals=0,
            bytes_accessed=4 * (N_pad * (E_pad + C_pad) + E_pad * C_pad)),
    )(H_p, x2, binv)

    # ---- K5: layer-2 node update + log_softmax ----
    out = pl.pallas_call(
        _node_update2_kernel,
        grid=(n_tiles,),
        in_specs=[rows(E_pad), pl.BlockSpec((E_pad, C_pad), lambda i: (0, 0)),
                  full(b2p)],
        out_specs=rows(C_pad),
        out_shape=jax.ShapeDtypeStruct((N_pad, C_pad), f32),
        compiler_params=params_par,
        cost_estimate=pl.CostEstimate(
            flops=2 * N_pad * E_pad * C_pad,
            transcendentals=N_pad * C_pad,
            bytes_accessed=4 * (N_pad * (E_pad + 2 * C_pad) + E_pad * C_pad)),
    )(H_p, m2, b2p)

    return out[:N, :C]


def reference_forward(x, H, w1, att, b1, w2, b2, *, heads, hid):
    """Pure-JAX reference (same math) for validation."""
    N, E = H.shape
    deg_n = H.sum(1, keepdims=True)
    Dinv = jnp.where(deg_n > 0, 1.0 / deg_n, 0.0)
    deg_e = H.sum(0, keepdims=True).T
    Binv = jnp.where(deg_e > 0, 1.0 / deg_e, 0.0)
    mask = H > 0
    x1 = x @ w1
    outs = []
    for h in range(heads):
        x1h = x1[:, h * hid:(h + 1) * hid]
        a_n = (x1h * att[h:h + 1, :hid]).sum(1, keepdims=True)
        a_e = (x1h[:E] * att[h:h + 1, hid:]).sum(1, keepdims=True).T
        logits = jax.nn.leaky_relu(a_n + a_e, 0.2)
        lm = jnp.where(mask, logits, -1e30)
        p = jnp.where(mask, jnp.exp(logits - lm.max(1, keepdims=True)), 0.0)
        s = p.sum(1, keepdims=True)
        alpha = p / jnp.where(s > 0, s, 1.0)
        m = Binv * (alpha.T @ x1h)
        outs.append(Dinv * (alpha @ m))
    h1 = jax.nn.elu(jnp.concatenate(outs, axis=1) + b1)
    x2 = h1 @ w2
    o2 = Dinv * (H @ (Binv * (H.T @ x2))) + b2
    return jax.nn.log_softmax(o2, axis=1)


if __name__ == "__main__":
    # Small shapes consistent with the module: N nodes, F input features,
    # E hyperedges (E <= N, required by the original attention indexing),
    # heads=4, hidden=8 per head, C=7 output classes (Cora-like).
    N, F, E, HEADS, HID, C = 16, 32, 8, 4, 8, 7

    key = jax.random.PRNGKey(0)
    k_x, k_w1, k_att, k_b1, k_w2, k_b2 = jax.random.split(key, 6)

    x = jax.random.normal(k_x, (N, F), jnp.float32)

    # deterministic incidence: node i belongs to hyperedges {i % E, (i // 2) % E}
    node_ids = jnp.arange(N)
    H = jnp.zeros((N, E), jnp.float32)
    H = H.at[node_ids, node_ids % E].set(1.0)
    H = H.at[node_ids, (node_ids // 2) % E].set(1.0)

    def glorot(k, shape):
        fan_in, fan_out = shape[0], shape[-1]
        scale = jnp.sqrt(2.0 / (fan_in + fan_out))
        return scale * jax.random.normal(k, shape, jnp.float32)

    w1 = glorot(k_w1, (F, HEADS * HID))            # hconv1 weight
    att = glorot(k_att, (HEADS, 2 * HID))          # hconv1 attention params
    b1 = 0.1 * jax.random.normal(k_b1, (HEADS * HID,), jnp.float32)
    w2 = glorot(k_w2, (HEADS * HID, C))            # hconv2 weight
    b2 = 0.1 * jax.random.normal(k_b2, (C,), jnp.float32)

    fwd = jax.jit(functools.partial(hyper_attention_forward, heads=HEADS, hid=HID))
    out = jax.block_until_ready(fwd(x, H, w1, att, b1, w2, b2))

    ref = reference_forward(x, H, w1, att, b1, w2, b2, heads=HEADS, hid=HID)
    assert out.shape == (N, C)
    assert bool(jnp.all(jnp.isfinite(out)))
    assert jnp.allclose(out, ref, rtol=1e-3, atol=1e-3), \
        float(jnp.max(jnp.abs(out - ref)))

    print("KERNEL_OK")
</pallas_src>

<mosaic_0001>
module attributes {stable_mosaic.version = 11 : i64} {
  func.func @_feature_kernel(%arg0: i32, %arg1: memref<16x32xf32, #tpu.memory_space<vmem>>, %arg2: memref<32x32xf32, #tpu.memory_space<vmem>>, %arg3: memref<32x8xf32, #tpu.memory_space<vmem>>, %arg4: memref<16x32xf32, #tpu.memory_space<vmem>>, %arg5: memref<16x8xf32, #tpu.memory_space<vmem>>) attributes {dimension_semantics = [#tpu.dimension_semantics<parallel>], iteration_bounds = array<i64: 1>, scalar_prefetch = 0 : i64, scratch_operands = 0 : i64, tpu.core_type = #tpu.core_type<tc>, window_params = [{transform_indices = @transform_0, window_bounds = array<i64: 16, 32>}, {pipeline_mode = #tpu.pipeline_mode<synchronous>, transform_indices = @transform_1, window_bounds = array<i64: 32, 32>}, {pipeline_mode = #tpu.pipeline_mode<synchronous>, transform_indices = @transform_2, window_bounds = array<i64: 32, 8>}, {transform_indices = @transform_3, window_bounds = array<i64: 16, 32>}, {transform_indices = @transform_4, window_bounds = array<i64: 16, 8>}]} {
    %c0 = arith.constant 0 : index
    %c0_0 = arith.constant 0 : index
    %0 = vector.load %arg1[%c0, %c0_0] : memref<16x32xf32, #tpu.memory_space<vmem>>, vector<16x32xf32>
    %c0_1 = arith.constant 0 : index
    %c0_2 = arith.constant 0 : index
    %1 = vector.load %arg2[%c0_1, %c0_2] : memref<32x32xf32, #tpu.memory_space<vmem>>, vector<32x32xf32>
    %cst = arith.constant dense<0.000000e+00> : vector<16x32xf32>
    %2 = tpu.matmul %0, %1, %cst {dimension_numbers = #tpu.dot_dimension_numbers<[1], [0], [0], [1], [0, 0, 1, 1], [], []>} : vector<16x32xf32>, vector<32x32xf32>, vector<16x32xf32> -> vector<16x32xf32>
    %c0_3 = arith.constant 0 : index
    %c0_4 = arith.constant 0 : index
    %3 = vector.load %arg4[%c0_3, %c0_4] : memref<16x32xf32, #tpu.memory_space<vmem>>, vector<16x32xf32>
    tpu.vector_store %arg4[%c0_3, %c0_4], %2 {strides = array<i32>} : memref<16x32xf32, #tpu.memory_space<vmem>>, vector<16x32xf32>,
    %c0_5 = arith.constant 0 : index
    %c0_6 = arith.constant 0 : index
    %4 = vector.load %arg3[%c0_5, %c0_6] : memref<32x8xf32, #tpu.memory_space<vmem>>, vector<32x8xf32>
    %cst_7 = arith.constant dense<0.000000e+00> : vector<16x8xf32>
    %5 = tpu.matmul %2, %4, %cst_7 {dimension_numbers = #tpu.dot_dimension_numbers<[1], [0], [0], [1], [0, 0, 1, 1], [], []>} : vector<16x32xf32>, vector<32x8xf32>, vector<16x8xf32> -> vector<16x8xf32>
    %c0_8 = arith.constant 0 : index
    %c0_9 = arith.constant 0 : index
    %6 = vector.load %arg5[%c0_8, %c0_9] : memref<16x8xf32, #tpu.memory_space<vmem>>, vector<16x8xf32>
    tpu.vector_store %arg5[%c0_8, %c0_9], %5 {strides = array<i32>} : memref<16x8xf32, #tpu.memory_space<vmem>>, vector<16x8xf32>,
    return
  }
  func.func @transform_0(%arg0: i32) -> (i32, i32) {
    %c0_i32 = arith.constant 0 : i32
    %c0_i32_0 = arith.constant 0 : i32
    return %arg0, %c0_i32 : i32, i32
  }
  func.func @transform_1(%arg0: i32) -> (i32, i32) {
    %c0_i32 = arith.constant 0 : i32
    %c0_i32_0 = arith.constant 0 : i32
    %c0_i32_1 = arith.constant 0 : i32
    return %c0_i32, %c0_i32_0 : i32, i32
  }
  func.func @transform_2(%arg0: i32) -> (i32, i32) {
    %c0_i32 = arith.constant 0 : i32
    %c0_i32_0 = arith.constant 0 : i32
    %c0_i32_1 = arith.constant 0 : i32
    return %c0_i32, %c0_i32_0 : i32, i32
  }
  func.func @transform_3(%arg0: i32) -> (i32, i32) {
    %c0_i32 = arith.constant 0 : i32
    %c0_i32_0 = arith.constant 0 : i32
    return %arg0, %c0_i32 : i32, i32
  }
  func.func @transform_4(%arg0: i32) -> (i32, i32) {
    %c0_i32 = arith.constant 0 : i32
    %c0_i32_0 = arith.constant 0 : i32
    return %arg0, %c0_i32 : i32, i32
  }
}

module attributes {stable_mosaic.version = 11 : i64} {
  func.func @_edge_agg2_kernel(%arg0: i32, %arg1: memref<16x128xf32, #tpu.memory_space<vmem>>, %arg2: memref<16x128xf32, #tpu.memory_space<vmem>>, %arg3: memref<128x1xf32, #tpu.memory_space<vmem>>, %arg4: memref<128x128xf32, #tpu.memory_space<vmem>>) attributes {dimension_semantics = [#tpu.dimension_semantics<arbitrary>], iteration_bounds = array<i64: 1>, scalar_prefetch = 0 : i64, scratch_operands = 0 : i64, tpu.core_type = #tpu.core_type<tc>, window_params = [{transform_indices = @transform_0, window_bounds = array<i64: 16, 128>}, {transform_indices = @transform_1, window_bounds = array<i64: 16, 128>}, {pipeline_mode = #tpu.pipeline_mode<synchronous>, transform_indices = @transform_2, window_bounds = array<i64: 128, 1>}, {pipeline_mode = #tpu.pipeline_mode<synchronous>, transform_indices = @transform_3, window_bounds = array<i64: 128, 128>}]} {
    %c0_i32 = arith.constant 0 : i32
    %0 = arith.cmpi eq, %arg0, %c0_i32 : i32
    %1 = arith.extui %0 : i1 to i32
    %c0_i32_0 = arith.constant 0 : i32
    %2 = arith.cmpi ne, %1, %c0_i32_0 : i32
    scf.if %2 {
      %cst_10 = arith.constant 0.000000e+00 : f32
      %12 = vector.broadcast %cst_10 : f32 to vector<128x128xf32>
      %c0_11 = arith.constant 0 : index
      %c0_12 = arith.constant 0 : index
      %13 = vector.load %arg4[%c0_11, %c0_12] : memref<128x128xf32, #tpu.memory_space<vmem>>, vector<128x128xf32>
      tpu.vector_store %arg4[%c0_11, %c0_12], %12 {strides = array<i32>} : memref<128x128xf32, #tpu.memory_space<vmem>>, vector<128x128xf32>,
    } else {
    }
    %c0 = arith.constant 0 : index
    %c0_1 = arith.constant 0 : index
    %3 = vector.load %arg4[%c0, %c0_1] : memref<128x128xf32, #tpu.memory_space<vmem>>, vector<128x128xf32>
    %c0_2 = arith.constant 0 : index
    %c0_3 = arith.constant 0 : index
    %4 = vector.load %arg1[%c0_2, %c0_3] : memref<16x128xf32, #tpu.memory_space<vmem>>, vector<16x128xf32>
    %c0_4 = arith.constant 0 : index
    %c0_5 = arith.constant 0 : index
    %5 = vector.load %arg2[%c0_4, %c0_5] : memref<16x128xf32, #tpu.memory_space<vmem>>, vector<16x128xf32>
    %cst = arith.constant dense<0.000000e+00> : vector<128x128xf32>
    %6 = tpu.matmul %4, %5, %cst {dimension_numbers = #tpu.dot_dimension_numbers<[0], [0], [1], [1], [0, 1, 1, 1], [], []>} : vector<16x128xf32>, vector<16x128xf32>, vector<128x128xf32> -> vector<128x128xf32>
    %7 = arith.addf %3, %6 : vector<128x128xf32>
    %c0_6 = arith.constant 0 : index
    %c0_7 = arith.constant 0 : index
    %8 = vector.load %arg4[%c0_6, %c0_7] : memref<128x128xf32, #tpu.memory_space<vmem>>, vector<128x128xf32>
    tpu.vector_store %arg4[%c0_6, %c0_7], %7 {strides = array<i32>} : memref<128x128xf32, #tpu.memory_space<vmem>>, vector<128x128xf32>,
    %c0_i32_8 = arith.constant 0 : i32
    %9 = arith.cmpi eq, %arg0, %c0_i32_8 : i32
    %10 = arith.extui %9 : i1 to i32
    %c0_i32_9 = arith.constant 0 : i32
    %11 = arith.cmpi ne, %10, %c0_i32_9 : i32
    scf.if %11 {
      %c0_10 = arith.constant 0 : index
      %c0_11 = arith.constant 0 : index
      %12 = vector.load %arg4[%c0_10, %c0_11] : memref<128x128xf32, #tpu.memory_space<vmem>>, vector<128x128xf32>
      %c0_12 = arith.constant 0 : index
      %c0_13 = arith.constant 0 : index
      %13 = vector.load %arg3[%c0_12, %c0_13] : memref<128x1xf32, #tpu.memory_space<vmem>>, vector<128x1xf32>
      %14 = vector.broadcast %13 : vector<128x1xf32> to vector<128x128xf32>
      %15 = arith.mulf %12, %14 : vector<128x128xf32>
      %c0_14 = arith.constant 0 : index
      %c0_15 = arith.constant 0 : index
      %16 = vector.load %arg4[%c0_14, %c0_15] : memref<128x128xf32, #tpu.memory_space<vmem>>, vector<128x128xf32>
      tpu.vector_store %arg4[%c0_14, %c0_15], %15 {strides = array<i32>} : memref<128x128xf32, #tpu.memory_space<vmem>>, vector<128x128xf32>,
    } else {
    }
    return
  }
  func.func @transform_0(%arg0: i32) -> (i32, i32) {
    %c0_i32 = arith.constant 0 : i32
    %c0_i32_0 = arith.constant 0 : i32
    return %arg0, %c0_i32 : i32, i32
  }
  func.func @transform_1(%arg0: i32) -> (i32, i32) {
    %c0_i32 = arith.constant 0 : i32
    %c0_i32_0 = arith.constant 0 : i32
    return %arg0, %c0_i32 : i32, i32
  }
  func.func @transform_2(%arg0: i32) -> (i32, i32) {
    %c0_i32 = arith.constant 0 : i32
    %c0_i32_0 = arith.constant 0 : i32
    %c0_i32_1 = arith.constant 0 : i32
    return %c0_i32, %c0_i32_0 : i32, i32
  }
  func.func @transform_3(%arg0: i32) -> (i32, i32) {
    %c0_i32 = arith.constant 0 : i32
    %c0_i32_0 = arith.constant 0 : i32
    %c0_i32_1 = arith.constant 0 : i32
    return %c0_i32, %c0_i32_0 : i32, i32
  }
}

module attributes {stable_mosaic.version = 11 : i64} {
  func.func @_edge_agg1_kernel(%arg0: i32, %arg1: memref<16x128xf32, #tpu.memory_space<vmem>>, %arg2: memref<16x32xf32, #tpu.memory_space<vmem>>, %arg3: memref<16x8xf32, #tpu.memory_space<vmem>>, %arg4: memref<4x128xf32, #tpu.memory_space<vmem>>, %arg5: memref<128x32xf32, #tpu.memory_space<vmem>>, %arg6: memref<128x1xf32, #tpu.memory_space<vmem>>) attributes {dimension_semantics = [#tpu.dimension_semantics<arbitrary>], iteration_bounds = array<i64: 1>, scalar_prefetch = 0 : i64, scratch_operands = 0 : i64, tpu.core_type = #tpu.core_type<tc>, window_params = [{transform_indices = @transform_0, window_bounds = array<i64: 16, 128>}, {transform_indices = @transform_1, window_bounds = array<i64: 16, 32>}, {transform_indices = @transform_2, window_bounds = array<i64: 16, 8>}, {pipeline_mode = #tpu.pipeline_mode<synchronous>, transform_indices = @transform_3, window_bounds = array<i64: 4, 128>}, {pipeline_mode = #tpu.pipeline_mode<synchronous>, transform_indices = @transform_4, window_bounds = array<i64: 128, 32>}, {pipeline_mode = #tpu.pipeline_mode<synchronous>, transform_indices = @transform_5, window_bounds = array<i64: 128, 1>}]} {
    %c0_i32 = arith.constant 0 : i32
    %0 = arith.cmpi eq, %arg0, %c0_i32 : i32
    %1 = arith.extui %0 : i1 to i32
    %c0_i32_0 = arith.constant 0 : i32
    %2 = arith.cmpi ne, %1, %c0_i32_0 : i32
    scf.if %2 {
      %cst_54 = arith.constant 0.000000e+00 : f32
      %148 = vector.broadcast %cst_54 : f32 to vector<128x32xf32>
      %c0_55 = arith.constant 0 : index
      %c0_56 = arith.constant 0 : index
      %149 = vector.load %arg5[%c0_55, %c0_56] : memref<128x32xf32, #tpu.memory_space<vmem>>, vector<128x32xf32>
      tpu.vector_store %arg5[%c0_55, %c0_56], %148 {strides = array<i32>} : memref<128x32xf32, #tpu.memory_space<vmem>>, vector<128x32xf32>,
      %cst_57 = arith.constant 0.000000e+00 : f32
      %150 = vector.broadcast %cst_57 : f32 to vector<128x1xf32>
      %c0_58 = arith.constant 0 : index
      %c0_59 = arith.constant 0 : index
      %151 = vector.load %arg6[%c0_58, %c0_59] : memref<128x1xf32, #tpu.memory_space<vmem>>, vector<128x1xf32>
      tpu.vector_store %arg6[%c0_58, %c0_59], %150 {strides = array<i32>} : memref<128x1xf32, #tpu.memory_space<vmem>>, vector<128x1xf32>,
    } else {
    }
    %c0 = arith.constant 0 : index
    %c0_1 = arith.constant 0 : index
    %3 = vector.load %arg1[%c0, %c0_1] : memref<16x128xf32, #tpu.memory_space<vmem>>, vector<16x128xf32>
    %c0_2 = arith.constant 0 : index
    %c0_3 = arith.constant 0 : index
    %4 = vector.load %arg2[%c0_2, %c0_3] : memref<16x32xf32, #tpu.memory_space<vmem>>, vector<16x32xf32>
    %c0_4 = arith.constant 0 : index
    %c0_5 = arith.constant 0 : index
    %5 = vector.load %arg3[%c0_4, %c0_5] : memref<16x8xf32, #tpu.memory_space<vmem>>, vector<16x8xf32>
    %c0_6 = arith.constant 0 : index
    %c0_7 = arith.constant 0 : index
    %6 = vector.load %arg4[%c0_6, %c0_7] : memref<4x128xf32, #tpu.memory_space<vmem>>, vector<4x128xf32>
    %cst = arith.constant 0.000000e+00 : f32
    %7 = vector.broadcast %cst : f32 to vector<16x128xf32>
    %8 = arith.cmpf ogt, %3, %7 : vector<16x128xf32>
    %cst_8 = arith.constant 0.000000e+00 : f32
    %cst_9 = arith.constant -1.000000e+30 : f32
    %9 = vector.broadcast %cst_8 : f32 to vector<16x128xf32>
    %10 = vector.broadcast %cst_9 : f32 to vector<16x128xf32>
    %11 = arith.select %8, %9, %10 : vector<16x128xi1>, vector<16x128xf32>
    %cst_10 = arith.constant 1.000000e+00 : f32
    %12 = vector.broadcast %cst_10 : f32 to vector<16x1xf32>
    %c0_11 = arith.constant 0 : index
    %c0_12 = arith.constant 0 : index
    %13 = vector.load %arg6[%c0_11, %c0_12] : memref<128x1xf32, #tpu.memory_space<vmem>>, vector<128x1xf32>
    %cst_13 = arith.constant dense<0.000000e+00> : vector<128x1xf32>
    %14 = tpu.matmul %3, %12, %cst_13 {dimension_numbers = #tpu.dot_dimension_numbers<[0], [0], [1], [1], [0, 1, 1, 1], [], []>} : vector<16x128xf32>, vector<16x1xf32>, vector<128x1xf32> -> vector<128x1xf32>
    %15 = arith.addf %13, %14 : vector<128x1xf32>
    %c0_14 = arith.constant 0 : index
    %c0_15 = arith.constant 0 : index
    %16 = vector.load %arg6[%c0_14, %c0_15] : memref<128x1xf32, #tpu.memory_space<vmem>>, vector<128x1xf32>
    tpu.vector_store %arg6[%c0_14, %c0_15], %15 {strides = array<i32>} : memref<128x1xf32, #tpu.memory_space<vmem>>, vector<128x1xf32>,
    %17 = vector.extract_strided_slice %5 {offsets = [0, 0], sizes = [16, 1], strides = [1, 1]} : vector<16x8xf32> to vector<16x1xf32>
    %18 = vector.extract_strided_slice %6 {offsets = [0, 0], sizes = [1, 128], strides = [1, 1]} : vector<4x128xf32> to vector<1x128xf32>
    %19 = vector.broadcast %17 : vector<16x1xf32> to vector<16x128xf32>
    %20 = vector.broadcast %18 : vector<1x128xf32> to vector<16x128xf32>
    %21 = arith.addf %19, %20 : vector<16x128xf32>
    %cst_16 = arith.constant 0.000000e+00 : f32
    %22 = vector.broadcast %cst_16 : f32 to vector<16x128xf32>
    %23 = arith.cmpf ogt, %21, %22 : vector<16x128xf32>
    %cst_17 = arith.constant 2.000000e-01 : f32
    %24 = vector.broadcast %cst_17 : f32 to vector<16x128xf32>
    %25 = arith.mulf %24, %21 : vector<16x128xf32>
    %26 = arith.select %23, %21, %25 : vector<16x128xi1>, vector<16x128xf32>
    %27 = arith.addf %26, %11 : vector<16x128xf32>
    %cst_18 = arith.constant dense<0xFF800000> : vector<16xf32>
    %28 = vector.multi_reduction <maximumf>, %27, %cst_18 [1] : vector<16x128xf32> to vector<16xf32>
    %29 = vector.shape_cast %28 : vector<16xf32> to vector<16x1xf32>
    %30 = vector.broadcast %29 : vector<16x1xf32> to vector<16x128xf32>
    %31 = arith.subf %27, %30 : vector<16x128xf32>
    %32 = math.exp %31 : vector<16x128xf32>
    %cst_19 = arith.constant dense<0.000000e+00> : vector<16xf32>
    %33 = vector.multi_reduction <add>, %32, %cst_19 [1] : vector<16x128xf32> to vector<16xf32>
    %34 = vector.shape_cast %33 : vector<16xf32> to vector<16x1xf32>
    %35 = tpu.reciprocal %34 {approx = true} : vector<16x1xf32> -> vector<16x1xf32>
    %36 = arith.mulf %34, %35 : vector<16x1xf32>
    %cst_20 = arith.constant 2.000000e+00 : f32
    %37 = vector.broadcast %cst_20 : f32 to vector<16x1xf32>
    %38 = arith.subf %37, %36 : vector<16x1xf32>
    %39 = arith.mulf %35, %38 : vector<16x1xf32>
    %cst_21 = arith.constant -5.000000e+29 : f32
    %40 = vector.broadcast %cst_21 : f32 to vector<16x1xf32>
    %41 = arith.cmpf ogt, %29, %40 : vector<16x1xf32>
    %cst_22 = arith.constant 0.000000e+00 : f32
    %42 = vector.broadcast %cst_22 : f32 to vector<16x1xf32>
    %43 = arith.select %41, %39, %42 : vector<16x1xi1>, vector<16x1xf32>
    %44 = vector.broadcast %43 : vector<16x1xf32> to vector<16x128xf32>
    %45 = arith.mulf %32, %44 : vector<16x128xf32>
    %46 = vector.extract_strided_slice %4 {offsets = [0, 0], sizes = [16, 8], strides = [1, 1]} : vector<16x32xf32> to vector<16x8xf32>
    %cst_23 = arith.constant dense<0.000000e+00> : vector<128x8xf32>
    %47 = tpu.matmul %45, %46, %cst_23 {dimension_numbers = #tpu.dot_dimension_numbers<[0], [0], [1], [1], [0, 1, 1, 1], [], []>} : vector<16x128xf32>, vector<16x8xf32>, vector<128x8xf32> -> vector<128x8xf32>
    %48 = vector.extract_strided_slice %5 {offsets = [0, 1], sizes = [16, 1], strides = [1, 1]} : vector<16x8xf32> to vector<16x1xf32>
    %49 = vector.extract_strided_slice %6 {offsets = [1, 0], sizes = [1, 128], strides = [1, 1]} : vector<4x128xf32> to vector<1x128xf32>
    %50 = vector.broadcast %48 : vector<16x1xf32> to vector<16x128xf32>
    %51 = vector.broadcast %49 : vector<1x128xf32> to vector<16x128xf32>
    %52 = arith.addf %50, %51 : vector<16x128xf32>
    %cst_24 = arith.constant 0.000000e+00 : f32
    %53 = vector.broadcast %cst_24 : f32 to vector<16x128xf32>
    %54 = arith.cmpf ogt, %52, %53 : vector<16x128xf32>
    %cst_25 = arith.constant 2.000000e-01 : f32
    %55 = vector.broadcast %cst_25 : f32 to vector<16x128xf32>
    %56 = arith.mulf %55, %52 : vector<16x128xf32>
    %57 = arith.select %54, %52, %56 : vector<16x128xi1>, vector<16x128xf32>
    %58 = arith.addf %57, %11 : vector<16x128xf32>
    %cst_26 = arith.constant dense<0xFF800000> : vector<16xf32>
    %59 = vector.multi_reduction <maximumf>, %58, %cst_26 [1] : vector<16x128xf32> to vector<16xf32>
    %60 = vector.shape_cast %59 : vector<16xf32> to vector<16x1xf32>
    %61 = vector.broadcast %60 : vector<16x1xf32> to vector<16x128xf32>
    %62 = arith.subf %58, %61 : vector<16x128xf32>
    %63 = math.exp %62 : vector<16x128xf32>
    %cst_27 = arith.constant dense<0.000000e+00> : vector<16xf32>
    %64 = vector.multi_reduction <add>, %63, %cst_27 [1] : vector<16x128xf32> to vector<16xf32>
    %65 = vector.shape_cast %64 : vector<16xf32> to vector<16x1xf32>
    %66 = tpu.reciprocal %65 {approx = true} : vector<16x1xf32> -> vector<16x1xf32>
    %67 = arith.mulf %65, %66 : vector<16x1xf32>
    %cst_28 = arith.constant 2.000000e+00 : f32
    %68 = vector.broadcast %cst_28 : f32 to vector<16x1xf32>
    %69 = arith.subf %68, %67 : vector<16x1xf32>
    %70 = arith.mulf %66, %69 : vector<16x1xf32>
    %cst_29 = arith.constant -5.000000e+29 : f32
    %71 = vector.broadcast %cst_29 : f32 to vector<16x1xf32>
    %72 = arith.cmpf ogt, %60, %71 : vector<16x1xf32>
    %cst_30 = arith.constant 0.000000e+00 : f32
    %73 = vector.broadcast %cst_30 : f32 to vector<16x1xf32>
    %74 = arith.select %72, %70, %73 : vector<16x1xi1>, vector<16x1xf32>
    %75 = vector.broadcast %74 : vector<16x1xf32> to vector<16x128xf32>
    %76 = arith.mulf %63, %75 : vector<16x128xf32>
    %77 = vector.extract_strided_slice %4 {offsets = [0, 8], sizes = [16, 8], strides = [1, 1]} : vector<16x32xf32> to vector<16x8xf32>
    %cst_31 = arith.constant dense<0.000000e+00> : vector<128x8xf32>
    %78 = tpu.matmul %76, %77, %cst_31 {dimension_numbers = #tpu.dot_dimension_numbers<[0], [0], [1], [1], [0, 1, 1, 1], [], []>} : vector<16x128xf32>, vector<16x8xf32>, vector<128x8xf32> -> vector<128x8xf32>
    %79 = vector.extract_strided_slice %5 {offsets = [0, 2], sizes = [16, 1], strides = [1, 1]} : vector<16x8xf32> to vector<16x1xf32>
    %80 = vector.extract_strided_slice %6 {offsets = [2, 0], sizes = [1, 128], strides = [1, 1]} : vector<4x128xf32> to vector<1x128xf32>
    %81 = vector.broadcast %79 : vector<16x1xf32> to vector<16x128xf32>
    %82 = vector.broadcast %80 : vector<1x128xf32> to vector<16x128xf32>
    %83 = arith.addf %81, %82 : vector<16x128xf32>
    %cst_32 = arith.constant 0.000000e+00 : f32
    %84 = vector.broadcast %cst_32 : f32 to vector<16x128xf32>
    %85 = arith.cmpf ogt, %83, %84 : vector<16x128xf32>
    %cst_33 = arith.constant 2.000000e-01 : f32
    %86 = vector.broadcast %cst_33 : f32 to vector<16x128xf32>
    %87 = arith.mulf %86, %83 : vector<16x128xf32>
    %88 = arith.select %85, %83, %87 : vector<16x128xi1>, vector<16x128xf32>
    %89 = arith.addf %88, %11 : vector<16x128xf32>
    %cst_34 = arith.constant dense<0xFF800000> : vector<16xf32>
    %90 = vector.multi_reduction <maximumf>, %89, %cst_34 [1] : vector<16x128xf32> to vector<16xf32>
    %91 = vector.shape_cast %90 : vector<16xf32> to vector<16x1xf32>
    %92 = vector.broadcast %91 : vector<16x1xf32> to vector<16x128xf32>
    %93 = arith.subf %89, %92 : vector<16x128xf32>
    %94 = math.exp %93 : vector<16x128xf32>
    %cst_35 = arith.constant dense<0.000000e+00> : vector<16xf32>
    %95 = vector.multi_reduction <add>, %94, %cst_35 [1] : vector<16x128xf32> to vector<16xf32>
    %96 = vector.shape_cast %95 : vector<16xf32> to vector<16x1xf32>
    %97 = tpu.reciprocal %96 {approx = true} : vector<16x1xf32> -> vector<16x1xf32>
    %98 = arith.mulf %96, %97 : vector<16x1xf32>
    %cst_36 = arith.constant 2.000000e+00 : f32
    %99 = vector.broadcast %cst_36 : f32 to vector<16x1xf32>
    %100 = arith.subf %99, %98 : vector<16x1xf32>
    %101 = arith.mulf %97, %100 : vector<16x1xf32>
    %cst_37 = arith.constant -5.000000e+29 : f32
    %102 = vector.broadcast %cst_37 : f32 to vector<16x1xf32>
    %103 = arith.cmpf ogt, %91, %102 : vector<16x1xf32>
    %cst_38 = arith.constant 0.000000e+00 : f32
    %104 = vector.broadcast %cst_38 : f32 to vector<16x1xf32>
    %105 = arith.select %103, %101, %104 : vector<16x1xi1>, vector<16x1xf32>
    %106 = vector.broadcast %105 : vector<16x1xf32> to vector<16x128xf32>
    %107 = arith.mulf %94, %106 : vector<16x128xf32>
    %108 = vector.extract_strided_slice %4 {offsets = [0, 16], sizes = [16, 8], strides = [1, 1]} : vector<16x32xf32> to vector<16x8xf32>
    %cst_39 = arith.constant dense<0.000000e+00> : vector<128x8xf32>
    %109 = tpu.matmul %107, %108, %cst_39 {dimension_numbers = #tpu.dot_dimension_numbers<[0], [0], [1], [1], [0, 1, 1, 1], [], []>} : vector<16x128xf32>, vector<16x8xf32>, vector<128x8xf32> -> vector<128x8xf32>
    %110 = vector.extract_strided_slice %5 {offsets = [0, 3], sizes = [16, 1], strides = [1, 1]} : vector<16x8xf32> to vector<16x1xf32>
    %111 = vector.extract_strided_slice %6 {offsets = [3, 0], sizes = [1, 128], strides = [1, 1]} : vector<4x128xf32> to vector<1x128xf32>
    %112 = vector.broadcast %110 : vector<16x1xf32> to vector<16x128xf32>
    %113 = vector.broadcast %111 : vector<1x128xf32> to vector<16x128xf32>
    %114 = arith.addf %112, %113 : vector<16x128xf32>
    %cst_40 = arith.constant 0.000000e+00 : f32
    %115 = vector.broadcast %cst_40 : f32 to vector<16x128xf32>
    %116 = arith.cmpf ogt, %114, %115 : vector<16x128xf32>
    %cst_41 = arith.constant 2.000000e-01 : f32
    %117 = vector.broadcast %cst_41 : f32 to vector<16x128xf32>
    %118 = arith.mulf %117, %114 : vector<16x128xf32>
    %119 = arith.select %116, %114, %118 : vector<16x128xi1>, vector<16x128xf32>
    %120 = arith.addf %119, %11 : vector<16x128xf32>
    %cst_42 = arith.constant dense<0xFF800000> : vector<16xf32>
    %121 = vector.multi_reduction <maximumf>, %120, %cst_42 [1] : vector<16x128xf32> to vector<16xf32>
    %122 = vector.shape_cast %121 : vector<16xf32> to vector<16x1xf32>
    %123 = vector.broadcast %122 : vector<16x1xf32> to vector<16x128xf32>
    %124 = arith.subf %120, %123 : vector<16x128xf32>
    %125 = math.exp %124 : vector<16x128xf32>
    %cst_43 = arith.constant dense<0.000000e+00> : vector<16xf32>
    %126 = vector.multi_reduction <add>, %125, %cst_43 [1] : vector<16x128xf32> to vector<16xf32>
    %127 = vector.shape_cast %126 : vector<16xf32> to vector<16x1xf32>
    %128 = tpu.reciprocal %127 {approx = true} : vector<16x1xf32> -> vector<16x1xf32>
    %129 = arith.mulf %127, %128 : vector<16x1xf32>
    %cst_44 = arith.constant 2.000000e+00 : f32
    %130 = vector.broadcast %cst_44 : f32 to vector<16x1xf32>
    %131 = arith.subf %130, %129 : vector<16x1xf32>
    %132 = arith.mulf %128, %131 : vector<16x1xf32>
    %cst_45 = arith.constant -5.000000e+29 : f32
    %133 = vector.broadcast %cst_45 : f32 to vector<16x1xf32>
    %134 = arith.cmpf ogt, %122, %133 : vector<16x1xf32>
    %cst_46 = arith.constant 0.000000e+00 : f32
    %135 = vector.broadcast %cst_46 : f32 to vector<16x1xf32>
    %136 = arith.select %134, %132, %135 : vector<16x1xi1>, vector<16x1xf32>
    %137 = vector.broadcast %136 : vector<16x1xf32> to vector<16x128xf32>
    %138 = arith.mulf %125, %137 : vector<16x128xf32>
    %139 = vector.extract_strided_slice %4 {offsets = [0, 24], sizes = [16, 8], strides = [1, 1]} : vector<16x32xf32> to vector<16x8xf32>
    %cst_47 = arith.constant dense<0.000000e+00> : vector<128x8xf32>
    %140 = tpu.matmul %138, %139, %cst_47 {dimension_numbers = #tpu.dot_dimension_numbers<[0], [0], [1], [1], [0, 1, 1, 1], [], []>} : vector<16x128xf32>, vector<16x8xf32>, vector<128x8xf32> -> vector<128x8xf32>
    %c0_48 = arith.constant 0 : index
    %c0_49 = arith.constant 0 : index
    %141 = vector.load %arg5[%c0_48, %c0_49] : memref<128x32xf32, #tpu.memory_space<vmem>>, vector<128x32xf32>
    %142 = tpu.concatenate %47, %78, %109, %140 in 1 : vector<128x8xf32>, vector<128x8xf32>, vector<128x8xf32>, vector<128x8xf32> -> vector<128x32xf32>
    %143 = arith.addf %141, %142 : vector<128x32xf32>
    %c0_50 = arith.constant 0 : index
    %c0_51 = arith.constant 0 : index
    %144 = vector.load %arg5[%c0_50, %c0_51] : memref<128x32xf32, #tpu.memory_space<vmem>>, vector<128x32xf32>
    tpu.vector_store %arg5[%c0_50, %c0_51], %143 {strides = array<i32>} : memref<128x32xf32, #tpu.memory_space<vmem>>, vector<128x32xf32>,
    %c0_i32_52 = arith.constant 0 : i32
    %145 = arith.cmpi eq, %arg0, %c0_i32_52 : i32
    %146 = arith.extui %145 : i1 to i32
    %c0_i32_53 = arith.constant 0 : i32
    %147 = arith.cmpi ne, %146, %c0_i32_53 : i32
    scf.if %147 {
      %c0_54 = arith.constant 0 : index
      %c0_55 = arith.constant 0 : index
      %148 = vector.load %arg6[%c0_54, %c0_55] : memref<128x1xf32, #tpu.memory_space<vmem>>, vector<128x1xf32>
      %cst_56 = arith.constant 0.000000e+00 : f32
      %149 = vector.broadcast %cst_56 : f32 to vector<128x1xf32>
      %150 = arith.cmpf ogt, %148, %149 : vector<128x1xf32>
      %cst_57 = arith.constant 1.000000e+00 : f32
      %151 = vector.broadcast %cst_57 : f32 to vector<128x1xf32>
      %152 = arith.divf %151, %148 : vector<128x1xf32>
      %cst_58 = arith.constant 0.000000e+00 : f32
      %153 = vector.broadcast %cst_58 : f32 to vector<128x1xf32>
      %154 = arith.select %150, %152, %153 : vector<128x1xi1>, vector<128x1xf32>
      %c0_59 = arith.constant 0 : index
      %c0_60 = arith.constant 0 : index
      %155 = vector.load %arg6[%c0_59, %c0_60] : memref<128x1xf32, #tpu.memory_space<vmem>>, vector<128x1xf32>
      tpu.vector_store %arg6[%c0_59, %c0_60], %154 {strides = array<i32>} : memref<128x1xf32, #tpu.memory_space<vmem>>, vector<128x1xf32>,
      %c0_61 = arith.constant 0 : index
      %c0_62 = arith.constant 0 : index
      %156 = vector.load %arg5[%c0_61, %c0_62] : memref<128x32xf32, #tpu.memory_space<vmem>>, vector<128x32xf32>
      %157 = vector.broadcast %154 : vector<128x1xf32> to vector<128x32xf32>
      %158 = arith.mulf %156, %157 : vector<128x32xf32>
      %c0_63 = arith.constant 0 : index
      %c0_64 = arith.constant 0 : index
      %159 = vector.load %arg5[%c0_63, %c0_64] : memref<128x32xf32, #tpu.memory_space<vmem>>, vector<128x32xf32>
      tpu.vector_store %arg5[%c0_63, %c0_64], %158 {strides = array<i32>} : memref<128x32xf32, #tpu.memory_space<vmem>>, vector<128x32xf32>,
    } else {
    }
    return
  }
  func.func @transform_0(%arg0: i32) -> (i32, i32) {
    %c0_i32 = arith.constant 0 : i32
    %c0_i32_0 = arith.constant 0 : i32
    return %arg0, %c0_i32 : i32, i32
  }
  func.func @transform_1(%arg0: i32) -> (i32, i32) {
    %c0_i32 = arith.constant 0 : i32
    %c0_i32_0 = arith.constant 0 : i32
    return %arg0, %c0_i32 : i32, i32
  }
  func.func @transform_2(%arg0: i32) -> (i32, i32) {
    %c0_i32 = arith.constant 0 : i32
    %c0_i32_0 = arith.constant 0 : i32
    return %arg0, %c0_i32 : i32, i32
  }
  func.func @transform_3(%arg0: i32) -> (i32, i32) {
    %c0_i32 = arith.constant 0 : i32
    %c0_i32_0 = arith.constant 0 : i32
    %c0_i32_1 = arith.constant 0 : i32
    return %c0_i32, %c0_i32_0 : i32, i32
  }
  func.func @transform_4(%arg0: i32) -> (i32, i32) {
    %c0_i32 = arith.constant 0 : i32
    %c0_i32_0 = arith.constant 0 : i32
    %c0_i32_1 = arith.constant 0 : i32
    return %c0_i32, %c0_i32_0 : i32, i32
  }
  func.func @transform_5(%arg0: i32) -> (i32, i32) {
    %c0_i32 = arith.constant 0 : i32
    %c0_i32_0 = arith.constant 0 : i32
    %c0_i32_1 = arith.constant 0 : i32
    return %c0_i32, %c0_i32_0 : i32, i32
  }
}

module attributes {stable_mosaic.version = 11 : i64} {
  func.func @_node_update1_kernel(%arg0: i32, %arg1: memref<16x128xf32, #tpu.memory_space<vmem>>, %arg2: memref<16x8xf32, #tpu.memory_space<vmem>>, %arg3: memref<4x128xf32, #tpu.memory_space<vmem>>, %arg4: memref<128x32xf32, #tpu.memory_space<vmem>>, %arg5: memref<1x32xf32, #tpu.memory_space<vmem>>, %arg6: memref<32x128xf32, #tpu.memory_space<vmem>>, %arg7: memref<16x128xf32, #tpu.memory_space<vmem>>) attributes {dimension_semantics = [#tpu.dimension_semantics<parallel>], iteration_bounds = array<i64: 1>, scalar_prefetch = 0 : i64, scratch_operands = 0 : i64, tpu.core_type = #tpu.core_type<tc>, window_params = [{transform_indices = @transform_0, window_bounds = array<i64: 16, 128>}, {transform_indices = @transform_1, window_bounds = array<i64: 16, 8>}, {pipeline_mode = #tpu.pipeline_mode<synchronous>, transform_indices = @transform_2, window_bounds = array<i64: 4, 128>}, {pipeline_mode = #tpu.pipeline_mode<synchronous>, transform_indices = @transform_3, window_bounds = array<i64: 128, 32>}, {pipeline_mode = #tpu.pipeline_mode<synchronous>, transform_indices = @transform_4, window_bounds = array<i64: 1, 32>}, {pipeline_mode = #tpu.pipeline_mode<synchronous>, transform_indices = @transform_5, window_bounds = array<i64: 32, 128>}, {transform_indices = @transform_6, window_bounds = array<i64: 16, 128>}]} {
    %c0 = arith.constant 0 : index
    %c0_0 = arith.constant 0 : index
    %0 = vector.load %arg1[%c0, %c0_0] : memref<16x128xf32, #tpu.memory_space<vmem>>, vector<16x128xf32>
    %c0_1 = arith.constant 0 : index
    %c0_2 = arith.constant 0 : index
    %1 = vector.load %arg2[%c0_1, %c0_2] : memref<16x8xf32, #tpu.memory_space<vmem>>, vector<16x8xf32>
    %c0_3 = arith.constant 0 : index
    %c0_4 = arith.constant 0 : index
    %2 = vector.load %arg3[%c0_3, %c0_4] : memref<4x128xf32, #tpu.memory_space<vmem>>, vector<4x128xf32>
    %c0_5 = arith.constant 0 : index
    %c0_6 = arith.constant 0 : index
    %3 = vector.load %arg4[%c0_5, %c0_6] : memref<128x32xf32, #tpu.memory_space<vmem>>, vector<128x32xf32>
    %cst = arith.constant 0.000000e+00 : f32
    %4 = vector.broadcast %cst : f32 to vector<16x128xf32>
    %5 = arith.cmpf ogt, %0, %4 : vector<16x128xf32>
    %cst_7 = arith.constant 0.000000e+00 : f32
    %cst_8 = arith.constant -1.000000e+30 : f32
    %6 = vector.broadcast %cst_7 : f32 to vector<16x128xf32>
    %7 = vector.broadcast %cst_8 : f32 to vector<16x128xf32>
    %8 = arith.select %5, %6, %7 : vector<16x128xi1>, vector<16x128xf32>
    %cst_9 = arith.constant dense<0.000000e+00> : vector<16xf32>
    %9 = vector.multi_reduction <add>, %0, %cst_9 [1] : vector<16x128xf32> to vector<16xf32>
    %10 = vector.shape_cast %9 : vector<16xf32> to vector<16x1xf32>
    %cst_10 = arith.constant 0.000000e+00 : f32
    %11 = vector.broadcast %cst_10 : f32 to vector<16x1xf32>
    %12 = arith.cmpf ogt, %10, %11 : vector<16x1xf32>
    %cst_11 = arith.constant 1.000000e+00 : f32
    %13 = vector.broadcast %cst_11 : f32 to vector<16x1xf32>
    %14 = arith.divf %13, %10 : vector<16x1xf32>
    %cst_12 = arith.constant 0.000000e+00 : f32
    %15 = vector.broadcast %cst_12 : f32 to vector<16x1xf32>
    %16 = arith.select %12, %14, %15 : vector<16x1xi1>, vector<16x1xf32>
    %17 = vector.extract_strided_slice %1 {offsets = [0, 0], sizes = [16, 1], strides = [1, 1]} : vector<16x8xf32> to vector<16x1xf32>
    %18 = vector.extract_strided_slice %2 {offsets = [0, 0], sizes = [1, 128], strides = [1, 1]} : vector<4x128xf32> to vector<1x128xf32>
    %19 = vector.broadcast %17 : vector<16x1xf32> to vector<16x128xf32>
    %20 = vector.broadcast %18 : vector<1x128xf32> to vector<16x128xf32>
    %21 = arith.addf %19, %20 : vector<16x128xf32>
    %cst_13 = arith.constant 0.000000e+00 : f32
    %22 = vector.broadcast %cst_13 : f32 to vector<16x128xf32>
    %23 = arith.cmpf ogt, %21, %22 : vector<16x128xf32>
    %cst_14 = arith.constant 2.000000e-01 : f32
    %24 = vector.broadcast %cst_14 : f32 to vector<16x128xf32>
    %25 = arith.mulf %24, %21 : vector<16x128xf32>
    %26 = arith.select %23, %21, %25 : vector<16x128xi1>, vector<16x128xf32>
    %27 = arith.addf %26, %8 : vector<16x128xf32>
    %cst_15 = arith.constant dense<0xFF800000> : vector<16xf32>
    %28 = vector.multi_reduction <maximumf>, %27, %cst_15 [1] : vector<16x128xf32> to vector<16xf32>
    %29 = vector.shape_cast %28 : vector<16xf32> to vector<16x1xf32>
    %30 = vector.broadcast %29 : vector<16x1xf32> to vector<16x128xf32>
    %31 = arith.subf %27, %30 : vector<16x128xf32>
    %32 = math.exp %31 : vector<16x128xf32>
    %cst_16 = arith.constant dense<0.000000e+00> : vector<16xf32>
    %33 = vector.multi_reduction <add>, %32, %cst_16 [1] : vector<16x128xf32> to vector<16xf32>
    %34 = vector.shape_cast %33 : vector<16xf32> to vector<16x1xf32>
    %35 = tpu.reciprocal %34 {approx = true} : vector<16x1xf32> -> vector<16x1xf32>
    %36 = arith.mulf %34, %35 : vector<16x1xf32>
    %cst_17 = arith.constant 2.000000e+00 : f32
    %37 = vector.broadcast %cst_17 : f32 to vector<16x1xf32>
    %38 = arith.subf %37, %36 : vector<16x1xf32>
    %39 = arith.mulf %35, %38 : vector<16x1xf32>
    %cst_18 = arith.constant -5.000000e+29 : f32
    %40 = vector.broadcast %cst_18 : f32 to vector<16x1xf32>
    %41 = arith.cmpf ogt, %29, %40 : vector<16x1xf32>
    %cst_19 = arith.constant 0.000000e+00 : f32
    %42 = vector.broadcast %cst_19 : f32 to vector<16x1xf32>
    %43 = arith.select %41, %39, %42 : vector<16x1xi1>, vector<16x1xf32>
    %44 = vector.broadcast %43 : vector<16x1xf32> to vector<16x128xf32>
    %45 = arith.mulf %32, %44 : vector<16x128xf32>
    %46 = vector.extract_strided_slice %3 {offsets = [0, 0], sizes = [128, 8], strides = [1, 1]} : vector<128x32xf32> to vector<128x8xf32>
    %cst_20 = arith.constant dense<0.000000e+00> : vector<16x8xf32>
    %47 = tpu.matmul %45, %46, %cst_20 {dimension_numbers = #tpu.dot_dimension_numbers<[1], [0], [0], [1], [0, 0, 1, 1], [], []>} : vector<16x128xf32>, vector<128x8xf32>, vector<16x8xf32> -> vector<16x8xf32>
    %48 = vector.extract_strided_slice %1 {offsets = [0, 1], sizes = [16, 1], strides = [1, 1]} : vector<16x8xf32> to vector<16x1xf32>
    %49 = vector.extract_strided_slice %2 {offsets = [1, 0], sizes = [1, 128], strides = [1, 1]} : vector<4x128xf32> to vector<1x128xf32>
    %50 = vector.broadcast %48 : vector<16x1xf32> to vector<16x128xf32>
    %51 = vector.broadcast %49 : vector<1x128xf32> to vector<16x128xf32>
    %52 = arith.addf %50, %51 : vector<16x128xf32>
    %cst_21 = arith.constant 0.000000e+00 : f32
    %53 = vector.broadcast %cst_21 : f32 to vector<16x128xf32>
    %54 = arith.cmpf ogt, %52, %53 : vector<16x128xf32>
    %cst_22 = arith.constant 2.000000e-01 : f32
    %55 = vector.broadcast %cst_22 : f32 to vector<16x128xf32>
    %56 = arith.mulf %55, %52 : vector<16x128xf32>
    %57 = arith.select %54, %52, %56 : vector<16x128xi1>, vector<16x128xf32>
    %58 = arith.addf %57, %8 : vector<16x128xf32>
    %cst_23 = arith.constant dense<0xFF800000> : vector<16xf32>
    %59 = vector.multi_reduction <maximumf>, %58, %cst_23 [1] : vector<16x128xf32> to vector<16xf32>
    %60 = vector.shape_cast %59 : vector<16xf32> to vector<16x1xf32>
    %61 = vector.broadcast %60 : vector<16x1xf32> to vector<16x128xf32>
    %62 = arith.subf %58, %61 : vector<16x128xf32>
    %63 = math.exp %62 : vector<16x128xf32>
    %cst_24 = arith.constant dense<0.000000e+00> : vector<16xf32>
    %64 = vector.multi_reduction <add>, %63, %cst_24 [1] : vector<16x128xf32> to vector<16xf32>
    %65 = vector.shape_cast %64 : vector<16xf32> to vector<16x1xf32>
    %66 = tpu.reciprocal %65 {approx = true} : vector<16x1xf32> -> vector<16x1xf32>
    %67 = arith.mulf %65, %66 : vector<16x1xf32>
    %cst_25 = arith.constant 2.000000e+00 : f32
    %68 = vector.broadcast %cst_25 : f32 to vector<16x1xf32>
    %69 = arith.subf %68, %67 : vector<16x1xf32>
    %70 = arith.mulf %66, %69 : vector<16x1xf32>
    %cst_26 = arith.constant -5.000000e+29 : f32
    %71 = vector.broadcast %cst_26 : f32 to vector<16x1xf32>
    %72 = arith.cmpf ogt, %60, %71 : vector<16x1xf32>
    %cst_27 = arith.constant 0.000000e+00 : f32
    %73 = vector.broadcast %cst_27 : f32 to vector<16x1xf32>
    %74 = arith.select %72, %70, %73 : vector<16x1xi1>, vector<16x1xf32>
    %75 = vector.broadcast %74 : vector<16x1xf32> to vector<16x128xf32>
    %76 = arith.mulf %63, %75 : vector<16x128xf32>
    %77 = vector.extract_strided_slice %3 {offsets = [0, 8], sizes = [128, 8], strides = [1, 1]} : vector<128x32xf32> to vector<128x8xf32>
    %cst_28 = arith.constant dense<0.000000e+00> : vector<16x8xf32>
    %78 = tpu.matmul %76, %77, %cst_28 {dimension_numbers = #tpu.dot_dimension_numbers<[1], [0], [0], [1], [0, 0, 1, 1], [], []>} : vector<16x128xf32>, vector<128x8xf32>, vector<16x8xf32> -> vector<16x8xf32>
    %79 = vector.extract_strided_slice %1 {offsets = [0, 2], sizes = [16, 1], strides = [1, 1]} : vector<16x8xf32> to vector<16x1xf32>
    %80 = vector.extract_strided_slice %2 {offsets = [2, 0], sizes = [1, 128], strides = [1, 1]} : vector<4x128xf32> to vector<1x128xf32>
    %81 = vector.broadcast %79 : vector<16x1xf32> to vector<16x128xf32>
    %82 = vector.broadcast %80 : vector<1x128xf32> to vector<16x128xf32>
    %83 = arith.addf %81, %82 : vector<16x128xf32>
    %cst_29 = arith.constant 0.000000e+00 : f32
    %84 = vector.broadcast %cst_29 : f32 to vector<16x128xf32>
    %85 = arith.cmpf ogt, %83, %84 : vector<16x128xf32>
    %cst_30 = arith.constant 2.000000e-01 : f32
    %86 = vector.broadcast %cst_30 : f32 to vector<16x128xf32>
    %87 = arith.mulf %86, %83 : vector<16x128xf32>
    %88 = arith.select %85, %83, %87 : vector<16x128xi1>, vector<16x128xf32>
    %89 = arith.addf %88, %8 : vector<16x128xf32>
    %cst_31 = arith.constant dense<0xFF800000> : vector<16xf32>
    %90 = vector.multi_reduction <maximumf>, %89, %cst_31 [1] : vector<16x128xf32> to vector<16xf32>
    %91 = vector.shape_cast %90 : vector<16xf32> to vector<16x1xf32>
    %92 = vector.broadcast %91 : vector<16x1xf32> to vector<16x128xf32>
    %93 = arith.subf %89, %92 : vector<16x128xf32>
    %94 = math.exp %93 : vector<16x128xf32>
    %cst_32 = arith.constant dense<0.000000e+00> : vector<16xf32>
    %95 = vector.multi_reduction <add>, %94, %cst_32 [1] : vector<16x128xf32> to vector<16xf32>
    %96 = vector.shape_cast %95 : vector<16xf32> to vector<16x1xf32>
    %97 = tpu.reciprocal %96 {approx = true} : vector<16x1xf32> -> vector<16x1xf32>
    %98 = arith.mulf %96, %97 : vector<16x1xf32>
    %cst_33 = arith.constant 2.000000e+00 : f32
    %99 = vector.broadcast %cst_33 : f32 to vector<16x1xf32>
    %100 = arith.subf %99, %98 : vector<16x1xf32>
    %101 = arith.mulf %97, %100 : vector<16x1xf32>
    %cst_34 = arith.constant -5.000000e+29 : f32
    %102 = vector.broadcast %cst_34 : f32 to vector<16x1xf32>
    %103 = arith.cmpf ogt, %91, %102 : vector<16x1xf32>
    %cst_35 = arith.constant 0.000000e+00 : f32
    %104 = vector.broadcast %cst_35 : f32 to vector<16x1xf32>
    %105 = arith.select %103, %101, %104 : vector<16x1xi1>, vector<16x1xf32>
    %106 = vector.broadcast %105 : vector<16x1xf32> to vector<16x128xf32>
    %107 = arith.mulf %94, %106 : vector<16x128xf32>
    %108 = vector.extract_strided_slice %3 {offsets = [0, 16], sizes = [128, 8], strides = [1, 1]} : vector<128x32xf32> to vector<128x8xf32>
    %cst_36 = arith.constant dense<0.000000e+00> : vector<16x8xf32>
    %109 = tpu.matmul %107, %108, %cst_36 {dimension_numbers = #tpu.dot_dimension_numbers<[1], [0], [0], [1], [0, 0, 1, 1], [], []>} : vector<16x128xf32>, vector<128x8xf32>, vector<16x8xf32> -> vector<16x8xf32>
    %110 = vector.extract_strided_slice %1 {offsets = [0, 3], sizes = [16, 1], strides = [1, 1]} : vector<16x8xf32> to vector<16x1xf32>
    %111 = vector.extract_strided_slice %2 {offsets = [3, 0], sizes = [1, 128], strides = [1, 1]} : vector<4x128xf32> to vector<1x128xf32>
    %112 = vector.broadcast %110 : vector<16x1xf32> to vector<16x128xf32>
    %113 = vector.broadcast %111 : vector<1x128xf32> to vector<16x128xf32>
    %114 = arith.addf %112, %113 : vector<16x128xf32>
    %cst_37 = arith.constant 0.000000e+00 : f32
    %115 = vector.broadcast %cst_37 : f32 to vector<16x128xf32>
    %116 = arith.cmpf ogt, %114, %115 : vector<16x128xf32>
    %cst_38 = arith.constant 2.000000e-01 : f32
    %117 = vector.broadcast %cst_38 : f32 to vector<16x128xf32>
    %118 = arith.mulf %117, %114 : vector<16x128xf32>
    %119 = arith.select %116, %114, %118 : vector<16x128xi1>, vector<16x128xf32>
    %120 = arith.addf %119, %8 : vector<16x128xf32>
    %cst_39 = arith.constant dense<0xFF800000> : vector<16xf32>
    %121 = vector.multi_reduction <maximumf>, %120, %cst_39 [1] : vector<16x128xf32> to vector<16xf32>
    %122 = vector.shape_cast %121 : vector<16xf32> to vector<16x1xf32>
    %123 = vector.broadcast %122 : vector<16x1xf32> to vector<16x128xf32>
    %124 = arith.subf %120, %123 : vector<16x128xf32>
    %125 = math.exp %124 : vector<16x128xf32>
    %cst_40 = arith.constant dense<0.000000e+00> : vector<16xf32>
    %126 = vector.multi_reduction <add>, %125, %cst_40 [1] : vector<16x128xf32> to vector<16xf32>
    %127 = vector.shape_cast %126 : vector<16xf32> to vector<16x1xf32>
    %128 = tpu.reciprocal %127 {approx = true} : vector<16x1xf32> -> vector<16x1xf32>
    %129 = arith.mulf %127, %128 : vector<16x1xf32>
    %cst_41 = arith.constant 2.000000e+00 : f32
    %130 = vector.broadcast %cst_41 : f32 to vector<16x1xf32>
    %131 = arith.subf %130, %129 : vector<16x1xf32>
    %132 = arith.mulf %128, %131 : vector<16x1xf32>
    %cst_42 = arith.constant -5.000000e+29 : f32
    %133 = vector.broadcast %cst_42 : f32 to vector<16x1xf32>
    %134 = arith.cmpf ogt, %122, %133 : vector<16x1xf32>
    %cst_43 = arith.constant 0.000000e+00 : f32
    %135 = vector.broadcast %cst_43 : f32 to vector<16x1xf32>
    %136 = arith.select %134, %132, %135 : vector<16x1xi1>, vector<16x1xf32>
    %137 = vector.broadcast %136 : vector<16x1xf32> to vector<16x128xf32>
    %138 = arith.mulf %125, %137 : vector<16x128xf32>
    %139 = vector.extract_strided_slice %3 {offsets = [0, 24], sizes = [128, 8], strides = [1, 1]} : vector<128x32xf32> to vector<128x8xf32>
    %cst_44 = arith.constant dense<0.000000e+00> : vector<16x8xf32>
    %140 = tpu.matmul %138, %139, %cst_44 {dimension_numbers = #tpu.dot_dimension_numbers<[1], [0], [0], [1], [0, 0, 1, 1], [], []>} : vector<16x128xf32>, vector<128x8xf32>, vector<16x8xf32> -> vector<16x8xf32>
    %141 = tpu.concatenate %47, %78, %109, %140 in 1 : vector<16x8xf32>, vector<16x8xf32>, vector<16x8xf32>, vector<16x8xf32> -> vector<16x32xf32>
    %142 = vector.broadcast %16 : vector<16x1xf32> to vector<16x32xf32>
    %143 = arith.mulf %141, %142 : vector<16x32xf32>
    %c0_45 = arith.constant 0 : index
    %c0_46 = arith.constant 0 : index
    %144 = vector.load %arg5[%c0_45, %c0_46] : memref<1x32xf32, #tpu.memory_space<vmem>>, vector<1x32xf32>
    %145 = vector.broadcast %144 : vector<1x32xf32> to vector<16x32xf32>
    %146 = arith.addf %143, %145 : vector<16x32xf32>
    %cst_47 = arith.constant 0.000000e+00 : f32
    %147 = vector.broadcast %cst_47 : f32 to vector<16x32xf32>
    %148 = arith.cmpf ogt, %146, %147 : vector<16x32xf32>
    %cst_48 = arith.constant 0.000000e+00 : f32
    %149 = vector.broadcast %cst_48 : f32 to vector<16x32xf32>
    %150 = arith.minimumf %146, %149 : vector<16x32xf32>
    %151 = math.exp %150 : vector<16x32xf32>
    %cst_49 = arith.constant 1.000000e+00 : f32
    %152 = vector.broadcast %cst_49 : f32 to vector<16x32xf32>
    %153 = arith.subf %151, %152 : vector<16x32xf32>
    %154 = arith.select %148, %146, %153 : vector<16x32xi1>, vector<16x32xf32>
    %c0_50 = arith.constant 0 : index
    %c0_51 = arith.constant 0 : index
    %155 = vector.load %arg6[%c0_50, %c0_51] : memref<32x128xf32, #tpu.memory_space<vmem>>, vector<32x128xf32>
    %cst_52 = arith.constant dense<0.000000e+00> : vector<16x128xf32>
    %156 = tpu.matmul %154, %155, %cst_52 {dimension_numbers = #tpu.dot_dimension_numbers<[1], [0], [0], [1], [0, 0, 1, 1], [], []>} : vector<16x32xf32>, vector<32x128xf32>, vector<16x128xf32> -> vector<16x128xf32>
    %c0_53 = arith.constant 0 : index
    %c0_54 = arith.constant 0 : index
    %157 = vector.load %arg7[%c0_53, %c0_54] : memref<16x128xf32, #tpu.memory_space<vmem>>, vector<16x128xf32>
    tpu.vector_store %arg7[%c0_53, %c0_54], %156 {strides = array<i32>} : memref<16x128xf32, #tpu.memory_space<vmem>>, vector<16x128xf32>,
    return
  }
  func.func @transform_0(%arg0: i32) -> (i32, i32) {
    %c0_i32 = arith.constant 0 : i32
    %c0_i32_0 = arith.constant 0 : i32
    return %arg0, %c0_i32 : i32, i32
  }
  func.func @transform_1(%arg0: i32) -> (i32, i32) {
    %c0_i32 = arith.constant 0 : i32
    %c0_i32_0 = arith.constant 0 : i32
    return %arg0, %c0_i32 : i32, i32
  }
  func.func @transform_2(%arg0: i32) -> (i32, i32) {
    %c0_i32 = arith.constant 0 : i32
    %c0_i32_0 = arith.constant 0 : i32
    %c0_i32_1 = arith.constant 0 : i32
    return %c0_i32, %c0_i32_0 : i32, i32
  }
  func.func @transform_3(%arg0: i32) -> (i32, i32) {
    %c0_i32 = arith.constant 0 : i32
    %c0_i32_0 = arith.constant 0 : i32
    %c0_i32_1 = arith.constant 0 : i32
    return %c0_i32, %c0_i32_0 : i32, i32
  }
  func.func @transform_4(%arg0: i32) -> (i32, i32) {
    %c0_i32 = arith.constant 0 : i32
    %c0_i32_0 = arith.constant 0 : i32
    %c0_i32_1 = arith.constant 0 : i32
    return %c0_i32, %c0_i32_0 : i32, i32
  }
  func.func @transform_5(%arg0: i32) -> (i32, i32) {
    %c0_i32 = arith.constant 0 : i32
    %c0_i32_0 = arith.constant 0 : i32
    %c0_i32_1 = arith.constant 0 : i32
    return %c0_i32, %c0_i32_0 : i32, i32
  }
  func.func @transform_6(%arg0: i32) -> (i32, i32) {
    %c0_i32 = arith.constant 0 : i32
    %c0_i32_0 = arith.constant 0 : i32
    return %arg0, %c0_i32 : i32, i32
  }
}

module attributes {stable_mosaic.version = 11 : i64} {
  func.func @_node_update2_kernel(%arg0: i32, %arg1: memref<16x128xf32, #tpu.memory_space<vmem>>, %arg2: memref<128x128xf32, #tpu.memory_space<vmem>>, %arg3: memref<1x128xf32, #tpu.memory_space<vmem>>, %arg4: memref<16x128xf32, #tpu.memory_space<vmem>>) attributes {dimension_semantics = [#tpu.dimension_semantics<parallel>], iteration_bounds = array<i64: 1>, scalar_prefetch = 0 : i64, scratch_operands = 0 : i64, tpu.core_type = #tpu.core_type<tc>, window_params = [{transform_indices = @transform_0, window_bounds = array<i64: 16, 128>}, {pipeline_mode = #tpu.pipeline_mode<synchronous>, transform_indices = @transform_1, window_bounds = array<i64: 128, 128>}, {pipeline_mode = #tpu.pipeline_mode<synchronous>, transform_indices = @transform_2, window_bounds = array<i64: 1, 128>}, {transform_indices = @transform_3, window_bounds = array<i64: 16, 128>}]} {
    %c0 = arith.constant 0 : index
    %c0_0 = arith.constant 0 : index
    %0 = vector.load %arg1[%c0, %c0_0] : memref<16x128xf32, #tpu.memory_space<vmem>>, vector<16x128xf32>
    %cst = arith.constant dense<0.000000e+00> : vector<16xf32>
    %1 = vector.multi_reduction <add>, %0, %cst [1] : vector<16x128xf32> to vector<16xf32>
    %2 = vector.shape_cast %1 : vector<16xf32> to vector<16x1xf32>
    %cst_1 = arith.constant 0.000000e+00 : f32
    %3 = vector.broadcast %cst_1 : f32 to vector<16x1xf32>
    %4 = arith.cmpf ogt, %2, %3 : vector<16x1xf32>
    %cst_2 = arith.constant 1.000000e+00 : f32
    %5 = vector.broadcast %cst_2 : f32 to vector<16x1xf32>
    %6 = arith.divf %5, %2 : vector<16x1xf32>
    %cst_3 = arith.constant 0.000000e+00 : f32
    %7 = vector.broadcast %cst_3 : f32 to vector<16x1xf32>
    %8 = arith.select %4, %6, %7 : vector<16x1xi1>, vector<16x1xf32>
    %c0_4 = arith.constant 0 : index
    %c0_5 = arith.constant 0 : index
    %9 = vector.load %arg2[%c0_4, %c0_5] : memref<128x128xf32, #tpu.memory_space<vmem>>, vector<128x128xf32>
    %cst_6 = arith.constant dense<0.000000e+00> : vector<16x128xf32>
    %10 = tpu.matmul %0, %9, %cst_6 {dimension_numbers = #tpu.dot_dimension_numbers<[1], [0], [0], [1], [0, 0, 1, 1], [], []>} : vector<16x128xf32>, vector<128x128xf32>, vector<16x128xf32> -> vector<16x128xf32>
    %11 = vector.broadcast %8 : vector<16x1xf32> to vector<16x128xf32>
    %12 = arith.mulf %11, %10 : vector<16x128xf32>
    %c0_7 = arith.constant 0 : index
    %c0_8 = arith.constant 0 : index
    %13 = vector.load %arg3[%c0_7, %c0_8] : memref<1x128xf32, #tpu.memory_space<vmem>>, vector<1x128xf32>
    %14 = vector.broadcast %13 : vector<1x128xf32> to vector<16x128xf32>
    %15 = arith.addf %12, %14 : vector<16x128xf32>
    %cst_9 = arith.constant dense<0xFF800000> : vector<16xf32>
    %16 = vector.multi_reduction <maximumf>, %15, %cst_9 [1] : vector<16x128xf32> to vector<16xf32>
    %17 = vector.shape_cast %16 : vector<16xf32> to vector<16x1xf32>
    %18 = vector.broadcast %17 : vector<16x1xf32> to vector<16x128xf32>
    %19 = arith.subf %15, %18 : vector<16x128xf32>
    %20 = math.exp %19 : vector<16x128xf32>
    %cst_10 = arith.constant dense<0.000000e+00> : vector<16xf32>
    %21 = vector.multi_reduction <add>, %20, %cst_10 [1] : vector<16x128xf32> to vector<16xf32>
    %22 = vector.shape_cast %21 : vector<16xf32> to vector<16x1xf32>
    %23 = math.log %22 : vector<16x1xf32>
    %24 = vector.broadcast %23 : vector<16x1xf32> to vector<16x128xf32>
    %25 = arith.subf %19, %24 : vector<16x128xf32>
    %c0_11 = arith.constant 0 : index
    %c0_12 = arith.constant 0 : index
    %26 = vector.load %arg4[%c0_11, %c0_12] : memref<16x128xf32, #tpu.memory_space<vmem>>, vector<16x128xf32>
    tpu.vector_store %arg4[%c0_11, %c0_12], %25 {strides = array<i32>} : memref<16x128xf32, #tpu.memory_space<vmem>>, vector<16x128xf32>,
    return
  }
  func.func @transform_0(%arg0: i32) -> (i32, i32) {
    %c0_i32 = arith.constant 0 : i32
    %c0_i32_0 = arith.constant 0 : i32
    return %arg0, %c0_i32 : i32, i32
  }
  func.func @transform_1(%arg0: i32) -> (i32, i32) {
    %c0_i32 = arith.constant 0 : i32
    %c0_i32_0 = arith.constant 0 : i32
    %c0_i32_1 = arith.constant 0 : i32
    return %c0_i32, %c0_i32_0 : i32, i32
  }
  func.func @transform_2(%arg0: i32) -> (i32, i32) {
    %c0_i32 = arith.constant 0 : i32
    %c0_i32_0 = arith.constant 0 : i32
    %c0_i32_1 = arith.constant 0 : i32
    return %c0_i32, %c0_i32_0 : i32, i32
  }
  func.func @transform_3(%arg0: i32) -> (i32, i32) {
    %c0_i32 = arith.constant 0 : i32
    %c0_i32_0 = arith.constant 0 : i32
    return %arg0, %c0_i32 : i32, i32
  }
}

</mosaic_0001>

<bundles_post_ra>
// kernel: hyper_attention_forward.5
= control target key start
LH: loop header
LB: loop body
LE: loop exit
PB: predicated region body
PF: predicated region fallthrough
CT: control target
= control target key end

     0   :  { %vm22_vm0 = vcmask 261120   ;;  %vm191_vm1 = vcmask 64512   ;;  %s329_s1 = inlined_call_operand.vmem [shape: f32[32,32], index: 1, kind: input, shape index: {}]   ;;  %s330_s0 = inlined_call_operand.vmem [shape: f32[16,32], index: 0, kind: input, shape index: {}]   ;;  %s331_s2 = inlined_call_operand.vmem [shape: f32[32,8], index: 2, kind: input, shape index: {}]   ;;  %s332_s3 = inlined_call_operand.vmem [shape: f32[16,32], index: 3, kind: output, shape index: {0}]   ;;  %s333_s4 = inlined_call_operand.vmem [shape: f32[16,8], index: 4, kind: output, shape index: {1}]  }
   0x1   :  { %v18_v0 = vld [vmem:[%s329_s1] sm:$0xff]  ;;  %v19_v1 = vld [vmem:[%s329_s1 + $0x8] sm:$0xff]  ;;  %v20_v2 = vld [vmem:[%s329_s1 + $0x10] sm:$0xff] }
   0x2   :  { %v240_v3 = vpack.c.bf16 %v19_v1, %v18_v0  ;;  %v21_v4 = vld [vmem:[%s329_s1 + $0x18] sm:$0xff]  ;;  %v16_v5 = vld [vmem:[%s330_s0] sm:$0xff]  ;;  %v107_v8 = vld [vmem:[%s331_s2 + $0x8] sm:$0xff] }
   0x3   :  { %v244_v6 = vpack.c.bf16 %v21_v4, %v20_v2  ;;  %226 = vmatprep.mubr.msk.f32.mxu0 %vm22_vm0, %v16_v5  ;;  %v106_v7 = vld [vmem:[%s331_s2] sm:$0xff]  ;;  %v108_v9 = vld [vmem:[%s331_s2 + $0x10] sm:$0xff]  ;;  %v109_v11 = vld [vmem:[%s331_s2 + $0x18] sm:$0xff] }
   0x4   :  { %241 = vmatprep.subr.bf16.mxu0 %v240_v3  ;;  %v248_v10 = vpack.c.bf16 %v107_v8, %v106_v7  ;;  %v252_v12 = vpack.c.bf16 %v109_v11, %v108_v9  ;;  %v17_v13 = vld [vmem:[%s330_s0 + $0x8] sm:$0xff] }
   0x5   :  { %243 = vmatpush3.bf16.msra.mxu0 %v240_v3 }
   0x6   :  { %245 = vmatprep.subr.bf16.mxu0 %v244_v6  ;;  %249 = vmatprep.subr.bf16.mxu1 %v248_v10 }
   0x7   :  { %251 = vmatpush3.bf16.msra.mxu1 %v248_v10 }
   0x8   :  { %253 = vmatprep.subr.bf16.mxu1 %v252_v12 }
   0x9   :  { %247 = vmatpush3.bf16.msra.mxu0 %v244_v6 }
   0xb   :  { %255 = vmatpush3.bf16.msra.mxu1 %v252_v12 }
   0xc   :  { %227 = vmatmul.mubr.msk.f32.vlgmr.msra.gmra.mrb[0].mxu0 %vm22_vm0, %v17_v13 }
  0xdf   :  { %v228_v14 = vpop.f32.mrb[0].mxu0 }
  0xe0   :  { %105 = vst.msk [vmem:[%s332_s3 + $0x8] sm:$0xff] %vm22_vm0, %v228_v14  ;;  %v95_v15 = vpop.f32.mrb[1].mxu0 }
  0xe1   :  { %104 = vst.msk [vmem:[%s332_s3] sm:$0xff] %vm22_vm0, %v95_v15  ;;  %237 = vmatprep.mubr.msk.f32.mxu1 %vm22_vm0, %v95_v15 }
  0xe2   :  { %238 = vmatmul.mubr.msk.f32.vlgmr.msra.gmra.mrb[0].mxu1 %vm22_vm0, %v228_v14 }
 0x1b5   :  { %v239_v16 = vpop.f32.mrb[0].mxu1 }
 0x1b6   :  { %193 = vst.msk [vmem:[%s333_s4 + $0x8] sm:$0xff] %vm191_vm1, %v239_v16  ;;  %v182_v17 = vpop.f32.mrb[1].mxu1 }
 0x1b7   :  { %192 = vst.msk [vmem:[%s333_s4] sm:$0xff] %vm191_vm1, %v182_v17 }

// kernel: hyper_attention_forward.8
= control target key start
LH: loop header
LB: loop body
LE: loop exit
PB: predicated region body
PF: predicated region fallthrough
CT: control target
= control target key end

     0   :  { %v535_v5 = vmov 0   ;;  %vm86_vm0 = vcmask 130048   ;;  %s680_s0 = inlined_call_operand.vmem [shape: f32[16,128], index: 0, kind: input, shape index: {}]   ;;  %s681_s1 = inlined_call_operand.vmem [shape: f32[16,128], index: 1, kind: input, shape index: {}]   ;;  %s682_s2 = inlined_call_operand.vmem [shape: f32[128,1], index: 2, kind: input, shape index: {}]   ;;  %s683_s3 = inlined_call_operand.vmem [shape: f32[128,128], index: 3, kind: output, shape index: {}]  }
   0x1   :  { %v50_v0 = vld [vmem:[%s680_s0] sm:$0xff]  ;;  %v53_v2 = vld [vmem:[%s681_s1 + $0x8] sm:$0xff]  ;;  %533 = vset.pattern.permute.xlu1 %v535_v5  ;;  %v334_v8 = vld [vmem:[%s682_s2 + $0x18] sm:$0xff] }
   0x2   :  { %v52_v1 = vld [vmem:[%s681_s1] sm:$0xff]  ;;  %54 = vxpose.xlu0.b32.start [1/2] (short) %v50_v0, 128  ;;  %v51_v3 = vld [vmem:[%s680_s0 + $0x8] sm:$0xff]  ;;  %v337_v11 = vld [vmem:[%s682_s2 + $0x30] sm:$0xff] }
   0x3   :  { %v525_v4 = vpack.c.bf16 %v53_v2, %v52_v1  ;;  %v331_v6 = vld [vmem:[%s682_s2] sm:$0xff]  ;;  %v332_v7 = vld [vmem:[%s682_s2 + $0x8] sm:$0xff]  ;;  %v338_v12 = vld [vmem:[%s682_s2 + $0x38] sm:$0xff] }
   0x4   :  { %349 = vperm.xlu1 %533, %v331_v6   ;;  %v335_v9 = vld [vmem:[%s682_s2 + $0x20] sm:$0xff]  ;;  %v336_v10 = vld [vmem:[%s682_s2 + $0x28] sm:$0xff]  ;;  %v341_v15 = vld [vmem:[%s682_s2 + $0x50] sm:$0xff] }
   0x5   :  { %526 = vmatprep.subr.bf16.mxu0 %v525_v4  ;;  %529 = vmatprep.subr.bf16.mxu1 %v525_v4  ;;  %v339_v13 = vld [vmem:[%s682_s2 + $0x40] sm:$0xff]  ;;  %v340_v14 = vld [vmem:[%s682_s2 + $0x48] sm:$0xff]  ;;  %v342_v16 = vld [vmem:[%s682_s2 + $0x58] sm:$0xff] }
   0x6   :  { %55 = vxpose.xlu0.b32.end [2/2] (short) %v51_v3, 128  ;;  %528 = vmatpush3.bf16.msra.mxu0 %v525_v4  ;;  %v343_v17 = vld [vmem:[%s682_s2 + $0x60] sm:$0xff]  ;;  %v344_v18 = vld [vmem:[%s682_s2 + $0x68] sm:$0xff]  ;;  %v345_v19 = vld [vmem:[%s682_s2 + $0x70] sm:$0xff] }
   0x7   :  { %530 = vmatpush3.bf16.msra.mxu1 %v525_v4  ;;  %v346_v20 = vld [vmem:[%s682_s2 + $0x78] sm:$0xff]  ;;  %v333_v21 = vld [vmem:[%s682_s2 + $0x10] sm:$0xff] }
   0x8   :  { %354 = vperm.xlu1 %533, %v332_v7  }
   0xc   :  { %364 = vperm.xlu1 %533, %v334_v8  }
  0x10   :  { %369 = vperm.xlu1 %533, %v335_v9  }
  0x14   :  { %374 = vperm.xlu1 %533, %v336_v10  }
  0x18   :  { %379 = vperm.xlu1 %533, %v337_v11  }
  0x1c   :  { %384 = vperm.xlu1 %533, %v338_v12  }
  0x20   :  { %389 = vperm.xlu1 %533, %v339_v13  }
  0x24   :  { %394 = vperm.xlu1 %533, %v340_v14  }
  0x28   :  { %399 = vperm.xlu1 %533, %v341_v15  }
  0x2c   :  { %404 = vperm.xlu1 %533, %v342_v16  }
  0x2f   :  { %534 = vset.pattern.permute.xlu0 %v535_v5 }
  0x30   :  { %409 = vperm.xlu1 %533, %v343_v17  }
  0x34   :  { %414 = vperm.xlu1 %533, %v344_v18  }
  0x38   :  { %419 = vperm.xlu1 %533, %v345_v19  }
  0x3c   :  { %424 = vperm.xlu1 %533, %v346_v20  }
  0x67   :  { %359 = vperm.xlu0 %534, %v333_v21  }
  0x82   :  { %v70_v22 = vpop.trf.xlu0 }
  0x83   :  { %501 = vmatprep.mubr.msk.f32.mxu0 %vm86_vm0, %v70_v22  ;;  %v350_v38 = vpop.permute.xlu1 %349 }
  0x86   :  { %v71_v23 = vpop.trf.xlu0 }
  0x87   :  { %502 = vmatmul.mubr.msk.f32.vlgmr.msra.gmra.mrb[0].mxu0 %vm86_vm0, %v71_v23  ;;  %v355_v39 = vpop.permute.xlu1 %354 }
  0x8a   :  { %v72_v24 = vpop.trf.xlu0 }
  0x8b   :  { %504 = vmatprep.mubr.msk.f32.mxu0 %vm86_vm0, %v72_v24  ;;  %v365_v40 = vpop.permute.xlu1 %364 }
  0x8e   :  { %v73_v25 = vpop.trf.xlu0 }
  0x8f   :  { %505 = vmatmul.mubr.msk.f32.gmra.mrb[2].mxu0 %vm86_vm0, %v73_v25  ;;  %v370_v41 = vpop.permute.xlu1 %369 }
  0x92   :  { %v74_v26 = vpop.trf.xlu0 }
  0x93   :  { %507 = vmatprep.mubr.msk.f32.mxu0 %vm86_vm0, %v74_v26  ;;  %v375_v42 = vpop.permute.xlu1 %374 }
  0x96   :  { %v75_v27 = vpop.trf.xlu0 }
  0x97   :  { %508 = vmatmul.mubr.msk.f32.gmra.mrb[4].mxu0 %vm86_vm0, %v75_v27  ;;  %v380_v46 = vpop.permute.xlu1 %379 }
  0x9a   :  { %v76_v28 = vpop.trf.xlu0 }
  0x9b   :  { %510 = vmatprep.mubr.msk.f32.mxu0 %vm86_vm0, %v76_v28  ;;  %v385_v51 = vpop.permute.xlu1 %384 }
  0x9e   :  { %v77_v29 = vpop.trf.xlu0 }
  0x9f   :  { %511 = vmatmul.mubr.msk.f32.gmra.mrb[6].mxu0 %vm86_vm0, %v77_v29  ;;  %v390_v54 = vpop.permute.xlu1 %389 }
  0xa2   :  { %v78_v30 = vpop.trf.xlu0 }
  0xa3   :  { %513 = vmatprep.mubr.msk.f32.mxu1 %vm86_vm0, %v78_v30  ;;  %v395_v59 = vpop.permute.xlu1 %394 }
  0xa6   :  { %v79_v31 = vpop.trf.xlu0 }
  0xa7   :  { %514 = vmatmul.mubr.msk.f32.vlgmr.msra.gmra.mrb[0].mxu1 %vm86_vm0, %v79_v31  ;;  %v400_v63 = vpop.permute.xlu1 %399 }
  0xaa   :  { %v80_v32 = vpop.trf.xlu0 }
  0xab   :  { %516 = vmatprep.mubr.msk.f32.mxu1 %vm86_vm0, %v80_v32  ;;  %v405_v3 = vpop.permute.xlu1 %404 }
  0xae   :  { %v81_v33 = vpop.trf.xlu0 }
  0xaf   :  { %517 = vmatmul.mubr.msk.f32.gmra.mrb[2].mxu1 %vm86_vm0, %v81_v33  ;;  %v410_v6 = vpop.permute.xlu1 %409 }
  0xb2   :  { %v82_v34 = vpop.trf.xlu0 }
  0xb3   :  { %519 = vmatprep.mubr.msk.f32.mxu1 %vm86_vm0, %v82_v34  ;;  %v415_v11 = vpop.permute.xlu1 %414 }
  0xb6   :  { %v83_v35 = vpop.trf.xlu0 }
  0xb7   :  { %520 = vmatmul.mubr.msk.f32.gmra.mrb[4].mxu1 %vm86_vm0, %v83_v35  ;;  %v420_v15 = vpop.permute.xlu1 %419 }
  0xba   :  { %v84_v36 = vpop.trf.xlu0 }
  0xbb   :  { %522 = vmatprep.mubr.msk.f32.mxu1 %vm86_vm0, %v84_v36  ;;  %v425_v19 = vpop.permute.xlu1 %424 }
  0xbe   :  { %v85_v37 = vpop.trf.xlu0 }
  0xbf   :  { %523 = vmatmul.mubr.msk.f32.gmra.mrb[6].mxu1 %vm86_vm0, %v85_v37 }
  0xe6   :  { %v360_v50 = vpop.permute.xlu0 %359 }
 0x15a   :  { %v503_v43 = vpop.f32.mrb[0].mxu0 }
 0x15b   :  { %v201_v44 = vpop.f32.mrb[1].mxu0  ;;  %v428_v45 = vmul.f32 %v503_v43, %v355_v39 }
 0x15c   :  { %v427_v47 = vmul.f32 %v350_v38, %v201_v44 }
 0x15d   :  { %444 = vst [vmem:[%s683_s3 + $0x8] sm:$0xff] %v428_v45 }
 0x15e   :  { %443 = vst [vmem:[%s683_s3] sm:$0xff] %v427_v47 }
 0x162   :  { %v506_v48 = vpop.f32.mrb[2].mxu0 }
 0x163   :  { %v211_v49 = vpop.f32.mrb[3].mxu0  ;;  %v430_v52 = vmul.f32 %v506_v48, %v365_v40 }
 0x164   :  { %v429_v53 = vmul.f32 %v360_v50, %v211_v49 }
 0x165   :  { %446 = vst [vmem:[%s683_s3 + $0x18] sm:$0xff] %v430_v52 }
 0x166   :  { %445 = vst [vmem:[%s683_s3 + $0x10] sm:$0xff] %v429_v53 }
 0x16a   :  { %v509_v55 = vpop.f32.mrb[4].mxu0 }
 0x16b   :  { %v221_v56 = vpop.f32.mrb[5].mxu0  ;;  %v432_v57 = vmul.f32 %v509_v55, %v375_v42 }
 0x16c   :  { %v431_v58 = vmul.f32 %v370_v41, %v221_v56 }
 0x16d   :  { %448 = vst [vmem:[%s683_s3 + $0x28] sm:$0xff] %v432_v57 }
 0x16e   :  { %447 = vst [vmem:[%s683_s3 + $0x20] sm:$0xff] %v431_v58 }
 0x172   :  { %v512_v60 = vpop.f32.mrb[6].mxu0 }
 0x173   :  { %v231_v61 = vpop.f32.mrb[7].mxu0  ;;  %v434_v62 = vmul.f32 %v512_v60, %v385_v51 }
 0x174   :  { %v433_v0 = vmul.f32 %v380_v46, %v231_v61 }
 0x175   :  { %450 = vst [vmem:[%s683_s3 + $0x38] sm:$0xff] %v434_v62 }
 0x176   :  { %449 = vst [vmem:[%s683_s3 + $0x30] sm:$0xff] %v433_v0 }
 0x17a   :  { %v515_v1 = vpop.f32.mrb[0].mxu1 }
 0x17b   :  { %v241_v2 = vpop.f32.mrb[1].mxu1  ;;  %v436_v4 = vmul.f32 %v515_v1, %v395_v59 }
 0x17c   :  { %v435_v5 = vmul.f32 %v390_v54, %v241_v2 }
 0x17d   :  { %452 = vst [vmem:[%s683_s3 + $0x48] sm:$0xff] %v436_v4 }
 0x17e   :  { %451 = vst [vmem:[%s683_s3 + $0x40] sm:$0xff] %v435_v5 }
 0x182   :  { %v518_v7 = vpop.f32.mrb[2].mxu1 }
 0x183   :  { %v251_v8 = vpop.f32.mrb[3].mxu1  ;;  %v438_v9 = vmul.f32 %v518_v7, %v405_v3 }
 0x184   :  { %v437_v10 = vmul.f32 %v400_v63, %v251_v8 }
 0x185   :  { %454 = vst [vmem:[%s683_s3 + $0x58] sm:$0xff] %v438_v9 }
 0x186   :  { %453 = vst [vmem:[%s683_s3 + $0x50] sm:$0xff] %v437_v10 }
 0x18a   :  { %v521_v12 = vpop.f32.mrb[4].mxu1 }
 0x18b   :  { %v261_v13 = vpop.f32.mrb[5].mxu1  ;;  %v440_v14 = vmul.f32 %v521_v12, %v415_v11 }
 0x18c   :  { %v439_v16 = vmul.f32 %v410_v6, %v261_v13 }
 0x18d   :  { %456 = vst [vmem:[%s683_s3 + $0x68] sm:$0xff] %v440_v14 }
 0x18e   :  { %455 = vst [vmem:[%s683_s3 + $0x60] sm:$0xff] %v439_v16 }
 0x192   :  { %v524_v17 = vpop.f32.mrb[6].mxu1 }
 0x193   :  { %v271_v18 = vpop.f32.mrb[7].mxu1  ;;  %v442_v20 = vmul.f32 %v524_v17, %v425_v19 }
 0x194   :  { %v441_v21 = vmul.f32 %v420_v15, %v271_v18 }
 0x195   :  { %458 = vst [vmem:[%s683_s3 + $0x78] sm:$0xff] %v442_v20 }
 0x196   :  { %457 = vst [vmem:[%s683_s3 + $0x70] sm:$0xff] %v441_v21 }

// kernel: hyper_attention_forward.7
= control target key start
LH: loop header
LB: loop body
LE: loop exit
PB: predicated region body
PF: predicated region fallthrough
CT: control target
= control target key end

     0   :  { %v1417_v0 = vmov 1   ;;  %v1418_v1 = vmov 0   ;;  %v1419_v4 = vmov 2   ;;  %v1420_v9 = vmov 3   ;;  %s1421_s16 = smov 120   ;;  %s1423_s8 = smov 112   ;;  %s1731_s1 = inlined_call_operand.vmem [shape: f32[16,8], index: 1, kind: input, shape index: {}]   ;;  %s1732_s3 = inlined_call_operand.vmem [shape: f32[128,32], index: 3, kind: input, shape index: {}]   ;;  %s1733_s2 = inlined_call_operand.vmem [shape: f32[4,128], index: 2, kind: input, shape index: {}]   ;;  %s1734_s0 = inlined_call_operand.vmem [shape: f32[16,128], index: 0, kind: input, shape index: {}]   ;;  %s1735_s5 = inlined_call_operand.vmem [shape: f32[32,128], index: 5, kind: input, shape index: {}]   ;;  %s1736_s4 = inlined_call_operand.vmem [shape: f32[1,32], index: 4, kind: input, shape index: {}]   ;;  %s1737_s6 = inlined_call_operand.vmem [shape: f32[16,128], index: 6, kind: output, shape index: {}]  }
   0x1   :  { %1252 = vset.pattern.permute.xlu1 %v1417_v0  ;;  %1251 = vset.pattern.permute.xlu0 %v1418_v1  ;;  %v25_v2 = vld [vmem:[%s1731_s1] sm:$0xff]  ;;  %v26_v3 = vld [vmem:[%s1731_s1 + $0x8] sm:$0xff]  ;;  %v30_v7 = vld [vmem:[%s1732_s3 + $0x10] sm:$0xff]  ;;  %v70_v38 = vlaneseq  ;;  %v1424_v51 = vmov -1e+30   ;;  %s1427_s23 = smov 24  }
   0x2   :  { %188 = vperm.xlu1 %1252, %v25_v2   ;;  %62 = vperm.xlu0 %1251, %v25_v2   ;;  %v28_v5 = vld [vmem:[%s1732_s3] sm:$0xff]  ;;  %v29_v6 = vld [vmem:[%s1732_s3 + $0x8] sm:$0xff]  ;;  %v31_v8 = vld [vmem:[%s1732_s3 + $0x18] sm:$0xff] }
   0x3   :  { %v1257_v10 = vpack.i.bf16 %v29_v6, %v28_v5  ;;  %v1262_v11 = vpack.i.bf16 %v31_v8, %v30_v7  ;;  %v32_v12 = vld [vmem:[%s1732_s3 + $0x20] sm:$0xff]  ;;  %v33_v13 = vld [vmem:[%s1732_s3 + $0x28] sm:$0xff]  ;;  %v34_v14 = vld [vmem:[%s1732_s3 + $0x30] sm:$0xff]  ;;  %v1104_v28 = vpack.c.bf16 %v29_v6, %v28_v5  ;;  %v1108_v31 = vpack.c.bf16 %v31_v8, %v30_v7 }
   0x4   :  { %v35_v15 = vld [vmem:[%s1732_s3 + $0x38] sm:$0xff]  ;;  %v1267_v16 = vpack.i.bf16 %v33_v13, %v32_v12  ;;  %v36_v18 = vld [vmem:[%s1732_s3 + $0x40] sm:$0xff]  ;;  %v37_v19 = vld [vmem:[%s1732_s3 + $0x48] sm:$0xff]  ;;  %v1112_v32 = vpack.c.bf16 %v33_v13, %v32_v12  ;;  %v71_v39 = vshrl.u32 %v70_v38, 7 }
   0x5   :  { %v1272_v17 = vpack.i.bf16 %v35_v15, %v34_v14  ;;  %v38_v20 = vld [vmem:[%s1732_s3 + $0x50] sm:$0xff]  ;;  %v39_v21 = vld [vmem:[%s1732_s3 + $0x58] sm:$0xff]  ;;  %v1505_v22 = vpack.i.bf16 %v37_v19, %v36_v18  ;;  %v40_v24 = vld [vmem:[%s1732_s3 + $0x60] sm:$0xff]  ;;  %1105 = vmatprep.subr.bf16.mxu0 %v1104_v28  ;;  %v1116_v33 = vpack.c.bf16 %v35_v15, %v34_v14  ;;  %v1120_v34 = vpack.c.bf16 %v37_v19, %v36_v18 }
   0x6   :  { %192 = vperm.xlu1 %1252, %v26_v3   ;;  %67 = vperm.xlu0 %1251, %v26_v3   ;;  %v1507_v23 = vpack.i.bf16 %v39_v21, %v38_v20  ;;  %v41_v25 = vld [vmem:[%s1732_s3 + $0x68] sm:$0xff]  ;;  %v42_v26 = vld [vmem:[%s1732_s3 + $0x70] sm:$0xff]  ;;  %v43_v27 = vld [vmem:[%s1732_s3 + $0x78] sm:$0xff]  ;;  %s1422_s3 = smov 104   ;;  %v1124_v35 = vpack.c.bf16 %v39_v21, %v38_v20  ;;  %v197_v40 = vsub.s32 1, %v71_v39  ;;  %v72_v41 = vsub.s32 0, %v71_v39 }
   0x7   :  { %v1523_v29 = vpack.i.bf16 %v41_v25, %v40_v24  ;;  %v1525_v30 = vpack.i.bf16 %v43_v27, %v42_v26  ;;  %1107 = vmatpush3.bf16.msra.mxu0 %v1104_v28  ;;  %v1128_v36 = vpack.c.bf16 %v41_v25, %v40_v24  ;;  %v1132_v37 = vpack.c.bf16 %v43_v27, %v42_v26  ;;  %v27_v42 = vld [vmem:[%s1733_s2] sm:$0xf]  ;;  %v1549_v48 = vld [vmem:[%s1734_s0 + $0x8] sm:$0xff]  ;;  %s1426_s2 = smov 16  }
   0x8   :  { %1109 = vmatprep.subr.bf16.mxu0 %v1108_v31  ;;  %v1543_v43 = vld [vmem:[%s1734_s0] sm:$0xff]  ;;  %v198_v44 = vrot.slane %v27_v42, %v197_v40  ;;  %v73_v45 = vrot.slane %v27_v42, %v72_v41  ;;  %v386_v53 = vsub.s32 2, %v71_v39  ;;  %vm45_vm2 = vcmp.gt.f32.partialorder %v1549_v48, 0.0  ;;  %s1425_s0 = smov 8  }
   0x9   :  { %vm44_vm0 = vcmp.gt.f32.partialorder %v1543_v43, 0.0  ;;  %v47_v63 = vsel %vm45_vm2, 0.0, %v1424_v51  ;;  %v559_v0 = vsub.s32 3, %v71_v39  ;;  %vm746_vm2 = vcmask 64512  }
   0xa   :  { %1254 = vset.pattern.permute.xlu1 %v1419_v4  ;;  %1253 = vset.pattern.permute.xlu0 %v1419_v4  ;;  %v46_v52 = vsel %vm44_vm0, 0.0, %v1424_v51  ;;  %v387_v62 = vrot.slane %v27_v42, %v386_v53 }
   0xb   :  { %381 = vperm.xlu1 %1254, %v26_v3   ;;  %377 = vperm.xlu0 %1253, %v25_v2  }
   0xc   :  { %1111 = vmatpush3.bf16.msra.mxu0 %v1108_v31 }
   0xd   :  { %1113 = vmatprep.subr.bf16.mxu0 %v1112_v32 }
   0xf   :  { %1255 = vset.pattern.permute.xlu1 %v1420_v9  ;;  %1256 = vset.pattern.permute.xlu0 %v1420_v9 }
  0x10   :  { %550 = vperm.xlu1 %1255, %v25_v2   ;;  %554 = vperm.xlu0 %1256, %v26_v3  }
  0x11   :  { %1115 = vmatpush3.bf16.msra.mxu0 %v1112_v32 }
  0x12   :  { %1117 = vmatprep.subr.bf16.mxu0 %v1116_v33 }
  0x14   :  { %1258 = vrot.lane.b32.xlu0 %v1257_v10, %s1421_s16  ;;  %1263 = vrot.lane.b32.xlu1 %v1262_v11, %s1421_s16 }
  0x15   :  { %1119 = vmatpush3.bf16.msra.mxu0 %v1116_v33 }
  0x16   :  { %1121 = vmatprep.subr.bf16.mxu0 %v1120_v34 }
  0x18   :  { %1268 = vrot.lane.b32.xlu0 %v1267_v16, %s1421_s16  ;;  %1273 = vrot.lane.b32.xlu1 %v1272_v17, %s1421_s16 }
  0x19   :  { %1123 = vmatpush3.bf16.msra.mxu0 %v1120_v34 }
  0x1a   :  { %1125 = vmatprep.subr.bf16.mxu0 %v1124_v35 }
  0x1c   :  { %1278 = vrot.lane.b32.xlu0 %v1505_v22, %s1421_s16  ;;  %1283 = vrot.lane.b32.xlu1 %v1507_v23, %s1421_s16 }
  0x1d   :  { %1127 = vmatpush3.bf16.msra.mxu0 %v1124_v35 }
  0x1e   :  { %1129 = vmatprep.subr.bf16.mxu0 %v1128_v36 }
  0x20   :  { %1288 = vrot.lane.b32.xlu0 %v1523_v29, %s1421_s16  ;;  %1293 = vrot.lane.b32.xlu1 %v1525_v30, %s1421_s16 }
  0x21   :  { %1131 = vmatpush3.bf16.msra.mxu0 %v1128_v36 }
  0x22   :  { %1133 = vmatprep.subr.bf16.mxu0 %v1132_v37 }
  0x24   :  { %1303 = vrot.lane.b32.xlu1 %v1257_v10, %s1422_s3  ;;  %1298 = vrot.lane.b32.xlu0 %v1257_v10, %s1423_s8 }
  0x25   :  { %1135 = vmatpush3.bf16.msra.mxu0 %v1132_v37 }
  0x28   :  { %1323 = vrot.lane.b32.xlu1 %v1267_v16, %s1422_s3  ;;  %1308 = vrot.lane.b32.xlu0 %v1262_v11, %s1423_s8 }
  0x2c   :  { %1333 = vrot.lane.b32.xlu1 %v1272_v17, %s1422_s3  ;;  %1313 = vrot.lane.b32.xlu0 %v1262_v11, %s1422_s3  ;;  %v560_v11 = vrot.slane %v27_v42, %v559_v0 }
  0x30   :  { %1318 = vrot.lane.b32.xlu0 %v1267_v16, %s1423_s8 }
  0x34   :  { %1328 = vrot.lane.b32.xlu0 %v1272_v17, %s1423_s8 }
  0x81   :  { %v189_v46 = vpop.permute.xlu1 %188  ;;  %v63_v47 = vpop.permute.xlu0 %62 }
  0x82   :  { %v199_v49 = vadd.f32 %v198_v44, %v189_v46  ;;  %v74_v50 = vadd.f32 %v73_v45, %v63_v47 }
  0x84   :  { %v203_v54 = vmul.f32 0.2, %v199_v49  ;;  %v78_v55 = vmul.f32 0.2, %v74_v50  ;;  %vm76_vm1 = vcmp.gt.f32.partialorder %v74_v50, 0.0  ;;  %vm201_vm3 = vcmp.gt.f32.partialorder %v199_v49, 0.0 }
  0x85   :  { %v193_v56 = vpop.permute.xlu1 %192  ;;  %v68_v57 = vpop.permute.xlu0 %67 }
  0x86   :  { %v200_v58 = vadd.f32 %v198_v44, %v193_v56  ;;  %v75_v59 = vadd.f32 %v73_v45, %v68_v57  ;;  %v80_v60 = vsel %vm76_vm1, %v74_v50, %v78_v55  ;;  %v205_v3 = vsel %vm201_vm3, %v199_v49, %v203_v54 }
  0x87   :  { %v1552_v61 = vadd.f32 %v80_v60, %v46_v52  ;;  %v1557_v10 = vadd.f32 %v205_v3, %v46_v52  ;;  %vm749_vm3 = vcmask 130048  }
  0x88   :  { %v204_v1 = vmul.f32 0.2, %v200_v58  ;;  %v79_v2 = vmul.f32 0.2, %v75_v59  ;;  %vm77_vm4 = vcmp.gt.f32.partialorder %v75_v59, 0.0  ;;  %vm202_vm5 = vcmp.gt.f32.partialorder %v200_v58, 0.0 }
  0x89   :  { %84 = vmax.xlane.f32.xlu1 %v1552_v61 }
  0x8a   :  { %v378_v4 = vpop.permute.xlu0 %377  ;;  %v382_v5 = vpop.permute.xlu1 %381  ;;  %v81_v6 = vsel %vm77_vm4, %v75_v59, %v79_v2  ;;  %v206_v12 = vsel %vm202_vm5, %v200_v58, %v204_v1  ;;  %vm752_vm5 = vcmask 195584  }
  0x8b   :  { %v388_v7 = vadd.f32 %v387_v62, %v378_v4  ;;  %v389_v8 = vadd.f32 %v387_v62, %v382_v5  ;;  %v1555_v9 = vadd.f32 %v81_v6, %v47_v63  ;;  %v1561_v17 = vadd.f32 %v206_v12, %v47_v63 }
  0x8d   :  { %v392_v13 = vmul.f32 0.2, %v388_v7  ;;  %v393_v14 = vmul.f32 0.2, %v389_v8  ;;  %86 = vmax.xlane.f32.xlu0 %v1555_v9  ;;  %209 = vmax.xlane.f32.xlu1 %v1557_v10  ;;  %vm390_vm6 = vcmp.gt.f32.partialorder %v388_v7, 0.0  ;;  %vm391_vm7 = vcmp.gt.f32.partialorder %v389_v8, 0.0 }
  0x8f   :  { %v551_v15 = vpop.permute.xlu1 %550  ;;  %v555_v16 = vpop.permute.xlu0 %554  ;;  %v394_v18 = vsel %vm390_vm6, %v388_v7, %v392_v13  ;;  %v395_v19 = vsel %vm391_vm7, %v389_v8, %v393_v14  ;;  %vm782_vm7 = vcmask 261120  }
  0x90   :  { %v561_v20 = vadd.f32 %v560_v11, %v551_v15  ;;  %v562_v21 = vadd.f32 %v560_v11, %v555_v16  ;;  %v1563_v24 = vadd.f32 %v394_v18, %v46_v52  ;;  %v1566_v25 = vadd.f32 %v395_v19, %v47_v63 }
  0x91   :  { %211 = vmax.xlane.f32.xlu0 %v1561_v17 }
  0x92   :  { %v565_v26 = vmul.f32 0.2, %v561_v20  ;;  %v566_v27 = vmul.f32 0.2, %v562_v21  ;;  %398 = vmax.xlane.f32.xlu1 %v1563_v24  ;;  %vm563_vm8 = vcmp.gt.f32.partialorder %v561_v20, 0.0  ;;  %vm564_vm9 = vcmp.gt.f32.partialorder %v562_v21, 0.0 }
  0x93   :  { %v1259_v28 = vpop.permute.xlu0 %1258  ;;  %v1264_v31 = vpop.permute.xlu1 %1263 }
  0x94   :  { %v567_v32 = vsel %vm563_vm8, %v561_v20, %v565_v26  ;;  %v568_v33 = vsel %vm564_vm9, %v562_v21, %v566_v27  ;;  %v1261_v34 = vunpack.i.h.bf16 %v1259_v28  ;;  %v1260_v35 = vunpack.i.l.bf16 %v1259_v28 }
  0x95   :  { %400 = vmax.xlane.f32.xlu0 %v1566_v25  ;;  %v1570_v36 = vadd.f32 %v567_v32, %v46_v52  ;;  %v1572_v37 = vadd.f32 %v568_v33, %v47_v63  ;;  %v1266_v38 = vunpack.i.h.bf16 %v1264_v31  ;;  %v1265_v39 = vunpack.i.l.bf16 %v1264_v31 }
  0x96   :  { %v1136_v40 = vpack.c.bf16 %v1261_v34, %v1260_v35 }
  0x97   :  { %571 = vmax.xlane.f32.xlu1 %v1570_v36  ;;  %v1140_v41 = vpack.c.bf16 %v1266_v38, %v1265_v39  ;;  %v1269_v42 = vpop.permute.xlu0 %1268  ;;  %v1274_v44 = vpop.permute.xlu1 %1273 }
  0x98   :  { %1137 = vmatprep.subr.bf16.mxu1 %v1136_v40  ;;  %v1271_v45 = vunpack.i.h.bf16 %v1269_v42  ;;  %v1270_v46 = vunpack.i.l.bf16 %v1269_v42  ;;  %v1276_v49 = vunpack.i.h.bf16 %v1274_v44  ;;  %v1275_v50 = vunpack.i.l.bf16 %v1274_v44 }
  0x99   :  { %573 = vmax.xlane.f32.xlu0 %v1572_v37  ;;  %1139 = vmatpush3.bf16.msra.mxu1 %v1136_v40 }
  0x9a   :  { %v1144_v47 = vpack.c.bf16 %v1271_v45, %v1270_v46  ;;  %1141 = vmatprep.subr.bf16.mxu1 %v1140_v41  ;;  %v1148_v52 = vpack.c.bf16 %v1276_v49, %v1275_v50 }
  0x9b   :  { %v1279_v51 = vpop.permute.xlu0 %1278  ;;  %v1284_v55 = vpop.permute.xlu1 %1283 }
  0x9c   :  { %v1281_v53 = vunpack.i.h.bf16 %v1279_v51  ;;  %v1280_v54 = vunpack.i.l.bf16 %v1279_v51  ;;  %v1286_v58 = vunpack.i.h.bf16 %v1284_v55  ;;  %v1285_v59 = vunpack.i.l.bf16 %v1284_v55 }
  0x9d   :  { %1143 = vmatpush3.bf16.msra.mxu1 %v1140_v41 }
  0x9e   :  { %1145 = vmatprep.subr.bf16.mxu1 %v1144_v47  ;;  %v1152_v57 = vpack.c.bf16 %v1281_v53, %v1280_v54  ;;  %v1156_v1 = vpack.c.bf16 %v1286_v58, %v1285_v59 }
  0x9f   :  { %v1289_v56 = vpop.permute.xlu0 %1288  ;;  %v1294_v0 = vpop.permute.xlu1 %1293 }
  0xa0   :  { %v1291_v2 = vunpack.i.h.bf16 %v1289_v56  ;;  %v1290_v3 = vunpack.i.l.bf16 %v1289_v56  ;;  %v1296_v6 = vunpack.i.h.bf16 %v1294_v0  ;;  %v1295_v7 = vunpack.i.l.bf16 %v1294_v0 }
  0xa1   :  { %1147 = vmatpush3.bf16.msra.mxu1 %v1144_v47 }
  0xa2   :  { %1149 = vmatprep.subr.bf16.mxu1 %v1148_v52  ;;  %v1160_v5 = vpack.c.bf16 %v1291_v2, %v1290_v3  ;;  %v1164_v11 = vpack.c.bf16 %v1296_v6, %v1295_v7 }
  0xa3   :  { %v1299_v60 = vpop.permute.xlu0 %1298  ;;  %v1304_v8 = vpop.permute.xlu1 %1303 }
  0xa4   :  { %v1301_v62 = vunpack.i.h.bf16 %v1299_v60  ;;  %v1300_v63 = vunpack.i.l.bf16 %v1299_v60  ;;  %v1306_v12 = vunpack.i.h.bf16 %v1304_v8  ;;  %v1305_v13 = vunpack.i.l.bf16 %v1304_v8 }
  0xa5   :  { %1151 = vmatpush3.bf16.msra.mxu1 %v1148_v52 }
  0xa6   :  { %1153 = vmatprep.subr.bf16.mxu1 %v1152_v57  ;;  %v1576_v4 = vpack.c.bf16 %v1301_v62, %v1300_v63  ;;  %v1585_v14 = vpack.c.bf16 %v1306_v12, %v1305_v13 }
  0xa7   :  { %v1590_v15 = vpop.permute.xlu0 %1308  ;;  %v1594_v18 = vpop.permute.xlu1 %1323 }
  0xa8   :  { %1169 = vmatprep.subr.bf16.mxu0 %v1576_v4  ;;  %1343 = vrot.lane.b32.xlu1 %v1505_v22, %s1422_s3  ;;  %v1310_v13 = vunpack.i.l.bf16 %v1590_v15 }
  0xa9   :  { %1155 = vmatpush3.bf16.msra.mxu1 %v1152_v57 }
  0xaa   :  { %1157 = vmatprep.subr.bf16.mxu1 %v1156_v1 }
  0xab   :  { %v1592_v16 = vpop.permute.xlu0 %1313  ;;  %v1598_v20 = vpop.permute.xlu1 %1333 }
  0xac   :  { %1353 = vrot.lane.b32.xlu1 %v1507_v23, %s1422_s3 }
  0xad   :  { %1159 = vmatpush3.bf16.msra.mxu1 %v1156_v1 }
  0xae   :  { %1161 = vmatprep.subr.bf16.mxu1 %v1160_v5 }
  0xaf   :  { %1338 = vrot.lane.b32.xlu0 %v1505_v22, %s1423_s8  ;;  %v1596_v19 = vpop.permute.xlu0 %1318 }
  0xb1   :  { %1163 = vmatpush3.bf16.msra.mxu1 %v1160_v5 }
  0xb2   :  { %1165 = vmatprep.subr.bf16.mxu1 %v1164_v11 }
  0xb3   :  { %1348 = vrot.lane.b32.xlu0 %v1507_v23, %s1423_s8  ;;  %v1600_v22 = vpop.permute.xlu0 %1328 }
  0xb5   :  { %1167 = vmatpush3.bf16.msra.mxu1 %v1164_v11  ;;  %v1311_v11 = vunpack.i.h.bf16 %v1590_v15 }
  0xb6   :  { %1201 = vmatprep.subr.bf16.mxu1 %v1585_v14 }
 0x116   :  { %v1602_v21 = vpop.xlane.xlu1 %84 }
 0x117   :  { %v88_v23 = vsub.f32 %v1552_v61, %v1602_v21  ;;  %vm106_vm10 = vcmp.gt.f32.partialorder %v1602_v21, -5e+29 }
 0x119   :  { %v90_v26 = vmul.f32 1.442695, %v88_v23 }
 0x11a   :  { %v1606_v27 = vpop.xlane.xlu0 %86  ;;  %v1608_v28 = vpop.xlane.xlu1 %209 }
 0x11b   :  { %1377 = vpow2.f32 %v90_v26  ;;  %v89_v31 = vsub.f32 %v1555_v9, %v1606_v27  ;;  %v213_v32 = vsub.f32 %v1557_v10, %v1608_v28  ;;  %vm107_vm11 = vcmp.gt.f32.partialorder %v1606_v27, -5e+29 }
 0x11c   :  { %vm231_vm12 = vcmp.gt.f32.partialorder %v1608_v28, -5e+29  ;;  %v1316_v27 = vunpack.i.h.bf16 %v1592_v16 }
 0x11d   :  { %v92_v33 = vmul.f32 1.442695, %v89_v31  ;;  %v215_v34 = vmul.f32 1.442695, %v213_v32 }
 0x11e   :  { %v1614_v35 = vpop.xlane.xlu0 %211 }
 0x11f   :  { %1379 = vpow2.f32 %v92_v33  ;;  %v214_v61 = vsub.f32 %v1561_v17, %v1614_v35  ;;  %v1631_v10 = vpop.xlane.xlu1 %398  ;;  %vm232_vm13 = vcmp.gt.f32.partialorder %v1614_v35, -5e+29 }
 0x120   :  { %1381 = vpow2.f32 %v215_v34  ;;  %v402_v17 = vsub.f32 %v1563_v24, %v1631_v10  ;;  %vm420_vm14 = vcmp.gt.f32.partialorder %v1631_v10, -5e+29 }
 0x121   :  { %v217_v38 = vmul.f32 1.442695, %v214_v61  ;;  %v1172_v61 = vpack.c.bf16 %v1311_v11, %v1310_v13 }
 0x122   :  { %v1635_v42 = vpop.xlane.xlu0 %400  ;;  %v404_v44 = vmul.f32 1.442695, %v402_v17  ;;  %v1315_v17 = vunpack.i.l.bf16 %v1592_v16 }
 0x123   :  { %1383 = vpow2.f32 %v217_v38  ;;  %v403_v45 = vsub.f32 %v1566_v25, %v1635_v42  ;;  %v1321_v38 = vunpack.i.h.bf16 %v1596_v19  ;;  %vm421_vm15 = vcmp.gt.f32.partialorder %v1635_v42, -5e+29 }
 0x124   :  { %v1639_v46 = vpop.xlane.xlu1 %571  ;;  %1385 = vpow2.f32 %v404_v44  ;;  %v1331_v44 = vunpack.i.h.bf16 %v1600_v22 }
 0x125   :  { %v1378_v39 = vpop.eup %1377  ;;  %v406_v47 = vmul.f32 1.442695, %v403_v45  ;;  %v575_v49 = vsub.f32 %v1570_v36, %v1639_v46  ;;  %v1326_v45 = vunpack.i.h.bf16 %v1594_v18  ;;  %vm593_vm0 = vcmp.gt.f32.partialorder %v1639_v46, -5e+29 }
 0x126   :  { %94 = vadd.xlane.f32.xlu1 %v1378_v39  ;;  %v1643_v50 = vpop.xlane.xlu0 %573 }
 0x127   :  { %1387 = vpow2.f32 %v406_v47  ;;  %v576_v24 = vsub.f32 %v1572_v37, %v1643_v50  ;;  %v1325_v47 = vunpack.i.l.bf16 %v1594_v18  ;;  %vm594_vm1 = vcmp.gt.f32.partialorder %v1643_v50, -5e+29  ;;  %v778_v50 = vld [vmem:[%s1735_s5] sm:$0xff] }
 0x128   :  { %v1665_v37 = vpop.permute.xlu1 %1343 }
 0x129   :  { %v1618_v40 = vpop.eup %1379  ;;  %v579_v51 = vmul.f32 1.442695, %v576_v24 }
 0x12a   :  { %v1620_v41 = vpop.eup %1381  ;;  %96 = vadd.xlane.f32.xlu0 %v1618_v40  ;;  %v1667_v54 = vpop.permute.xlu0 %1338 }
 0x12b   :  { %219 = vadd.xlane.f32.xlu1 %v1620_v41  ;;  %v1341_v16 = vunpack.i.h.bf16 %v1667_v54  ;;  %v1340_v35 = vunpack.i.l.bf16 %v1667_v54 }
 0x12c   :  { %v1669_v55 = vpop.permute.xlu1 %1353 }
 0x12d   :  { %v1624_v9 = vpop.eup %1383  ;;  %v1184_v18 = vpack.c.bf16 %v1341_v16, %v1340_v35 }
 0x12e   :  { %v1647_v52 = vpop.eup %1385  ;;  %v1671_v56 = vpop.permute.xlu0 %1348 }
 0x12f   :  { %221 = vadd.xlane.f32.xlu1 %v1624_v9  ;;  %v1351_v24 = vunpack.i.h.bf16 %v1671_v56 }
 0x131   :  { %v1650_v25 = vpop.eup %1387 }
 0x140   :  { %1363 = vrot.lane.b32.xlu1 %v1523_v29, %s1422_s3  ;;  %1358 = vrot.lane.b32.xlu0 %v1523_v29, %s1423_s8  ;;  %v577_v29 = vmul.f32 1.442695, %v575_v49  ;;  %v1204_v49 = vpack.c.bf16 %v1316_v27, %v1315_v17 }
 0x142   :  { %1389 = vpow2.f32 %v577_v29  ;;  %v1336_v29 = vunpack.i.h.bf16 %v1598_v20 }
 0x143   :  { %1391 = vpow2.f32 %v579_v51 }
 0x14c   :  { %v1653_v53 = vpop.eup %1389 }
 0x14d   :  { %v1656_v36 = vpop.eup %1391 }
 0x15f   :  { %408 = vadd.xlane.f32.xlu0 %v1647_v52 }
 0x164   :  { %410 = vadd.xlane.f32.xlu1 %v1650_v25 }
 0x168   :  { %581 = vadd.xlane.f32.xlu1 %v1653_v53 }
 0x16c   :  { %583 = vadd.xlane.f32.xlu1 %v1656_v36 }
 0x175   :  { %1368 = vrot.lane.b32.xlu0 %v1525_v30, %s1423_s8 }
 0x17d   :  { %1373 = vrot.lane.b32.xlu1 %v1525_v30, %s1422_s3 }
 0x194   :  { %48 = vadd.xlane.f32.xlu0 %v1543_v43 }
 0x1a1   :  { %50 = vadd.xlane.f32.xlu1 %v1549_v48 }
 0x1b3   :  { %v95_v57 = vpop.xlane.xlu1 %94 }
 0x1b4   :  { %1393 = vrcp.f32 %v95_v57 }
 0x1b7   :  { %v97_v58 = vpop.xlane.xlu0 %96 }
 0x1b8   :  { %1395 = vrcp.f32 %v97_v58  ;;  %v220_v59 = vpop.xlane.xlu1 %219 }
 0x1b9   :  { %1397 = vrcp.f32 %v220_v59 }
 0x1bb   :  { %v1359_v54 = vpop.permute.xlu0 %1358 }
 0x1bc   :  { %v222_v60 = vpop.xlane.xlu1 %221 }
 0x1bd   :  { %1399 = vrcp.f32 %v222_v60 }
 0x1be   :  { %v1394_v30 = vpop.eup %1393 }
 0x1bf   :  { %v100_v43 = vmul.f32 %v1394_v30, %v95_v57  ;;  %v1346_v57 = vunpack.i.h.bf16 %v1665_v37 }
 0x1c1   :  { %v102_v62 = vsub.f32 2.0, %v100_v43  ;;  %v1356_v43 = vunpack.i.h.bf16 %v1669_v55 }
 0x1c2   :  { %v1396_v48 = vpop.eup %1395 }
 0x1c3   :  { %v1398_v63 = vpop.eup %1397  ;;  %v101_v0 = vmul.f32 %v1396_v48, %v97_v58  ;;  %v104_v1 = vmul.f32 %v1394_v30, %v102_v62  ;;  %v1345_v58 = vunpack.i.l.bf16 %v1665_v37  ;;  %v1355_v62 = vunpack.i.l.bf16 %v1669_v55 }
 0x1c4   :  { %v225_v2 = vmul.f32 %v1398_v63, %v220_v59  ;;  %v1361_v59 = vunpack.i.h.bf16 %v1359_v54 }
 0x1c5   :  { %v103_v3 = vsub.f32 2.0, %v101_v0  ;;  %v108_v5 = vsel %vm106_vm10, %v104_v1, 0.0  ;;  %v1216_v30 = vpack.c.bf16 %v1346_v57, %v1345_v58  ;;  %v1220_v37 = vpack.c.bf16 %v1356_v43, %v1355_v62 }
 0x1c6   :  { %v227_v6 = vsub.f32 2.0, %v225_v2  ;;  %v110_v7 = vmul.f32 %v1378_v39, %v108_v5  ;;  %v1320_v39 = vunpack.i.l.bf16 %v1596_v19  ;;  %v1330_v19 = vunpack.i.l.bf16 %v1600_v22 }
 0x1c7   :  { %v1400_v8 = vpop.eup %1399  ;;  %v105_v12 = vmul.f32 %v1396_v48, %v103_v3  ;;  %v1335_v22 = vunpack.i.l.bf16 %v1598_v20 }
 0x1c8   :  { %v226_v23 = vmul.f32 %v1400_v8, %v222_v60  ;;  %985 = vmatprep.mubr.f32.mxu0 %v110_v7  ;;  %v229_v26 = vmul.f32 %v1398_v63, %v227_v6  ;;  %v1360_v60 = vunpack.i.l.bf16 %v1359_v54 }
 0x1c9   :  { %v109_v31 = vsel %vm107_vm11, %v105_v12, 0.0  ;;  %v1212_v51 = vpack.c.bf16 %v1336_v29, %v1335_v22 }
 0x1ca   :  { %v228_v21 = vsub.f32 2.0, %v226_v23  ;;  %v111_v32 = vmul.f32 %v1618_v40, %v109_v31  ;;  %v233_v33 = vsel %vm231_vm12, %v229_v26, 0.0  ;;  %v1192_v48 = vpack.c.bf16 %v1361_v59, %v1360_v60 }
 0x1cb   :  { %v235_v34 = vmul.f32 %v1620_v41, %v233_v33  ;;  %v1176_v41 = vpack.c.bf16 %v1321_v38, %v1320_v39 }
 0x1cc   :  { %v230_v15 = vmul.f32 %v1400_v8, %v228_v21  ;;  %986 = vmatmul.mubr.f32.vlgmr.msra.gmra.mrb[0].mxu0 %v111_v32 }
 0x1cd   :  { %1020 = vmatprep.mubr.f32.mxu1 %v235_v34  ;;  %1171 = vmatpush3.bf16.msra.mxu0 %v1576_v4  ;;  %v1180_v4 = vpack.c.bf16 %v1331_v44, %v1330_v19 }
 0x1ce   :  { %1173 = vmatprep.subr.bf16.mxu0 %v1172_v61  ;;  %v234_v28 = vsel %vm232_vm13, %v230_v15, 0.0 }
 0x1cf   :  { %v236_v40 = vmul.f32 %v1624_v9, %v234_v28  ;;  %v1208_v9 = vpack.c.bf16 %v1326_v45, %v1325_v47 }
 0x1d1   :  { %1021 = vmatmul.mubr.f32.vlgmr.msra.gmra.mrb[0].mxu1 %v236_v40  ;;  %1175 = vmatpush3.bf16.msra.mxu0 %v1172_v61 }
 0x1d2   :  { %1203 = vmatpush3.bf16.msra.mxu1 %v1585_v14  ;;  %1177 = vmatprep.subr.bf16.mxu0 %v1176_v41  ;;  %v1350_v14 = vunpack.i.l.bf16 %v1671_v56  ;;  %v1364_v56 = vpop.permute.xlu1 %1363 }
 0x1d3   :  { %1205 = vmatprep.subr.bf16.mxu1 %v1204_v49  ;;  %v1366_v63 = vunpack.i.h.bf16 %v1364_v56  ;;  %v1365_v0 = vunpack.i.l.bf16 %v1364_v56 }
 0x1d4   :  { %v1188_v20 = vpack.c.bf16 %v1351_v24, %v1350_v14  ;;  %v781_v14 = vld [vmem:[%s1735_s5 + $0x18] sm:$0xff] }
 0x1d5   :  { %1179 = vmatpush3.bf16.msra.mxu0 %v1176_v41  ;;  %v1224_v1 = vpack.c.bf16 %v1366_v63, %v1365_v0 }
 0x1d6   :  { %1207 = vmatpush3.bf16.msra.mxu1 %v1204_v49  ;;  %1181 = vmatprep.subr.bf16.mxu0 %v1180_v4 }
 0x1d7   :  { %1209 = vmatprep.subr.bf16.mxu1 %v1208_v9 }
 0x1d9   :  { %1183 = vmatpush3.bf16.msra.mxu0 %v1180_v4 }
 0x1da   :  { %1211 = vmatpush3.bf16.msra.mxu1 %v1208_v9  ;;  %1185 = vmatprep.subr.bf16.mxu0 %v1184_v18 }
 0x1db   :  { %1213 = vmatprep.subr.bf16.mxu1 %v1212_v51 }
 0x1dd   :  { %1187 = vmatpush3.bf16.msra.mxu0 %v1184_v18 }
 0x1de   :  { %1215 = vmatpush3.bf16.msra.mxu1 %v1212_v51  ;;  %1189 = vmatprep.subr.bf16.mxu0 %v1188_v20 }
 0x1df   :  { %1217 = vmatprep.subr.bf16.mxu1 %v1216_v30 }
 0x1e1   :  { %1191 = vmatpush3.bf16.msra.mxu0 %v1188_v20 }
 0x1e2   :  { %1219 = vmatpush3.bf16.msra.mxu1 %v1216_v30  ;;  %1193 = vmatprep.subr.bf16.mxu0 %v1192_v48 }
 0x1e3   :  { %1221 = vmatprep.subr.bf16.mxu1 %v1220_v37 }
 0x1e5   :  { %1195 = vmatpush3.bf16.msra.mxu0 %v1192_v48 }
 0x1e6   :  { %1223 = vmatpush3.bf16.msra.mxu1 %v1220_v37 }
 0x1e7   :  { %1225 = vmatprep.subr.bf16.mxu1 %v1224_v1 }
 0x1ea   :  { %1227 = vmatpush3.bf16.msra.mxu1 %v1224_v1 }
 0x1ec   :  { %v409_v2 = vpop.xlane.xlu0 %408 }
 0x1ed   :  { %1401 = vrcp.f32 %v409_v2 }
 0x1f0   :  { %v1369_v55 = vpop.permute.xlu0 %1368 }
 0x1f1   :  { %v411_v3 = vpop.xlane.xlu1 %410  ;;  %v1371_v5 = vunpack.i.h.bf16 %v1369_v55  ;;  %v1370_v6 = vunpack.i.l.bf16 %v1369_v55 }
 0x1f2   :  { %1403 = vrcp.f32 %v411_v3 }
 0x1f3   :  { %v1196_v7 = vpack.c.bf16 %v1371_v5, %v1370_v6 }
 0x1f5   :  { %v582_v8 = vpop.xlane.xlu1 %581  ;;  %1197 = vmatprep.subr.bf16.mxu0 %v1196_v7 }
 0x1f6   :  { %1405 = vrcp.f32 %v582_v8  ;;  %1199 = vmatpush3.bf16.msra.mxu0 %v1196_v7 }
 0x1f7   :  { %v1402_v11 = vpop.eup %1401 }
 0x1f8   :  { %v414_v12 = vmul.f32 %v1402_v11, %v409_v2  ;;  %v870_v2 = vld [vmem:[%s1736_s4] ss:$0 sm:$0xff] }
 0x1f9   :  { %v584_v13 = vpop.xlane.xlu1 %583 }
 0x1fa   :  { %v416_v23 = vsub.f32 2.0, %v414_v12  ;;  %1407 = vrcp.f32 %v584_v13 }
 0x1fc   :  { %v1404_v26 = vpop.eup %1403  ;;  %v418_v31 = vmul.f32 %v1402_v11, %v416_v23 }
 0x1fd   :  { %v415_v21 = vmul.f32 %v1404_v26, %v411_v3  ;;  %v1374_v32 = vpop.permute.xlu1 %1373 }
 0x1fe   :  { %v422_v33 = vsel %vm420_vm14, %v418_v31, 0.0  ;;  %v1376_v34 = vunpack.i.h.bf16 %v1374_v32  ;;  %v1375_v61 = vunpack.i.l.bf16 %v1374_v32 }
 0x1ff   :  { %v417_v38 = vsub.f32 2.0, %v415_v21  ;;  %v424_v39 = vmul.f32 %v1647_v52, %v422_v33 }
 0x200   :  { %v1406_v15 = vpop.eup %1405  ;;  %v1228_v27 = vpack.c.bf16 %v1376_v34, %v1375_v61 }
 0x201   :  { %v419_v17 = vmul.f32 %v1404_v26, %v417_v38  ;;  %v587_v28 = vmul.f32 %v1406_v15, %v582_v8  ;;  %1055 = vmatprep.mubr.f32.mxu0 %v424_v39 }
 0x202   :  { %1229 = vmatprep.subr.bf16.mxu1 %v1228_v27 }
 0x203   :  { %v423_v40 = vsel %vm421_vm15, %v419_v17, 0.0  ;;  %v589_v41 = vsub.f32 2.0, %v587_v28  ;;  %1231 = vmatpush3.bf16.msra.mxu1 %v1228_v27 }
 0x204   :  { %v1408_v10 = vpop.eup %1407  ;;  %v425_v44 = vmul.f32 %v1650_v25, %v423_v40 }
 0x205   :  { %v591_v19 = vmul.f32 %v1406_v15, %v589_v41  ;;  %v588_v45 = vmul.f32 %v1408_v10, %v584_v13 }
 0x206   :  { %1056 = vmatmul.mubr.f32.vlgmr.msra.gmra.mrb[2].mxu0 %v425_v44 }
 0x207   :  { %v590_v52 = vsub.f32 2.0, %v588_v45  ;;  %v595_v47 = vsel %vm593_vm0, %v591_v19, 0.0 }
 0x208   :  { %v597_v49 = vmul.f32 %v1653_v53, %v595_v47  ;;  %v779_v53 = vld [vmem:[%s1735_s5 + $0x8] sm:$0xff] }
 0x209   :  { %v592_v4 = vmul.f32 %v1408_v10, %v590_v52  ;;  %v1232_v24 = vpack.c.bf16 %v779_v53, %v778_v50 }
 0x20a   :  { %1090 = vmatprep.mubr.f32.mxu1 %v597_v49 }
 0x20b   :  { %v596_v42 = vsel %vm594_vm1, %v592_v4, 0.0  ;;  %1233 = vmatprep.subr.bf16.mxu0 %v1232_v24 }
 0x20c   :  { %v598_v16 = vmul.f32 %v1656_v36, %v596_v42  ;;  %v780_v36 = vld [vmem:[%s1735_s5 + $0x10] sm:$0xff]  ;;  %1235 = vmatpush3.bf16.msra.mxu0 %v1232_v24 }
 0x20d   :  { %v1236_v57 = vpack.c.bf16 %v781_v14, %v780_v36 }
 0x20e   :  { %1091 = vmatmul.mubr.f32.vlgmr.msra.gmra.mrb[2].mxu1 %v598_v16 }
 0x20f   :  { %1237 = vmatprep.subr.bf16.mxu0 %v1236_v57 }
 0x210   :  { %1239 = vmatpush3.bf16.msra.mxu0 %v1236_v57 }
 0x221   :  { %v49_v54 = vpop.xlane.xlu0 %48 }
 0x222   :  { %vm52_vm6 = vcmp.gt.f32.partialorder %v49_v54, 0.0 }
 0x22e   :  { %v51_v58 = vpop.xlane.xlu1 %50 }
 0x22f   :  { %1409 = vrcp.f32 %v51_v58  ;;  %vm53_vm4 = vcmp.gt.f32.partialorder %v51_v58, 0.0 }
 0x230   :  { %1411 = vrcp.f32 %v49_v54 }
 0x239   :  { %v1410_v43 = vpop.eup %1409 }
 0x23a   :  { %v1412_v62 = vpop.eup %1411  ;;  %v59_v0 = vsel %vm53_vm4, %v1410_v43, 0.0 }
 0x23b   :  { %v58_v5 = vsel %vm52_vm6, %v1412_v62, 0.0 }
 0x29f   :  { %v987_v35 = vpop.f32.mrb[0].mxu0 }
 0x2a0   :  { %v178_v9 = vpop.f32.mrb[1].mxu0 }
 0x2a4   :  { %v1022_v25 = vpop.f32.mrb[0].mxu1 }
 0x2a5   :  { %726 = vrot.lane.b32.xlu1 %v1022_v25, %s1425_s0  ;;  %v367_v29 = vpop.f32.mrb[1].mxu1 }
 0x2a6   :  { %724 = vrot.lane.b32.xlu0 %v367_v29, %s1425_s0 }
 0x2d9   :  { %v1057_v46 = vpop.f32.mrb[2].mxu0 }
 0x2da   :  { %734 = vrot.lane.b32.xlu1 %v1057_v46, %s1426_s2  ;;  %v540_v22 = vpop.f32.mrb[3].mxu0 }
 0x2db   :  { %732 = vrot.lane.b32.xlu0 %v540_v22, %s1426_s2 }
 0x2e1   :  { %v1092_v18 = vpop.f32.mrb[2].mxu1 }
 0x2e2   :  { %742 = vrot.lane.b32.xlu1 %v1092_v18, %s1427_s23  ;;  %v713_v51 = vpop.f32.mrb[3].mxu1 }
 0x2e3   :  { %740 = vrot.lane.b32.xlu0 %v713_v51, %s1427_s23 }
 0x317   :  { %v727_v20 = vpop.permute.xlu1 %726 }
 0x318   :  { %v725_v59 = vpop.permute.xlu0 %724  ;;  %v748_v56 = vsel %vm746_vm2, %v987_v35, %v727_v20 }
 0x319   :  { %v747_v48 = vsel %vm746_vm2, %v178_v9, %v725_v59 }
 0x34c   :  { %v735_v60 = vpop.permute.xlu1 %734 }
 0x34d   :  { %v733_v30 = vpop.permute.xlu0 %732  ;;  %v751_v37 = vsel %vm749_vm3, %v748_v56, %v735_v60 }
 0x34e   :  { %v750_v1 = vsel %vm749_vm3, %v747_v48, %v733_v30 }
 0x354   :  { %v743_v63 = vpop.permute.xlu1 %742 }
 0x355   :  { %v754_v55 = vsel %vm752_vm5, %v751_v37, %v743_v63  ;;  %v741_v3 = vpop.permute.xlu0 %740 }
 0x356   :  { %v756_v6 = vmul.f32 %v754_v55, %v59_v0  ;;  %v753_v7 = vsel %vm752_vm5, %v750_v1, %v741_v3 }
 0x357   :  { %v755_v8 = vmul.f32 %v753_v7, %v58_v5 }
 0x358   :  { %v765_v11 = vadd.f32 %v870_v2, %v756_v6 }
 0x359   :  { %v764_v12 = vadd.f32 %v870_v2, %v755_v8 }
 0x35a   :  { %v769_v13 = vmin.f32 %v765_v11, 0.0  ;;  %vm767_vm9 = vcmp.gt.f32.partialorder %v765_v11, 0.0 }
 0x35b   :  { %v768_v23 = vmin.f32 %v764_v12, 0.0  ;;  %vm766_vm8 = vcmp.gt.f32.partialorder %v764_v12, 0.0 }
 0x35c   :  { %v772_v26 = vmul.f32 1.442695, %v769_v13 }
 0x35d   :  { %v770_v31 = vmul.f32 1.442695, %v768_v23 }
 0x35e   :  { %1413 = vpow2.f32 %v772_v26 }
 0x35f   :  { %1415 = vpow2.f32 %v770_v31 }
 0x368   :  { %v1414_v21 = vpop.eup %1413 }
 0x369   :  { %v1416_v32 = vpop.eup %1415  ;;  %v872_v33 = vadd.f32 -1.0, %v1414_v21 }
 0x36a   :  { %v871_v34 = vadd.f32 -1.0, %v1416_v32 }
 0x36b   :  { %v777_v38 = vsel %vm767_vm9, %v765_v11, %v872_v33 }
 0x36c   :  { %v776_v61 = vsel %vm766_vm8, %v764_v12, %v871_v34 }
 0x36d   :  { %1101 = vmatprep.mubr.msk.f32.mxu0 %vm782_vm7, %v776_v61 }
 0x36e   :  { %1102 = vmatmul.mubr.msk.f32.vlgmr.msra.gmra.mrb[4].mxu0 %vm782_vm7, %v777_v38 }
 0x441   :  { %v1103_v39 = vpop.f32.mrb[4].mxu0 }
 0x442   :  { %865 = vst [vmem:[%s1737_s6 + $0x8] sm:$0xff] %v1103_v39  ;;  %v855_v15 = vpop.f32.mrb[5].mxu0 }
 0x443   :  { %864 = vst [vmem:[%s1737_s6] sm:$0xff] %v855_v15 }

// kernel: hyper_attention_forward.9
= control target key start
LH: loop header
LB: loop body
LE: loop exit
PB: predicated region body
PF: predicated region fallthrough
CT: control target
= control target key end

     0   :  { %s337_s1 = inlined_call_operand.vmem [shape: f32[128,128], index: 1, kind: input, shape index: {}]   ;;  %s338_s0 = inlined_call_operand.vmem [shape: f32[16,128], index: 0, kind: input, shape index: {}]   ;;  %s339_s2 = inlined_call_operand.vmem [shape: f32[1,128], index: 2, kind: input, shape index: {}]   ;;  %s340_s3 = inlined_call_operand.vmem [shape: f32[16,128], index: 3, kind: output, shape index: {}]  }
   0x1   :  { %v28_v0 = vld [vmem:[%s337_s1] sm:$0xff]  ;;  %v29_v1 = vld [vmem:[%s337_s1 + $0x8] sm:$0xff]  ;;  %v30_v2 = vld [vmem:[%s337_s1 + $0x10] sm:$0xff] }
   0x2   :  { %v210_v3 = vpack.c.bf16 %v29_v1, %v28_v0  ;;  %v31_v4 = vld [vmem:[%s337_s1 + $0x18] sm:$0xff]  ;;  %v32_v6 = vld [vmem:[%s337_s1 + $0x20] sm:$0xff]  ;;  %v33_v7 = vld [vmem:[%s337_s1 + $0x28] sm:$0xff] }
   0x3   :  { %v214_v5 = vpack.c.bf16 %v31_v4, %v30_v2  ;;  %v218_v8 = vpack.c.bf16 %v33_v7, %v32_v6  ;;  %v14_v9 = vld [vmem:[%s338_s0] sm:$0xff]  ;;  %v34_v10 = vld [vmem:[%s337_s1 + $0x30] sm:$0xff]  ;;  %v35_v11 = vld [vmem:[%s337_s1 + $0x38] sm:$0xff] }
   0x4   :  { %211 = vmatprep.subr.bf16.mxu0 %v210_v3  ;;  %207 = vmatprep.mubr.f32.mxu0 %v14_v9  ;;  %v222_v12 = vpack.c.bf16 %v35_v11, %v34_v10  ;;  %v15_v13 = vld [vmem:[%s338_s0 + $0x8] sm:$0xff]  ;;  %v36_v14 = vld [vmem:[%s337_s1 + $0x40] sm:$0xff]  ;;  %v38_v17 = vld [vmem:[%s337_s1 + $0x50] sm:$0xff] }
   0x5   :  { %213 = vmatpush3.bf16.msra.mxu0 %v210_v3  ;;  %16 = vadd.xlane.f32.xlu0 %v14_v9  ;;  %v37_v15 = vld [vmem:[%s337_s1 + $0x48] sm:$0xff]  ;;  %v39_v18 = vld [vmem:[%s337_s1 + $0x58] sm:$0xff]  ;;  %v40_v20 = vld [vmem:[%s337_s1 + $0x60] sm:$0xff] }
   0x6   :  { %215 = vmatprep.subr.bf16.mxu0 %v214_v5  ;;  %v226_v16 = vpack.c.bf16 %v37_v15, %v36_v14  ;;  %v230_v19 = vpack.c.bf16 %v39_v18, %v38_v17  ;;  %v41_v21 = vld [vmem:[%s337_s1 + $0x68] sm:$0xff]  ;;  %v42_v23 = vld [vmem:[%s337_s1 + $0x70] sm:$0xff]  ;;  %v43_v24 = vld [vmem:[%s337_s1 + $0x78] sm:$0xff] }
   0x7   :  { %v234_v22 = vpack.c.bf16 %v41_v21, %v40_v20  ;;  %v238_v25 = vpack.c.bf16 %v43_v24, %v42_v23  ;;  %v156_v33 = vld [vmem:[%s339_s2] ss:$0 sm:$0xff] }
   0x9   :  { %217 = vmatpush3.bf16.msra.mxu0 %v214_v5  ;;  %18 = vadd.xlane.f32.xlu0 %v15_v13 }
   0xa   :  { %219 = vmatprep.subr.bf16.mxu0 %v218_v8 }
   0xd   :  { %221 = vmatpush3.bf16.msra.mxu0 %v218_v8 }
   0xe   :  { %223 = vmatprep.subr.bf16.mxu0 %v222_v12 }
  0x11   :  { %225 = vmatpush3.bf16.msra.mxu0 %v222_v12 }
  0x12   :  { %227 = vmatprep.subr.bf16.mxu0 %v226_v16 }
  0x15   :  { %229 = vmatpush3.bf16.msra.mxu0 %v226_v16 }
  0x16   :  { %231 = vmatprep.subr.bf16.mxu0 %v230_v19 }
  0x19   :  { %233 = vmatpush3.bf16.msra.mxu0 %v230_v19 }
  0x1a   :  { %235 = vmatprep.subr.bf16.mxu0 %v234_v22 }
  0x1d   :  { %237 = vmatpush3.bf16.msra.mxu0 %v234_v22 }
  0x1e   :  { %239 = vmatprep.subr.bf16.mxu0 %v238_v25 }
  0x21   :  { %241 = vmatpush3.bf16.msra.mxu0 %v238_v25 }
  0x24   :  { %208 = vmatmul.mubr.f32.vlgmr.msra.gmra.mrb[0].mxu0 %v15_v13 }
  0x92   :  { %v17_v26 = vpop.xlane.xlu0 %16 }
  0x93   :  { %242 = vrcp.f32 %v17_v26  ;;  %vm20_vm0 = vcmp.gt.f32.partialorder %v17_v26, 0.0 }
  0x96   :  { %v19_v27 = vpop.xlane.xlu0 %18 }
  0x97   :  { %244 = vrcp.f32 %v19_v27  ;;  %vm21_vm1 = vcmp.gt.f32.partialorder %v19_v27, 0.0 }
  0x9d   :  { %v243_v28 = vpop.eup %242 }
  0x9e   :  { %v26_v31 = vsel %vm20_vm0, %v243_v28, 0.0 }
  0xa1   :  { %v245_v29 = vpop.eup %244 }
  0xa2   :  { %v27_v35 = vsel %vm21_vm1, %v245_v29, 0.0 }
  0xf7   :  { %v209_v30 = vpop.f32.mrb[0].mxu0 }
  0xf8   :  { %v110_v32 = vpop.f32.mrb[1].mxu0  ;;  %v120_v36 = vmul.f32 %v209_v30, %v27_v35 }
  0xf9   :  { %v119_v34 = vmul.f32 %v110_v32, %v26_v31 }
  0xfa   :  { %v129_v38 = vadd.f32 %v156_v33, %v120_v36 }
  0xfb   :  { %v128_v37 = vadd.f32 %v156_v33, %v119_v34 }
  0xfd   :  { %130 = vmax.xlane.f32.xlu1 %v128_v37 }
 0x101   :  { %132 = vmax.xlane.f32.xlu1 %v129_v38 }
 0x18a   :  { %v131_v39 = vpop.xlane.xlu1 %130 }
 0x18b   :  { %v134_v40 = vsub.f32 %v128_v37, %v131_v39 }
 0x18d   :  { %v136_v41 = vmul.f32 1.442695, %v134_v40 }
 0x18e   :  { %v133_v42 = vpop.xlane.xlu1 %132 }
 0x18f   :  { %246 = vpow2.f32 %v136_v41  ;;  %v135_v43 = vsub.f32 %v129_v38, %v133_v42 }
 0x191   :  { %v138_v44 = vmul.f32 1.442695, %v135_v43 }
 0x193   :  { %248 = vpow2.f32 %v138_v44 }
 0x199   :  { %v247_v45 = vpop.eup %246 }
 0x19a   :  { %140 = vadd.xlane.f32.xlu0 %v247_v45 }
 0x19d   :  { %v249_v46 = vpop.eup %248 }
 0x19e   :  { %142 = vadd.xlane.f32.xlu1 %v249_v46 }
 0x227   :  { %v141_v47 = vpop.xlane.xlu0 %140 }
 0x228   :  { %250 = vlog2.f32 %v141_v47 }
 0x22b   :  { %v143_v48 = vpop.xlane.xlu1 %142 }
 0x22c   :  { %252 = vlog2.f32 %v143_v48 }
 0x232   :  { %v251_v49 = vpop.eup %250 }
 0x233   :  { %v145_v50 = vmul.f32 0.6931472, %v251_v49 }
 0x235   :  { %v148_v51 = vsub.f32 %v134_v40, %v145_v50 }
 0x236   :  { %v253_v52 = vpop.eup %252 }
 0x237   :  { %150 = vst [vmem:[%s340_s3] sm:$0xff] %v148_v51  ;;  %v147_v53 = vmul.f32 0.6931472, %v253_v52 }
 0x239   :  { %v149_v54 = vsub.f32 %v135_v43, %v147_v53 }
 0x23b   :  { %151 = vst [vmem:[%s340_s3 + $0x8] sm:$0xff] %v149_v54 }

// kernel: hyper_attention_forward.6
= control target key start
LH: loop header
LB: loop body
LE: loop exit
PB: predicated region body
PF: predicated region fallthrough
CT: control target
= control target key end

     0   :  { %v2421_v0 = vmov 0   ;;  %v2422_v3 = vmov 1   ;;  %v2423_v4 = vmov 2   ;;  %v2424_v5 = vmov 3   ;;  %s2427_s29 = smov 120   ;;  %s2430_s8 = smov 104   ;;  %s3566_s2 = inlined_call_operand.vmem [shape: f32[16,8], index: 2, kind: input, shape index: {}]   ;;  %s3567_s0 = inlined_call_operand.vmem [shape: f32[16,128], index: 0, kind: input, shape index: {}]   ;;  %s3568_s3 = inlined_call_operand.vmem [shape: f32[4,128], index: 3, kind: input, shape index: {}]   ;;  %s3569_s1 = inlined_call_operand.vmem [shape: f32[16,32], index: 1, kind: input, shape index: {}]   ;;  %s3570_s5 = inlined_call_operand.vmem [shape: f32[128,1], index: 5, kind: output, shape index: {1}]   ;;  %s3571_s4 = inlined_call_operand.vmem [shape: f32[128,32], index: 4, kind: output, shape index: {0}]  }
   0x1   :  { %2336 = vset.pattern.permute.xlu1 %v2421_v0  ;;  %2334 = vset.pattern.permute.xlu0 %v2421_v0  ;;  %v62_v1 = vld [vmem:[%s3566_s2 + $0x8] sm:$0xff]  ;;  %v61_v2 = vld [vmem:[%s3566_s2] sm:$0xff]  ;;  %v2425_v8 = vmov 1.0|1.0   ;;  %v353_v9 = vlaneseq  ;;  %v2426_v19 = vmov -1e+30  }
   0x2   :  { %350 = vperm.xlu1 %2336, %v62_v1   ;;  %345 = vperm.xlu0 %2334, %v61_v2   ;;  %v57_v6 = vld [vmem:[%s3567_s0] sm:$0xff]  ;;  %v58_v7 = vld [vmem:[%s3567_s0 + $0x8] sm:$0xff]  ;;  %vm116_vm10 = vcmask 130048   ;;  %vm40_vm11 = vcmask 7168   ;;  %s2432_s2 = smov 16   ;;  %s2433_s24 = smov 24  }
   0x3   :  { %2301 = vmatprep.subr.bf16.mxu0 %v2425_v8  ;;  %2319 = vmatprep.subr.bf16.mxu1 %v2425_v8  ;;  %v354_v10 = vshrl.u32 %v353_v9, 7  ;;  %v63_v12 = vld [vmem:[%s3568_s3] sm:$0xf]  ;;  %vm64_vm0 = vcmp.gt.f32.partialorder %v57_v6, 0.0  ;;  %vm65_vm2 = vcmp.gt.f32.partialorder %v58_v7, 0.0  ;;  %v60_v63 = vld [vmem:[%s3569_s1 + $0x8] sm:$0xff] }
   0x4   :  { %2302 = vmatpush3.bf16.msra.mxu0 %v2425_v8  ;;  %2320 = vmatpush3.bf16.msra.mxu1 %v2425_v8  ;;  %v66_v20 = vsel %vm64_vm0, 0.0, %v2426_v19  ;;  %v67_v32 = vsel %vm65_vm2, 0.0, %v2426_v19  ;;  %v59_v62 = vld [vmem:[%s3569_s1] sm:$0xff]  ;;  %s2428_s1 = smov 112  }
   0x5   :  { %v355_v11 = vsub.s32 0, %v354_v10  ;;  %v630_v14 = vsub.s32 1, %v354_v10  ;;  %v913_v24 = vsub.s32 2, %v354_v10  ;;  %v1194_v40 = vsub.s32 3, %v354_v10 }
   0x6   :  { %2337 = vset.pattern.permute.xlu1 %v2422_v3  ;;  %2335 = vset.pattern.permute.xlu0 %v2422_v3 }
   0x7   :  { %625 = vperm.xlu1 %2337, %v62_v1   ;;  %621 = vperm.xlu0 %2335, %v61_v2   ;;  %v356_v13 = vrot.slane %v63_v12, %v355_v11  ;;  %v631_v21 = vrot.slane %v63_v12, %v630_v14  ;;  %v914_v31 = vrot.slane %v63_v12, %v913_v24 }
   0x8   :  { %v1195_v48 = vrot.slane %v63_v12, %v1194_v40 }
   0xb   :  { %2338 = vset.pattern.permute.xlu0 %v2423_v4 }
   0xc   :  { %904 = vperm.xlu0 %2338, %v61_v2  }
  0x10   :  { %908 = vperm.xlu0 %2338, %v62_v1  }
  0x14   :  { %2339 = vset.pattern.permute.xlu0 %v2424_v5 }
  0x15   :  { %1185 = vperm.xlu0 %2339, %v61_v2   ;;  %v2510_v2 = vpack.i.bf16 %v60_v63, %v59_v62 }
  0x19   :  { %1189 = vperm.xlu0 %2339, %v62_v1  }
  0x30   :  { %84 = vxpose.xlu1.b32.start [1/2] (short) %v57_v6, 128 }
  0x34   :  { %85 = vxpose.xlu1.b32.end [2/2] (short) %v58_v7, 128 }
  0x81   :  { %v351_v15 = vpop.permute.xlu1 %350  ;;  %v346_v16 = vpop.permute.xlu0 %345 }
  0x82   :  { %v358_v17 = vadd.f32 %v356_v13, %v351_v15  ;;  %v357_v18 = vadd.f32 %v356_v13, %v346_v16  ;;  %v2303_v15 = vpack.c.bf16 %v60_v63, %v59_v62 }
  0x84   :  { %v362_v22 = vmul.f32 0.2, %v358_v17  ;;  %v361_v23 = vmul.f32 0.2, %v357_v18  ;;  %vm359_vm1 = vcmp.gt.f32.partialorder %v357_v18, 0.0  ;;  %vm360_vm3 = vcmp.gt.f32.partialorder %v358_v17, 0.0  ;;  %2304 = vmatprep.subr.bf16.mxu1 %v2303_v15 }
  0x86   :  { %v626_v25 = vpop.permute.xlu1 %625  ;;  %v622_v26 = vpop.permute.xlu0 %621  ;;  %v363_v27 = vsel %vm359_vm1, %v357_v18, %v361_v23  ;;  %v364_v33 = vsel %vm360_vm3, %v358_v17, %v362_v22  ;;  %v2429_v17 = vmov 0.0  }
  0x87   :  { %v633_v28 = vadd.f32 %v631_v21, %v626_v25  ;;  %v632_v29 = vadd.f32 %v631_v21, %v622_v26  ;;  %v2481_v30 = vadd.f32 %v363_v27, %v66_v20  ;;  %v2484_v37 = vadd.f32 %v364_v33, %v67_v32  ;;  %42 = vst.msk [vmem:[%s3570_s5 + $0x8] sm:$0xff] %vm40_vm11, %v2429_v17 }
  0x88   :  { %41 = vst.msk [vmem:[%s3570_s5] sm:$0xff] %vm40_vm11, %v2429_v17  ;;  %43 = vst.msk [vmem:[%s3570_s5 + $0x10] sm:$0xff] %vm40_vm11, %v2429_v17 }
  0x89   :  { %v637_v34 = vmul.f32 0.2, %v633_v28  ;;  %367 = vmax.xlane.f32.xlu0 %v2481_v30  ;;  %vm635_vm4 = vcmp.gt.f32.partialorder %v633_v28, 0.0  ;;  %v636_v35 = vmul.f32 0.2, %v632_v29  ;;  %vm634_vm5 = vcmp.gt.f32.partialorder %v632_v29, 0.0 }
  0x8a   :  { %44 = vst.msk [vmem:[%s3570_s5 + $0x18] sm:$0xff] %vm40_vm11, %v2429_v17  ;;  %45 = vst.msk [vmem:[%s3570_s5 + $0x20] sm:$0xff] %vm40_vm11, %v2429_v17 }
  0x8b   :  { %v905_v36 = vpop.permute.xlu0 %904  ;;  %v639_v39 = vsel %vm635_vm4, %v633_v28, %v637_v34  ;;  %v638_v42 = vsel %vm634_vm5, %v632_v29, %v636_v35  ;;  %46 = vst.msk [vmem:[%s3570_s5 + $0x28] sm:$0xff] %vm40_vm11, %v2429_v17  ;;  %47 = vst.msk [vmem:[%s3570_s5 + $0x30] sm:$0xff] %vm40_vm11, %v2429_v17 }
  0x8c   :  { %v915_v38 = vadd.f32 %v914_v31, %v905_v36  ;;  %v2487_v44 = vadd.f32 %v639_v39, %v67_v32  ;;  %v2490_v47 = vadd.f32 %v638_v42, %v66_v20  ;;  %48 = vst.msk [vmem:[%s3570_s5 + $0x38] sm:$0xff] %vm40_vm11, %v2429_v17  ;;  %49 = vst.msk [vmem:[%s3570_s5 + $0x40] sm:$0xff] %vm40_vm11, %v2429_v17 }
  0x8d   :  { %369 = vmax.xlane.f32.xlu0 %v2484_v37  ;;  %50 = vst.msk [vmem:[%s3570_s5 + $0x48] sm:$0xff] %vm40_vm11, %v2429_v17  ;;  %51 = vst.msk [vmem:[%s3570_s5 + $0x50] sm:$0xff] %vm40_vm11, %v2429_v17 }
  0x8e   :  { %v919_v41 = vmul.f32 0.2, %v915_v38  ;;  %vm917_vm6 = vcmp.gt.f32.partialorder %v915_v38, 0.0  ;;  %52 = vst.msk [vmem:[%s3570_s5 + $0x58] sm:$0xff] %vm40_vm11, %v2429_v17  ;;  %53 = vst.msk [vmem:[%s3570_s5 + $0x60] sm:$0xff] %vm40_vm11, %v2429_v17  ;;  %v69_v62 = vld [vmem:[%s3570_s5 + $0x8] sm:$0xff] }
  0x8f   :  { %v909_v43 = vpop.permute.xlu0 %908  ;;  %54 = vst.msk [vmem:[%s3570_s5 + $0x68] sm:$0xff] %vm40_vm11, %v2429_v17  ;;  %55 = vst.msk [vmem:[%s3570_s5 + $0x70] sm:$0xff] %vm40_vm11, %v2429_v17  ;;  %v68_v63 = vld [vmem:[%s3570_s5] sm:$0xff] }
  0x90   :  { %v921_v45 = vsel %vm917_vm6, %v915_v38, %v919_v41  ;;  %v916_v46 = vadd.f32 %v914_v31, %v909_v43  ;;  %56 = vst.msk [vmem:[%s3570_s5 + $0x78] sm:$0xff] %vm40_vm11, %v2429_v17 }
  0x91   :  { %644 = vmax.xlane.f32.xlu0 %v2487_v44  ;;  %v2492_v49 = vadd.f32 %v921_v45, %v66_v20 }
  0x92   :  { %v920_v51 = vmul.f32 0.2, %v916_v46  ;;  %vm918_vm7 = vcmp.gt.f32.partialorder %v916_v46, 0.0 }
  0x93   :  { %642 = vmax.xlane.f32.xlu1 %v2490_v47 }
  0x94   :  { %v1186_v50 = vpop.permute.xlu0 %1185  ;;  %v922_v57 = vsel %vm918_vm7, %v916_v46, %v920_v51 }
  0x95   :  { %v1196_v52 = vadd.f32 %v1195_v48, %v1186_v50  ;;  %925 = vmax.xlane.f32.xlu0 %v2492_v49  ;;  %v2499_v60 = vadd.f32 %v922_v57, %v67_v32 }
  0x97   :  { %v1200_v53 = vmul.f32 0.2, %v1196_v52  ;;  %vm1198_vm8 = vcmp.gt.f32.partialorder %v1196_v52, 0.0 }
  0x98   :  { %v1190_v54 = vpop.permute.xlu0 %1189 }
  0x99   :  { %v1197_v55 = vadd.f32 %v1195_v48, %v1190_v54  ;;  %v1202_v56 = vsel %vm1198_vm8, %v1196_v52, %v1200_v53 }
  0x9a   :  { %v2496_v58 = vadd.f32 %v1202_v56, %v66_v20 }
  0x9b   :  { %v1201_v59 = vmul.f32 0.2, %v1197_v55  ;;  %vm1199_vm9 = vcmp.gt.f32.partialorder %v1197_v55, 0.0 }
  0x9c   :  { %1206 = vmax.xlane.f32.xlu0 %v2496_v58 }
  0x9d   :  { %v1203_v61 = vsel %vm1199_vm9, %v1197_v55, %v1201_v59 }
  0x9e   :  { %v2508_v1 = vadd.f32 %v1203_v61, %v67_v32 }
  0xa0   :  { %927 = vmax.xlane.f32.xlu0 %v2499_v60 }
  0xa4   :  { %1208 = vmax.xlane.f32.xlu0 %v2508_v1  ;;  %2341 = vrot.lane.b32.xlu1 %v2510_v2, %s2427_s29 }
  0xb0   :  { %v100_v3 = vpop.trf.xlu1 }
  0xb1   :  { %2165 = vmatprep.mubr.msk.f32.mxu0 %vm116_vm10, %v100_v3 }
  0xb4   :  { %v101_v4 = vpop.trf.xlu1 }
  0xb5   :  { %2166 = vmatmul.mubr.msk.f32.vlgmr.msra.gmra.mrb[0].mxu0 %vm116_vm10, %v101_v4 }
  0xb8   :  { %v102_v5 = vpop.trf.xlu1 }
  0xb9   :  { %2168 = vmatprep.mubr.msk.f32.mxu0 %vm116_vm10, %v102_v5  ;;  %v70_v5 = vld [vmem:[%s3570_s5 + $0x10] sm:$0xff] }
  0xba   :  { %2346 = vrot.lane.b32.xlu0 %v2510_v2, %s2428_s1 }
  0xbc   :  { %v103_v6 = vpop.trf.xlu1 }
  0xbd   :  { %2169 = vmatmul.mubr.msk.f32.gmra.mrb[2].mxu0 %vm116_vm10, %v103_v6 }
  0xc0   :  { %v104_v7 = vpop.trf.xlu1 }
  0xc1   :  { %2171 = vmatprep.mubr.msk.f32.mxu0 %vm116_vm10, %v104_v7 }
  0xc4   :  { %v105_v8 = vpop.trf.xlu1 }
  0xc5   :  { %2172 = vmatmul.mubr.msk.f32.gmra.mrb[4].mxu0 %vm116_vm10, %v105_v8 }
  0xc8   :  { %v106_v9 = vpop.trf.xlu1 }
  0xc9   :  { %2174 = vmatprep.mubr.msk.f32.mxu0 %vm116_vm10, %v106_v9 }
  0xcc   :  { %v107_v10 = vpop.trf.xlu1 }
  0xcd   :  { %2175 = vmatmul.mubr.msk.f32.gmra.mrb[6].mxu0 %vm116_vm10, %v107_v10 }
  0xd0   :  { %v108_v11 = vpop.trf.xlu1 }
  0xd1   :  { %2177 = vmatprep.mubr.msk.f32.mxu1 %vm116_vm10, %v108_v11 }
  0xd4   :  { %v109_v12 = vpop.trf.xlu1 }
  0xd5   :  { %2178 = vmatmul.mubr.msk.f32.vlgmr.msra.gmra.mrb[0].mxu1 %vm116_vm10, %v109_v12  ;;  %v73_v12 = vld [vmem:[%s3570_s5 + $0x28] sm:$0xff] }
  0xd6   :  { %2306 = vmatpush3.bf16.msra.mxu1 %v2303_v15 }
  0xd8   :  { %v110_v13 = vpop.trf.xlu1 }
  0xd9   :  { %2180 = vmatprep.mubr.msk.f32.mxu1 %vm116_vm10, %v110_v13  ;;  %v72_v13 = vld [vmem:[%s3570_s5 + $0x20] sm:$0xff] }
  0xdc   :  { %v111_v14 = vpop.trf.xlu1 }
  0xdd   :  { %2181 = vmatmul.mubr.msk.f32.gmra.mrb[2].mxu1 %vm116_vm10, %v111_v14 }
  0xe0   :  { %v112_v16 = vpop.trf.xlu1 }
  0xe1   :  { %2183 = vmatprep.mubr.msk.f32.mxu1 %vm116_vm10, %v112_v16 }
  0xe4   :  { %v113_v18 = vpop.trf.xlu1 }
  0xe5   :  { %2184 = vmatmul.mubr.msk.f32.gmra.mrb[4].mxu1 %vm116_vm10, %v113_v18 }
  0xe8   :  { %v114_v19 = vpop.trf.xlu1 }
  0xe9   :  { %2186 = vmatprep.mubr.msk.f32.mxu1 %vm116_vm10, %v114_v19 }
  0xec   :  { %v115_v20 = vpop.trf.xlu1 }
  0xed   :  { %2187 = vmatmul.mubr.msk.f32.gmra.mrb[6].mxu1 %vm116_vm10, %v115_v20 }
 0x116   :  { %v2611_v21 = vpop.xlane.xlu0 %367 }
 0x117   :  { %v371_v22 = vsub.f32 %v2481_v30, %v2611_v21  ;;  %vm389_vm7 = vcmp.gt.f32.partialorder %v2611_v21, -5e+29 }
 0x119   :  { %v373_v23 = vmul.f32 1.442695, %v371_v22 }
 0x11a   :  { %v2615_v24 = vpop.xlane.xlu0 %369 }
 0x11b   :  { %2357 = vpow2.f32 %v373_v23  ;;  %v372_v25 = vsub.f32 %v2484_v37, %v2615_v24  ;;  %vm390_vm9 = vcmp.gt.f32.partialorder %v2615_v24, -5e+29 }
 0x11d   :  { %v375_v26 = vmul.f32 1.442695, %v372_v25  ;;  %v75_v25 = vld [vmem:[%s3570_s5 + $0x38] sm:$0xff] }
 0x11e   :  { %v2619_v27 = vpop.xlane.xlu0 %644 }
 0x11f   :  { %2359 = vpow2.f32 %v375_v26  ;;  %v647_v29 = vsub.f32 %v2487_v44, %v2619_v27 }
 0x120   :  { %v2621_v28 = vpop.xlane.xlu1 %642 }
 0x121   :  { %v646_v31 = vsub.f32 %v2490_v47, %v2621_v28  ;;  %v650_v34 = vmul.f32 1.442695, %v647_v29  ;;  %v74_v29 = vld [vmem:[%s3570_s5 + $0x30] sm:$0xff] }
 0x122   :  { %v2629_v35 = vpop.xlane.xlu0 %925 }
 0x123   :  { %v648_v30 = vmul.f32 1.442695, %v646_v31  ;;  %v929_v59 = vsub.f32 %v2492_v49, %v2629_v35  ;;  %v71_v49 = vld [vmem:[%s3570_s5 + $0x18] sm:$0xff] }
 0x124   :  { %v2342_v32 = vpop.permute.xlu1 %2341 }
 0x125   :  { %v2627_v33 = vpop.eup %2357  ;;  %2361 = vpow2.f32 %v648_v30  ;;  %v2344_v36 = vunpack.i.h.bf16 %v2342_v32  ;;  %v2343_v37 = vunpack.i.l.bf16 %v2342_v32 }
 0x126   :  { %377 = vadd.xlane.f32.xlu0 %v2627_v33  ;;  %2363 = vpow2.f32 %v650_v34 }
 0x127   :  { %v2307_v38 = vpack.c.bf16 %v2344_v36, %v2343_v37 }
 0x129   :  { %v2632_v39 = vpop.eup %2359  ;;  %v2634_v40 = vpop.xlane.xlu0 %1206  ;;  %2308 = vmatprep.subr.bf16.mxu0 %v2307_v38 }
 0x12a   :  { %v1210_v41 = vsub.f32 %v2496_v58, %v2634_v40  ;;  %379 = vadd.xlane.f32.xlu0 %v2632_v39  ;;  %2310 = vmatpush3.bf16.msra.mxu0 %v2307_v38 }
 0x12c   :  { %v1212_v42 = vmul.f32 1.442695, %v1210_v41 }
 0x12d   :  { %v2639_v43 = vpop.xlane.xlu0 %927 }
 0x12e   :  { %2365 = vpow2.f32 %v1212_v42  ;;  %v930_v44 = vsub.f32 %v2499_v60, %v2639_v43  ;;  %v931_v60 = vmul.f32 1.442695, %v929_v59 }
 0x12f   :  { %v2643_v45 = vpop.eup %2361 }
 0x130   :  { %v933_v46 = vmul.f32 1.442695, %v930_v44  ;;  %652 = vadd.xlane.f32.xlu1 %v2643_v45  ;;  %v2650_v50 = vpop.eup %2363  ;;  %v77_v44 = vld [vmem:[%s3570_s5 + $0x48] sm:$0xff] }
 0x131   :  { %v2646_v47 = vpop.xlane.xlu0 %1208 }
 0x132   :  { %2367 = vpow2.f32 %v933_v46  ;;  %v1211_v48 = vsub.f32 %v2508_v1, %v2646_v47 }
 0x134   :  { %v1214_v51 = vmul.f32 1.442695, %v1211_v48  ;;  %654 = vadd.xlane.f32.xlu1 %v2650_v50  ;;  %v76_v48 = vld [vmem:[%s3570_s5 + $0x40] sm:$0xff] }
 0x135   :  { %v2347_v52 = vpop.permute.xlu0 %2346 }
 0x136   :  { %2369 = vpow2.f32 %v1214_v51  ;;  %v2349_v53 = vunpack.i.h.bf16 %v2347_v52  ;;  %v2348_v54 = vunpack.i.l.bf16 %v2347_v52 }
 0x137   :  { %2371 = vpow2.f32 %v931_v60 }
 0x138   :  { %v2653_v55 = vpop.eup %2365  ;;  %v2655_v56 = vpack.c.bf16 %v2349_v53, %v2348_v54 }
 0x139   :  { %1216 = vadd.xlane.f32.xlu1 %v2653_v55 }
 0x13a   :  { %2312 = vmatprep.subr.bf16.mxu1 %v2655_v56 }
 0x13c   :  { %v2659_v57 = vpop.eup %2367 }
 0x13d   :  { %937 = vadd.xlane.f32.xlu1 %v2659_v57 }
 0x140   :  { %v2662_v58 = vpop.eup %2369  ;;  %2351 = vrot.lane.b32.xlu0 %v2510_v2, %s2430_s8 }
 0x141   :  { %1218 = vadd.xlane.f32.xlu1 %v2662_v58  ;;  %v2668_v61 = vpop.eup %2371 }
 0x15f   :  { %935 = vadd.xlane.f32.xlu0 %v2668_v61 }
 0x188   :  { %v2167_v1 = vpop.f32.mrb[0].mxu0 }
 0x189   :  { %v311_v2 = vadd.f32 %v2167_v1, %v69_v62  ;;  %v231_v3 = vpop.f32.mrb[1].mxu0 }
 0x18a   :  { %v310_v4 = vadd.f32 %v231_v3, %v68_v63 }
 0x18b   :  { %328 = vst.msk [vmem:[%s3570_s5 + $0x8] sm:$0xff] %vm40_vm11, %v311_v2  ;;  %v79_v2 = vld [vmem:[%s3570_s5 + $0x58] sm:$0xff] }
 0x18c   :  { %327 = vst.msk [vmem:[%s3570_s5] sm:$0xff] %vm40_vm11, %v310_v4  ;;  %v78_v4 = vld [vmem:[%s3570_s5 + $0x50] sm:$0xff] }
 0x190   :  { %v2170_v6 = vpop.f32.mrb[2].mxu0 }
 0x191   :  { %v313_v7 = vadd.f32 %v2170_v6, %v71_v49  ;;  %v241_v8 = vpop.f32.mrb[3].mxu0 }
 0x192   :  { %v312_v9 = vadd.f32 %v241_v8, %v70_v5  ;;  %v1760_v10 = vld [vmem:[%s3570_s5 + $0x8] sm:$0xff] }
 0x193   :  { %330 = vst.msk [vmem:[%s3570_s5 + $0x18] sm:$0xff] %vm40_vm11, %v313_v7  ;;  %2373 = vrcp.f32 %v1760_v10  ;;  %v1759_v11 = vld [vmem:[%s3570_s5] sm:$0xff]  ;;  %vm1776_vm12 = vcmp.gt.f32.partialorder %v1760_v10, 0.0 }
 0x194   :  { %329 = vst.msk [vmem:[%s3570_s5 + $0x10] sm:$0xff] %vm40_vm11, %v312_v9  ;;  %2375 = vrcp.f32 %v1759_v11  ;;  %vm1775_vm13 = vcmp.gt.f32.partialorder %v1759_v11, 0.0 }
 0x198   :  { %v2173_v14 = vpop.f32.mrb[4].mxu0 }
 0x199   :  { %v315_v15 = vadd.f32 %v2173_v14, %v73_v12  ;;  %v251_v16 = vpop.f32.mrb[5].mxu0  ;;  %v81_v14 = vld [vmem:[%s3570_s5 + $0x68] sm:$0xff] }
 0x19a   :  { %v314_v18 = vadd.f32 %v251_v16, %v72_v13  ;;  %v1762_v19 = vld [vmem:[%s3570_s5 + $0x18] sm:$0xff] }
 0x19b   :  { %332 = vst.msk [vmem:[%s3570_s5 + $0x28] sm:$0xff] %vm40_vm11, %v315_v15  ;;  %v1761_v20 = vld [vmem:[%s3570_s5 + $0x10] sm:$0xff]  ;;  %2377 = vrcp.f32 %v1762_v19  ;;  %vm1778_vm14 = vcmp.gt.f32.partialorder %v1762_v19, 0.0 }
 0x19c   :  { %331 = vst.msk [vmem:[%s3570_s5 + $0x20] sm:$0xff] %vm40_vm11, %v314_v18  ;;  %2379 = vrcp.f32 %v1761_v20  ;;  %vm1777_vm15 = vcmp.gt.f32.partialorder %v1761_v20, 0.0  ;;  %v80_v18 = vld [vmem:[%s3570_s5 + $0x60] sm:$0xff] }
 0x19d   :  { %v2374_v22 = vpop.eup %2373 }
 0x19e   :  { %v2376_v23 = vpop.eup %2375  ;;  %v2728_v26 = vsel %vm1776_vm12, %v2374_v22, 0.0 }
 0x19f   :  { %1840 = vst.msk [vmem:[%s3570_s5 + $0x8] sm:$0xff] %vm40_vm11, %v2728_v26  ;;  %v2738_v31 = vsel %vm1775_vm13, %v2376_v23, 0.0 }
 0x1a0   :  { %v2176_v30 = vpop.f32.mrb[6].mxu0  ;;  %1839 = vst.msk [vmem:[%s3570_s5] sm:$0xff] %vm40_vm11, %v2738_v31 }
 0x1a1   :  { %v317_v32 = vadd.f32 %v2176_v30, %v75_v25  ;;  %v261_v34 = vpop.f32.mrb[7].mxu0 }
 0x1a2   :  { %v316_v36 = vadd.f32 %v261_v34, %v74_v29  ;;  %v1764_v37 = vld [vmem:[%s3570_s5 + $0x28] sm:$0xff] }
 0x1a3   :  { %334 = vst.msk [vmem:[%s3570_s5 + $0x38] sm:$0xff] %vm40_vm11, %v317_v32  ;;  %v1763_v38 = vld [vmem:[%s3570_s5 + $0x20] sm:$0xff]  ;;  %2381 = vrcp.f32 %v1764_v37  ;;  %vm1780_vm0 = vcmp.gt.f32.partialorder %v1764_v37, 0.0 }
 0x1a4   :  { %333 = vst.msk [vmem:[%s3570_s5 + $0x30] sm:$0xff] %vm40_vm11, %v316_v36  ;;  %2383 = vrcp.f32 %v1763_v38  ;;  %vm1779_vm1 = vcmp.gt.f32.partialorder %v1763_v38, 0.0 }
 0x1a5   :  { %v2378_v41 = vpop.eup %2377 }
 0x1a6   :  { %v2380_v42 = vpop.eup %2379  ;;  %v2762_v46 = vsel %vm1778_vm14, %v2378_v41, 0.0  ;;  %vm664_vm14 = vcmp.gt.f32.partialorder %v2621_v28, -5e+29 }
 0x1a7   :  { %v2767_v51 = vsel %vm1777_vm15, %v2380_v42, 0.0  ;;  %1842 = vst.msk [vmem:[%s3570_s5 + $0x18] sm:$0xff] %vm40_vm11, %v2762_v46  ;;  %vm665_vm15 = vcmp.gt.f32.partialorder %v2619_v27, -5e+29 }
 0x1a8   :  { %v2179_v52 = vpop.f32.mrb[0].mxu1  ;;  %1841 = vst.msk [vmem:[%s3570_s5 + $0x10] sm:$0xff] %vm40_vm11, %v2767_v51 }
 0x1a9   :  { %v319_v53 = vadd.f32 %v2179_v52, %v77_v44  ;;  %v271_v54 = vpop.f32.mrb[1].mxu1  ;;  %v83_v44 = vld [vmem:[%s3570_s5 + $0x78] sm:$0xff] }
 0x1aa   :  { %v318_v59 = vadd.f32 %v271_v54, %v76_v48  ;;  %v1766_v60 = vld [vmem:[%s3570_s5 + $0x38] sm:$0xff]  ;;  %v82_v54 = vld [vmem:[%s3570_s5 + $0x70] sm:$0xff] }
 0x1ab   :  { %336 = vst.msk [vmem:[%s3570_s5 + $0x48] sm:$0xff] %vm40_vm11, %v319_v53  ;;  %v1765_v62 = vld [vmem:[%s3570_s5 + $0x30] sm:$0xff]  ;;  %2385 = vrcp.f32 %v1766_v60  ;;  %vm1782_vm2 = vcmp.gt.f32.partialorder %v1766_v60, 0.0 }
 0x1ac   :  { %335 = vst.msk [vmem:[%s3570_s5 + $0x40] sm:$0xff] %vm40_vm11, %v318_v59  ;;  %2387 = vrcp.f32 %v1765_v62  ;;  %vm1781_vm3 = vcmp.gt.f32.partialorder %v1765_v62, 0.0 }
 0x1ad   :  { %v2382_v63 = vpop.eup %2381 }
 0x1ae   :  { %v2384_v1 = vpop.eup %2383  ;;  %v2796_v3 = vsel %vm1780_vm0, %v2382_v63, 0.0 }
 0x1af   :  { %v2801_v49 = vsel %vm1779_vm1, %v2384_v1, 0.0  ;;  %1844 = vst.msk [vmem:[%s3570_s5 + $0x28] sm:$0xff] %vm40_vm11, %v2796_v3 }
 0x1b0   :  { %v2182_v5 = vpop.f32.mrb[2].mxu1  ;;  %1843 = vst.msk [vmem:[%s3570_s5 + $0x20] sm:$0xff] %vm40_vm11, %v2801_v49 }
 0x1b1   :  { %v321_v6 = vadd.f32 %v2182_v5, %v79_v2  ;;  %v281_v7 = vpop.f32.mrb[3].mxu1 }
 0x1b2   :  { %v320_v8 = vadd.f32 %v281_v7, %v78_v4  ;;  %v1768_v9 = vld [vmem:[%s3570_s5 + $0x48] sm:$0xff] }
 0x1b3   :  { %v378_v10 = vpop.xlane.xlu0 %377  ;;  %338 = vst.msk [vmem:[%s3570_s5 + $0x58] sm:$0xff] %vm40_vm11, %v321_v6  ;;  %v1767_v11 = vld [vmem:[%s3570_s5 + $0x40] sm:$0xff]  ;;  %2389 = vrcp.f32 %v1768_v9  ;;  %vm1784_vm4 = vcmp.gt.f32.partialorder %v1768_v9, 0.0 }
 0x1b4   :  { %2391 = vrcp.f32 %v378_v10  ;;  %337 = vst.msk [vmem:[%s3570_s5 + $0x50] sm:$0xff] %vm40_vm11, %v320_v8  ;;  %vm1783_vm5 = vcmp.gt.f32.partialorder %v1767_v11, 0.0 }
 0x1b5   :  { %v2386_v12 = vpop.eup %2385  ;;  %2393 = vrcp.f32 %v1767_v11 }
 0x1b6   :  { %v2388_v13 = vpop.eup %2387  ;;  %v2830_v15 = vsel %vm1782_vm2, %v2386_v12, 0.0  ;;  %vm948_vm2 = vcmp.gt.f32.partialorder %v2639_v43, -5e+29 }
 0x1b7   :  { %v380_v16 = vpop.xlane.xlu0 %379  ;;  %v2835_v19 = vsel %vm1781_vm3, %v2388_v13, 0.0  ;;  %1846 = vst.msk [vmem:[%s3570_s5 + $0x38] sm:$0xff] %vm40_vm11, %v2830_v15  ;;  %vm1228_vm3 = vcmp.gt.f32.partialorder %v2634_v40, -5e+29 }
 0x1b8   :  { %2395 = vrcp.f32 %v380_v16  ;;  %v2185_v20 = vpop.f32.mrb[4].mxu1  ;;  %1845 = vst.msk [vmem:[%s3570_s5 + $0x30] sm:$0xff] %vm40_vm11, %v2835_v19 }
 0x1b9   :  { %v323_v22 = vadd.f32 %v2185_v20, %v81_v14  ;;  %v291_v23 = vpop.f32.mrb[5].mxu1 }
 0x1ba   :  { %v322_v25 = vadd.f32 %v291_v23, %v80_v18  ;;  %v1770_v29 = vld [vmem:[%s3570_s5 + $0x58] sm:$0xff] }
 0x1bb   :  { %v2352_v30 = vpop.permute.xlu0 %2351  ;;  %340 = vst.msk [vmem:[%s3570_s5 + $0x68] sm:$0xff] %vm40_vm11, %v323_v22  ;;  %v1769_v32 = vld [vmem:[%s3570_s5 + $0x50] sm:$0xff]  ;;  %2397 = vrcp.f32 %v1770_v29  ;;  %vm1786_vm6 = vcmp.gt.f32.partialorder %v1770_v29, 0.0 }
 0x1bc   :  { %v2354_v34 = vunpack.i.h.bf16 %v2352_v30  ;;  %v2353_v36 = vunpack.i.l.bf16 %v2352_v30  ;;  %339 = vst.msk [vmem:[%s3570_s5 + $0x60] sm:$0xff] %vm40_vm11, %v322_v25  ;;  %2399 = vrcp.f32 %v1769_v32  ;;  %vm1785_vm8 = vcmp.gt.f32.partialorder %v1769_v32, 0.0 }
 0x1bd   :  { %v2390_v37 = vpop.eup %2389  ;;  %v653_v38 = vpop.xlane.xlu1 %652 }
 0x1be   :  { %v2392_v41 = vpop.eup %2391  ;;  %2401 = vrcp.f32 %v653_v38  ;;  %v2861_v42 = vpack.c.bf16 %v2354_v34, %v2353_v36  ;;  %v2866_v48 = vsel %vm1784_vm4, %v2390_v37, 0.0  ;;  %vm1229_vm4 = vcmp.gt.f32.partialorder %v2646_v47, -5e+29 }
 0x1bf   :  { %v2394_v52 = vpop.eup %2393  ;;  %v383_v53 = vmul.f32 %v2392_v41, %v378_v10  ;;  %1848 = vst.msk [vmem:[%s3570_s5 + $0x48] sm:$0xff] %vm40_vm11, %v2866_v48 }
 0x1c0   :  { %2316 = vmatprep.subr.bf16.mxu0 %v2861_v42  ;;  %v2188_v59 = vpop.f32.mrb[6].mxu1  ;;  %v2877_v60 = vsel %vm1783_vm5, %v2394_v52, 0.0  ;;  %vm23_vm5 = vcmask 261120  }
 0x1c1   :  { %v385_v62 = vsub.f32 2.0, %v383_v53  ;;  %v655_v63 = vpop.xlane.xlu1 %654  ;;  %v325_v1 = vadd.f32 %v2188_v59, %v83_v44  ;;  %v301_v2 = vpop.f32.mrb[7].mxu1  ;;  %1847 = vst.msk [vmem:[%s3570_s5 + $0x40] sm:$0xff] %vm40_vm11, %v2877_v60 }
 0x1c2   :  { %v2396_v4 = vpop.eup %2395  ;;  %2403 = vrcp.f32 %v655_v63  ;;  %v324_v5 = vadd.f32 %v301_v2, %v82_v54  ;;  %v1772_v6 = vld [vmem:[%s3570_s5 + $0x68] sm:$0xff]  ;;  %25 = vst.msk [vmem:[%s3571_s4 + $0x8] sm:$0xff] %vm23_vm5, %v2429_v17  ;;  %24 = vst.msk [vmem:[%s3571_s4] sm:$0xff] %vm23_vm5, %v2429_v17 }
 0x1c3   :  { %v387_v7 = vmul.f32 %v2392_v41, %v385_v62  ;;  %v384_v8 = vmul.f32 %v2396_v4, %v380_v16  ;;  %342 = vst.msk [vmem:[%s3570_s5 + $0x78] sm:$0xff] %vm40_vm11, %v325_v1  ;;  %v1771_v9 = vld [vmem:[%s3570_s5 + $0x60] sm:$0xff]  ;;  %2405 = vrcp.f32 %v1772_v6  ;;  %vm1788_vm12 = vcmp.gt.f32.partialorder %v1772_v6, 0.0 }
 0x1c4   :  { %341 = vst.msk [vmem:[%s3570_s5 + $0x70] sm:$0xff] %vm40_vm11, %v324_v5  ;;  %2407 = vrcp.f32 %v1771_v9  ;;  %vm1787_vm13 = vcmp.gt.f32.partialorder %v1771_v9, 0.0 }
 0x1c5   :  { %v2398_v10 = vpop.eup %2397  ;;  %v386_v11 = vsub.f32 2.0, %v384_v8  ;;  %v391_v12 = vsel %vm389_vm7, %v387_v7, 0.0  ;;  %26 = vst.msk [vmem:[%s3571_s4 + $0x10] sm:$0xff] %vm23_vm5, %v2429_v17  ;;  %27 = vst.msk [vmem:[%s3571_s4 + $0x18] sm:$0xff] %vm23_vm5, %v2429_v17  ;;  %vm1706_vm7 = vcmask 195584  }
 0x1c6   :  { %v2400_v13 = vpop.eup %2399  ;;  %v393_v14 = vmul.f32 %v2627_v33, %v391_v12  ;;  %v2900_v16 = vsel %vm1786_vm6, %v2398_v10, 0.0  ;;  %v1217_v27 = vpop.xlane.xlu1 %1216  ;;  %28 = vst.msk [vmem:[%s3571_s4 + $0x20] sm:$0xff] %vm23_vm5, %v2429_v17  ;;  %29 = vst.msk [vmem:[%s3571_s4 + $0x28] sm:$0xff] %vm23_vm5, %v2429_v17  ;;  %vm1673_vm6 = vcmask 64512  }
 0x1c7   :  { %v388_v18 = vmul.f32 %v2396_v4, %v386_v11  ;;  %v2902_v20 = vsel %vm1785_vm8, %v2400_v13, 0.0  ;;  %1850 = vst.msk [vmem:[%s3570_s5 + $0x58] sm:$0xff] %vm40_vm11, %v2900_v16 }
 0x1c8   :  { %v2402_v21 = vpop.eup %2401  ;;  %395 = vxpose.xlu0.b32.start [1/2] (short) %v393_v14, 128  ;;  %1849 = vst.msk [vmem:[%s3570_s5 + $0x50] sm:$0xff] %vm40_vm11, %v2902_v20 }
 0x1c9   :  { %v392_v33 = vsel %vm390_vm9, %v388_v18, 0.0  ;;  %v658_v22 = vmul.f32 %v2402_v21, %v653_v38  ;;  %30 = vst.msk [vmem:[%s3571_s4 + $0x30] sm:$0xff] %vm23_vm5, %v2429_v17  ;;  %31 = vst.msk [vmem:[%s3571_s4 + $0x38] sm:$0xff] %vm23_vm5, %v2429_v17 }
 0x1ca   :  { %v394_v23 = vmul.f32 %v2632_v39, %v392_v33  ;;  %v1774_v25 = vld [vmem:[%s3570_s5 + $0x78] sm:$0xff]  ;;  %32 = vst.msk [vmem:[%s3571_s4 + $0x40] sm:$0xff] %vm23_vm5, %v2429_v17  ;;  %33 = vst.msk [vmem:[%s3571_s4 + $0x48] sm:$0xff] %vm23_vm5, %v2429_v17 }
 0x1cb   :  { %v660_v29 = vsub.f32 2.0, %v658_v22  ;;  %v1773_v24 = vld [vmem:[%s3570_s5 + $0x70] sm:$0xff]  ;;  %vm1790_vm1 = vcmp.gt.f32.partialorder %v1774_v25, 0.0  ;;  %34 = vst.msk [vmem:[%s3571_s4 + $0x50] sm:$0xff] %vm23_vm5, %v2429_v17  ;;  %35 = vst.msk [vmem:[%s3571_s4 + $0x58] sm:$0xff] %vm23_vm5, %v2429_v17 }
 0x1cc   :  { %v2404_v30 = vpop.eup %2403  ;;  %396 = vxpose.xlu0.b32.end [2/2] (short) %v394_v23, 128  ;;  %2409 = vrcp.f32 %v1773_v24  ;;  %vm1789_vm0 = vcmp.gt.f32.partialorder %v1773_v24, 0.0  ;;  %36 = vst.msk [vmem:[%s3571_s4 + $0x60] sm:$0xff] %vm23_vm5, %v2429_v17  ;;  %37 = vst.msk [vmem:[%s3571_s4 + $0x68] sm:$0xff] %vm23_vm5, %v2429_v17 }
 0x1cd   :  { %v2406_v32 = vpop.eup %2405  ;;  %v662_v34 = vmul.f32 %v2402_v21, %v660_v29  ;;  %v659_v36 = vmul.f32 %v2404_v30, %v655_v63  ;;  %2411 = vrcp.f32 %v1774_v25  ;;  %38 = vst.msk [vmem:[%s3571_s4 + $0x70] sm:$0xff] %vm23_vm5, %v2429_v17  ;;  %39 = vst.msk [vmem:[%s3571_s4 + $0x78] sm:$0xff] %vm23_vm5, %v2429_v17 }
 0x1ce   :  { %v2408_v37 = vpop.eup %2407  ;;  %v2923_v39 = vsel %vm1788_vm12, %v2406_v32, 0.0 }
 0x1cf   :  { %v666_v38 = vsel %vm664_vm14, %v662_v34, 0.0  ;;  %v661_v41 = vsub.f32 2.0, %v659_v36  ;;  %v2925_v44 = vsel %vm1787_vm13, %v2408_v37, 0.0  ;;  %1852 = vst.msk [vmem:[%s3570_s5 + $0x68] sm:$0xff] %vm40_vm11, %v2923_v39 }
 0x1d0   :  { %v668_v52 = vmul.f32 %v2643_v45, %v666_v38  ;;  %1851 = vst.msk [vmem:[%s3570_s5 + $0x60] sm:$0xff] %vm40_vm11, %v2925_v44 }
 0x1d1   :  { %v663_v28 = vmul.f32 %v2404_v30, %v661_v41 }
 0x1d2   :  { %670 = vxpose.xlu1.b32.start [1/2] (short) %v668_v52, 128 }
 0x1d3   :  { %v667_v53 = vsel %vm665_vm15, %v663_v28, 0.0 }
 0x1d4   :  { %v669_v54 = vmul.f32 %v2650_v50, %v667_v53  ;;  %v938_v50 = vpop.xlane.xlu1 %937 }
 0x1d5   :  { %2413 = vrcp.f32 %v938_v50 }
 0x1d6   :  { %v2410_v59 = vpop.eup %2409  ;;  %671 = vxpose.xlu1.b32.end [2/2] (short) %v669_v54, 128 }
 0x1d7   :  { %v2412_v62 = vpop.eup %2411  ;;  %v2940_v63 = vsel %vm1789_vm0, %v2410_v59, 0.0 }
 0x1d8   :  { %1853 = vst.msk [vmem:[%s3570_s5 + $0x70] sm:$0xff] %vm40_vm11, %v2940_v63  ;;  %v2947_v45 = vsel %vm1790_vm1, %v2412_v62, 0.0  ;;  %v1219_v2 = vpop.xlane.xlu1 %1218 }
 0x1d9   :  { %1854 = vst.msk [vmem:[%s3570_s5 + $0x78] sm:$0xff] %vm40_vm11, %v2947_v45  ;;  %vm947_vm11 = vcmp.gt.f32.partialorder %v2629_v35, -5e+29  ;;  %s2431_s5 = smov 8  }
 0x1df   :  { %v2414_v4 = vpop.eup %2413 }
 0x1e0   :  { %v942_v6 = vmul.f32 %v2414_v4, %v938_v50 }
 0x1e2   :  { %v944_v10 = vsub.f32 2.0, %v942_v6 }
 0x1e4   :  { %v946_v14 = vmul.f32 %v2414_v4, %v944_v10 }
 0x1e6   :  { %v950_v23 = vsel %vm948_vm2, %v946_v14, 0.0 }
 0x1e7   :  { %v952_v24 = vmul.f32 %v2659_v57, %v950_v23 }
 0x1ec   :  { %v936_v1 = vpop.xlane.xlu0 %935 }
 0x1ed   :  { %2415 = vrcp.f32 %v936_v1 }
 0x1ee   :  { %2417 = vrcp.f32 %v1217_v27 }
 0x1ef   :  { %2419 = vrcp.f32 %v1219_v2 }
 0x1f7   :  { %v2416_v5 = vpop.eup %2415 }
 0x1f8   :  { %v941_v7 = vmul.f32 %v2416_v5, %v936_v1  ;;  %v2418_v9 = vpop.eup %2417 }
 0x1f9   :  { %v1222_v12 = vmul.f32 %v2418_v9, %v1217_v27  ;;  %v2420_v13 = vpop.eup %2419 }
 0x1fa   :  { %v943_v8 = vsub.f32 2.0, %v941_v7  ;;  %v1223_v33 = vmul.f32 %v2420_v13, %v1219_v2 }
 0x1fb   :  { %v1224_v21 = vsub.f32 2.0, %v1222_v12 }
 0x1fc   :  { %v945_v11 = vmul.f32 %v2416_v5, %v943_v8  ;;  %v1225_v29 = vsub.f32 2.0, %v1223_v33 }
 0x1fd   :  { %v1226_v25 = vmul.f32 %v2418_v9, %v1224_v21 }
 0x1fe   :  { %v949_v18 = vsel %vm947_vm11, %v945_v11, 0.0  ;;  %v1227_v32 = vmul.f32 %v2420_v13, %v1225_v29 }
 0x1ff   :  { %v951_v22 = vmul.f32 %v2668_v61, %v949_v18  ;;  %v1230_v30 = vsel %vm1228_vm3, %v1226_v25, 0.0 }
 0x200   :  { %v1232_v35 = vmul.f32 %v2653_v55, %v1230_v30  ;;  %v1231_v34 = vsel %vm1229_vm4, %v1227_v32, 0.0 }
 0x201   :  { %v1233_v43 = vmul.f32 %v2662_v58, %v1231_v34 }
 0x205   :  { %953 = vxpose.xlu0.b32.start [1/2] (short) %v951_v22, 128 }
 0x209   :  { %954 = vxpose.xlu0.b32.end [2/2] (short) %v952_v24, 128 }
 0x20f   :  { %1234 = vxpose.xlu1.b32.start [1/2] (short) %v1232_v35, 128 }
 0x213   :  { %1235 = vxpose.xlu1.b32.end [2/2] (short) %v1233_v43, 128 }
 0x231   :  { %2356 = vset.pattern.permute.xlu1 %v2421_v0 }
 0x232   :  { %2355 = vset.pattern.permute.xlu0 %v2421_v0 }
 0x248   :  { %v411_v61 = vpop.trf.xlu0 }
 0x249   :  { %2193 = vmatprep.mubr.msk.f32.mxu1 %vm116_vm10, %v411_v61 }
 0x24c   :  { %v412_v40 = vpop.trf.xlu0 }
 0x24d   :  { %2194 = vmatmul.mubr.msk.f32.vlgmr.msra.gmra.mrb[8].mxu1 %vm116_vm10, %v412_v40 }
 0x24e   :  { %2314 = vmatpush3.bf16.msra.mxu1 %v2655_v56 }
 0x250   :  { %v413_v47 = vpop.trf.xlu0 }
 0x251   :  { %2196 = vmatprep.mubr.msk.f32.mxu1 %vm116_vm10, %v413_v47 }
 0x252   :  { %v686_v55 = vpop.trf.xlu1 }
 0x253   :  { %2221 = vmatprep.mubr.msk.f32.mxu0 %vm116_vm10, %v686_v55 }
 0x254   :  { %v414_v57 = vpop.trf.xlu0 }
 0x255   :  { %2197 = vmatmul.mubr.msk.f32.gmra.mrb[10].mxu1 %vm116_vm10, %v414_v57 }
 0x256   :  { %v687_v58 = vpop.trf.xlu1 }
 0x257   :  { %2222 = vmatmul.mubr.msk.f32.vlgmr.msra.gmra.mrb[8].mxu0 %vm116_vm10, %v687_v58 }
 0x258   :  { %2318 = vmatpush3.bf16.msra.mxu0 %v2861_v42  ;;  %v415_v0 = vpop.trf.xlu0 }
 0x259   :  { %2199 = vmatprep.mubr.msk.f32.mxu1 %vm116_vm10, %v415_v0 }
 0x25a   :  { %v688_v36 = vpop.trf.xlu1 }
 0x25b   :  { %2224 = vmatprep.mubr.msk.f32.mxu0 %vm116_vm10, %v688_v36 }
 0x25c   :  { %v416_v56 = vpop.trf.xlu0 }
 0x25d   :  { %2200 = vmatmul.mubr.msk.f32.gmra.mrb[12].mxu1 %vm116_vm10, %v416_v56 }
 0x25e   :  { %v689_v37 = vpop.trf.xlu1 }
 0x25f   :  { %2225 = vmatmul.mubr.msk.f32.gmra.mrb[10].mxu0 %vm116_vm10, %v689_v37 }
 0x260   :  { %v417_v38 = vpop.trf.xlu0 }
 0x261   :  { %2202 = vmatprep.mubr.msk.f32.mxu1 %vm116_vm10, %v417_v38 }
 0x262   :  { %v690_v41 = vpop.trf.xlu1 }
 0x263   :  { %2227 = vmatprep.mubr.msk.f32.mxu0 %vm116_vm10, %v690_v41 }
 0x264   :  { %v418_v52 = vpop.trf.xlu0 }
 0x265   :  { %2203 = vmatmul.mubr.msk.f32.gmra.mrb[14].mxu1 %vm116_vm10, %v418_v52 }
 0x266   :  { %v691_v42 = vpop.trf.xlu1 }
 0x267   :  { %2228 = vmatmul.mubr.msk.f32.gmra.mrb[12].mxu0 %vm116_vm10, %v691_v42 }
 0x268   :  { %v419_v28 = vpop.trf.xlu0 }
 0x269   :  { %1878 = vperm.xlu1 %2356, %v2728_v26   ;;  %2205 = vmatprep.mubr.msk.f32.mxu1 %vm116_vm10, %v419_v28 }
 0x26a   :  { %v692_v53 = vpop.trf.xlu1  ;;  %1873 = vperm.xlu0 %2355, %v2738_v31  }
 0x26b   :  { %2230 = vmatprep.mubr.msk.f32.mxu0 %vm116_vm10, %v692_v53 }
 0x26c   :  { %v420_v54 = vpop.trf.xlu0 }
 0x26d   :  { %1883 = vperm.xlu1 %2356, %v2767_v51   ;;  %2206 = vmatmul.mubr.msk.f32.gmra.mrb[16].mxu1 %vm116_vm10, %v420_v54 }
 0x26e   :  { %v693_v59 = vpop.trf.xlu1  ;;  %1888 = vperm.xlu0 %2355, %v2762_v46  }
 0x26f   :  { %2231 = vmatmul.mubr.msk.f32.gmra.mrb[14].mxu0 %vm116_vm10, %v693_v59 }
 0x270   :  { %v421_v62 = vpop.trf.xlu0 }
 0x271   :  { %1893 = vperm.xlu1 %2356, %v2801_v49   ;;  %2208 = vmatprep.mubr.msk.f32.mxu1 %vm116_vm10, %v421_v62 }
 0x272   :  { %v694_v26 = vpop.trf.xlu1  ;;  %1898 = vperm.xlu0 %2355, %v2796_v3  }
 0x273   :  { %2233 = vmatprep.mubr.msk.f32.mxu0 %vm116_vm10, %v694_v26 }
 0x274   :  { %v422_v31 = vpop.trf.xlu0 }
 0x275   :  { %1903 = vperm.xlu1 %2356, %v2835_v19   ;;  %2209 = vmatmul.mubr.msk.f32.gmra.mrb[18].mxu1 %vm116_vm10, %v422_v31 }
 0x276   :  { %v695_v51 = vpop.trf.xlu1  ;;  %1908 = vperm.xlu0 %2355, %v2830_v15  }
 0x277   :  { %2234 = vmatmul.mubr.msk.f32.gmra.mrb[16].mxu0 %vm116_vm10, %v695_v51 }
 0x278   :  { %v423_v46 = vpop.trf.xlu0 }
 0x279   :  { %1913 = vperm.xlu1 %2356, %v2877_v60   ;;  %2211 = vmatprep.mubr.msk.f32.mxu1 %vm116_vm10, %v423_v46 }
 0x27a   :  { %v696_v49 = vpop.trf.xlu1  ;;  %1918 = vperm.xlu0 %2355, %v2866_v48  }
 0x27b   :  { %2236 = vmatprep.mubr.msk.f32.mxu0 %vm116_vm10, %v696_v49 }
 0x27c   :  { %v424_v3 = vpop.trf.xlu0 }
 0x27d   :  { %1923 = vperm.xlu1 %2356, %v2902_v20   ;;  %2212 = vmatmul.mubr.msk.f32.gmra.mrb[20].mxu1 %vm116_vm10, %v424_v3 }
 0x27e   :  { %v697_v19 = vpop.trf.xlu1  ;;  %1928 = vperm.xlu0 %2355, %v2900_v16  }
 0x27f   :  { %2237 = vmatmul.mubr.msk.f32.gmra.mrb[18].mxu0 %vm116_vm10, %v697_v19 }
 0x280   :  { %v425_v15 = vpop.trf.xlu0 }
 0x281   :  { %1933 = vperm.xlu1 %2356, %v2925_v44   ;;  %2214 = vmatprep.mubr.msk.f32.mxu1 %vm116_vm10, %v425_v15 }
 0x282   :  { %v698_v60 = vpop.trf.xlu1  ;;  %1938 = vperm.xlu0 %2355, %v2923_v39  }
 0x283   :  { %2239 = vmatprep.mubr.msk.f32.mxu0 %vm116_vm10, %v698_v60 }
 0x284   :  { %v426_v48 = vpop.trf.xlu0 }
 0x285   :  { %2215 = vmatmul.mubr.msk.f32.gmra.mrb[22].mxu1 %vm116_vm10, %v426_v48 }
 0x286   :  { %v699_v20 = vpop.trf.xlu1 }
 0x287   :  { %2240 = vmatmul.mubr.msk.f32.gmra.mrb[20].mxu0 %vm116_vm10, %v699_v20 }
 0x288   :  { %v969_v27 = vpop.trf.xlu0 }
 0x289   :  { %2249 = vmatprep.mubr.msk.f32.mxu1 %vm116_vm10, %v969_v27 }
 0x28a   :  { %v700_v16 = vpop.trf.xlu1 }
 0x28b   :  { %2242 = vmatprep.mubr.msk.f32.mxu0 %vm116_vm10, %v700_v16 }
 0x28c   :  { %v970_v44 = vpop.trf.xlu0 }
 0x28d   :  { %2250 = vmatmul.mubr.msk.f32.vlgmr.msra.gmra.mrb[24].mxu1 %vm116_vm10, %v970_v44 }
 0x28e   :  { %v701_v50 = vpop.trf.xlu1 }
 0x28f   :  { %2243 = vmatmul.mubr.msk.f32.gmra.mrb[22].mxu0 %vm116_vm10, %v701_v50 }
 0x290   :  { %v971_v39 = vpop.trf.xlu0 }
 0x291   :  { %2252 = vmatprep.mubr.msk.f32.mxu1 %vm116_vm10, %v971_v39 }
 0x292   :  { %v1250_v1 = vpop.trf.xlu1 }
 0x293   :  { %2277 = vmatprep.mubr.msk.f32.mxu0 %vm116_vm10, %v1250_v1 }
 0x294   :  { %v972_v2 = vpop.trf.xlu0 }
 0x295   :  { %2253 = vmatmul.mubr.msk.f32.gmra.mrb[26].mxu1 %vm116_vm10, %v972_v2 }
 0x296   :  { %v1251_v4 = vpop.trf.xlu1 }
 0x297   :  { %2278 = vmatmul.mubr.msk.f32.vlgmr.msra.gmra.mrb[24].mxu0 %vm116_vm10, %v1251_v4 }
 0x298   :  { %v973_v5 = vpop.trf.xlu0 }
 0x299   :  { %2255 = vmatprep.mubr.msk.f32.mxu1 %vm116_vm10, %v973_v5 }
 0x29a   :  { %v1252_v6 = vpop.trf.xlu1 }
 0x29b   :  { %2280 = vmatprep.mubr.msk.f32.mxu0 %vm116_vm10, %v1252_v6 }
 0x29c   :  { %v974_v7 = vpop.trf.xlu0 }
 0x29d   :  { %2256 = vmatmul.mubr.msk.f32.gmra.mrb[28].mxu1 %vm116_vm10, %v974_v7 }
 0x29e   :  { %v1253_v8 = vpop.trf.xlu1 }
 0x29f   :  { %2281 = vmatmul.mubr.msk.f32.gmra.mrb[26].mxu0 %vm116_vm10, %v1253_v8 }
 0x2a0   :  { %v975_v9 = vpop.trf.xlu0 }
 0x2a1   :  { %2258 = vmatprep.mubr.msk.f32.mxu1 %vm116_vm10, %v975_v9 }
 0x2a2   :  { %v1254_v10 = vpop.trf.xlu1 }
 0x2a3   :  { %2283 = vmatprep.mubr.msk.f32.mxu0 %vm116_vm10, %v1254_v10 }
 0x2a4   :  { %v976_v11 = vpop.trf.xlu0 }
 0x2a5   :  { %2259 = vmatmul.mubr.msk.f32.gmra.mrb[30].mxu1 %vm116_vm10, %v976_v11 }
 0x2a6   :  { %v1255_v12 = vpop.trf.xlu1 }
 0x2a7   :  { %2284 = vmatmul.mubr.msk.f32.gmra.mrb[28].mxu0 %vm116_vm10, %v1255_v12 }
 0x2a8   :  { %v977_v13 = vpop.trf.xlu0 }
 0x2a9   :  { %2261 = vmatprep.mubr.msk.f32.mxu1 %vm116_vm10, %v977_v13 }
 0x2aa   :  { %v1256_v14 = vpop.trf.xlu1 }
 0x2ab   :  { %2286 = vmatprep.mubr.msk.f32.mxu0 %vm116_vm10, %v1256_v14 }
 0x2ac   :  { %v978_v18 = vpop.trf.xlu0 }
 0x2ad   :  { %2262 = vmatmul.mubr.msk.f32.gmra.mrb[32].mxu1 %vm116_vm10, %v978_v18 }
 0x2ae   :  { %v1257_v21 = vpop.trf.xlu1 }
 0x2af   :  { %2287 = vmatmul.mubr.msk.f32.gmra.mrb[30].mxu0 %vm116_vm10, %v1257_v21 }
 0x2b0   :  { %v979_v33 = vpop.trf.xlu0 }
 0x2b1   :  { %2264 = vmatprep.mubr.msk.f32.mxu1 %vm116_vm10, %v979_v33 }
 0x2b2   :  { %v1258_v22 = vpop.trf.xlu1 }
 0x2b3   :  { %2289 = vmatprep.mubr.msk.f32.mxu0 %vm116_vm10, %v1258_v22 }
 0x2b4   :  { %v980_v23 = vpop.trf.xlu0 }
 0x2b5   :  { %2265 = vmatmul.mubr.msk.f32.gmra.mrb[34].mxu1 %vm116_vm10, %v980_v23 }
 0x2b6   :  { %v1259_v25 = vpop.trf.xlu1 }
 0x2b7   :  { %2290 = vmatmul.mubr.msk.f32.gmra.mrb[32].mxu0 %vm116_vm10, %v1259_v25 }
 0x2b8   :  { %v981_v29 = vpop.trf.xlu0 }
 0x2b9   :  { %2267 = vmatprep.mubr.msk.f32.mxu1 %vm116_vm10, %v981_v29 }
 0x2ba   :  { %v1260_v24 = vpop.trf.xlu1 }
 0x2bb   :  { %2292 = vmatprep.mubr.msk.f32.mxu0 %vm116_vm10, %v1260_v24 }
 0x2bc   :  { %v982_v30 = vpop.trf.xlu0 }
 0x2bd   :  { %2268 = vmatmul.mubr.msk.f32.gmra.mrb[36].mxu1 %vm116_vm10, %v982_v30 }
 0x2be   :  { %v1261_v32 = vpop.trf.xlu1 }
 0x2bf   :  { %2293 = vmatmul.mubr.msk.f32.gmra.mrb[34].mxu0 %vm116_vm10, %v1261_v32 }
 0x2c0   :  { %v983_v35 = vpop.trf.xlu0 }
 0x2c1   :  { %2270 = vmatprep.mubr.msk.f32.mxu1 %vm116_vm10, %v983_v35 }
 0x2c2   :  { %v1262_v34 = vpop.trf.xlu1 }
 0x2c3   :  { %2295 = vmatprep.mubr.msk.f32.mxu0 %vm116_vm10, %v1262_v34 }
 0x2c4   :  { %v984_v43 = vpop.trf.xlu0 }
 0x2c5   :  { %2271 = vmatmul.mubr.msk.f32.gmra.mrb[38].mxu1 %vm116_vm10, %v984_v43 }
 0x2c6   :  { %v1263_v61 = vpop.trf.xlu1 }
 0x2c7   :  { %2296 = vmatmul.mubr.msk.f32.gmra.mrb[36].mxu0 %vm116_vm10, %v1263_v61 }
 0x2ca   :  { %v1264_v40 = vpop.trf.xlu1 }
 0x2cb   :  { %2298 = vmatprep.mubr.msk.f32.mxu0 %vm116_vm10, %v1264_v40 }
 0x2ce   :  { %v1265_v47 = vpop.trf.xlu1 }
 0x2cf   :  { %2299 = vmatmul.mubr.msk.f32.gmra.mrb[38].mxu0 %vm116_vm10, %v1265_v47 }
 0x2e9   :  { %v3182_v13 = vpop.permute.xlu0 %1873 }
 0x2ed   :  { %v3187_v21 = vpop.permute.xlu0 %1888 }
 0x2f1   :  { %v3192_v29 = vpop.permute.xlu0 %1898 }
 0x2f5   :  { %v3197_v34 = vpop.permute.xlu0 %1908 }
 0x2f9   :  { %v3202_v40 = vpop.permute.xlu0 %1918 }
 0x320   :  { %v3044_v55 = vpop.f32.mrb[8].mxu1 }
 0x321   :  { %v3046_v57 = vpop.f32.mrb[9].mxu1 }
 0x328   :  { %v3048_v58 = vpop.f32.mrb[10].mxu1 }
 0x329   :  { %v3050_v0 = vpop.f32.mrb[11].mxu1 }
 0x32a   :  { %v2223_v36 = vpop.f32.mrb[8].mxu0 }
 0x32b   :  { %1499 = vrot.lane.b32.xlu1 %v2223_v36, %s2431_s5  ;;  %v824_v56 = vpop.f32.mrb[9].mxu0 }
 0x32c   :  { %1497 = vrot.lane.b32.xlu0 %v824_v56, %s2431_s5  ;;  %v3207_v56 = vpop.permute.xlu0 %1928 }
 0x330   :  { %v3054_v37 = vpop.f32.mrb[12].mxu1 }
 0x331   :  { %v3056_v38 = vpop.f32.mrb[13].mxu1 }
 0x332   :  { %v2226_v41 = vpop.f32.mrb[10].mxu0 }
 0x333   :  { %v834_v52 = vpop.f32.mrb[11].mxu0  ;;  %1503 = vrot.lane.b32.xlu0 %v2226_v41, %s2431_s5 }
 0x337   :  { %1501 = vrot.lane.b32.xlu0 %v834_v52, %s2431_s5 }
 0x338   :  { %v3060_v42 = vpop.f32.mrb[14].mxu1 }
 0x339   :  { %v3062_v28 = vpop.f32.mrb[15].mxu1 }
 0x33a   :  { %v2229_v53 = vpop.f32.mrb[12].mxu0 }
 0x33b   :  { %v844_v54 = vpop.f32.mrb[13].mxu0  ;;  %1507 = vrot.lane.b32.xlu0 %v2229_v53, %s2431_s5 }
 0x33f   :  { %1505 = vrot.lane.b32.xlu0 %v844_v54, %s2431_s5 }
 0x340   :  { %v3066_v59 = vpop.f32.mrb[16].mxu1 }
 0x341   :  { %v3068_v62 = vpop.f32.mrb[17].mxu1 }
 0x342   :  { %v2232_v26 = vpop.f32.mrb[14].mxu0 }
 0x343   :  { %v854_v31 = vpop.f32.mrb[15].mxu0  ;;  %1511 = vrot.lane.b32.xlu0 %v2232_v26, %s2431_s5  ;;  %v3212_v26 = vpop.permute.xlu1 %1878 }
 0x347   :  { %1509 = vrot.lane.b32.xlu0 %v854_v31, %s2431_s5  ;;  %v3214_v31 = vpop.permute.xlu0 %1938 }
 0x348   :  { %v3072_v51 = vpop.f32.mrb[18].mxu1 }
 0x349   :  { %v3074_v46 = vpop.f32.mrb[19].mxu1 }
 0x34a   :  { %v2235_v49 = vpop.f32.mrb[16].mxu0 }
 0x34b   :  { %1515 = vrot.lane.b32.xlu1 %v2235_v49, %s2431_s5  ;;  %v864_v3 = vpop.f32.mrb[17].mxu0 }
 0x34c   :  { %1513 = vrot.lane.b32.xlu0 %v864_v3, %s2431_s5 }
 0x350   :  { %v3078_v19 = vpop.f32.mrb[20].mxu1 }
 0x351   :  { %v3080_v15 = vpop.f32.mrb[21].mxu1 }
 0x352   :  { %v2238_v60 = vpop.f32.mrb[18].mxu0 }
 0x353   :  { %1519 = vrot.lane.b32.xlu1 %v2238_v60, %s2431_s5  ;;  %v874_v48 = vpop.f32.mrb[19].mxu0  ;;  %v3218_v60 = vpop.permute.xlu1 %1883 }
 0x354   :  { %1517 = vrot.lane.b32.xlu0 %v874_v48, %s2431_s5 }
 0x358   :  { %v3084_v20 = vpop.f32.mrb[22].mxu1 }
 0x359   :  { %v3166_v27 = vpop.f32.mrb[23].mxu1 }
 0x35a   :  { %v2241_v16 = vpop.f32.mrb[20].mxu0 }
 0x35b   :  { %1523 = vrot.lane.b32.xlu1 %v2241_v16, %s2431_s5  ;;  %v884_v44 = vpop.f32.mrb[21].mxu0 }
 0x35c   :  { %1521 = vrot.lane.b32.xlu0 %v884_v44, %s2431_s5  ;;  %v3224_v44 = vpop.permute.xlu1 %1893 }
 0x360   :  { %v2251_v50 = vpop.f32.mrb[24].mxu1 }
 0x361   :  { %v1105_v39 = vpop.f32.mrb[25].mxu1 }
 0x362   :  { %v2244_v1 = vpop.f32.mrb[22].mxu0 }
 0x363   :  { %1527 = vrot.lane.b32.xlu1 %v2244_v1, %s2431_s5  ;;  %v894_v2 = vpop.f32.mrb[23].mxu0 }
 0x364   :  { %1525 = vrot.lane.b32.xlu0 %v894_v2, %s2431_s5 }
 0x367   :  { %1563 = vrot.lane.b32.xlu1 %v2251_v50, %s2432_s2 }
 0x368   :  { %1561 = vrot.lane.b32.xlu0 %v1105_v39, %s2432_s2  ;;  %v2254_v17 = vpop.f32.mrb[26].mxu1  ;;  %v3226_v39 = vpop.permute.xlu1 %1903 }
 0x369   :  { %v1115_v4 = vpop.f32.mrb[27].mxu1 }
 0x36a   :  { %v2279_v5 = vpop.f32.mrb[24].mxu0 }
 0x36b   :  { %v1386_v6 = vpop.f32.mrb[25].mxu0  ;;  %1627 = vrot.lane.b32.xlu1 %v2279_v5, %s2433_s24 }
 0x36c   :  { %1625 = vrot.lane.b32.xlu0 %v1386_v6, %s2433_s24  ;;  %v3228_v2 = vpop.permute.xlu1 %1913 }
 0x36f   :  { %1567 = vrot.lane.b32.xlu1 %v2254_v17, %s2432_s2 }
 0x370   :  { %1565 = vrot.lane.b32.xlu0 %v1115_v4, %s2432_s2  ;;  %v2257_v7 = vpop.f32.mrb[28].mxu1  ;;  %v3230_v4 = vpop.permute.xlu1 %1923 }
 0x371   :  { %v1125_v8 = vpop.f32.mrb[29].mxu1 }
 0x372   :  { %v2282_v9 = vpop.f32.mrb[26].mxu0 }
 0x373   :  { %v1396_v10 = vpop.f32.mrb[27].mxu0  ;;  %1631 = vrot.lane.b32.xlu1 %v2282_v9, %s2433_s24 }
 0x374   :  { %1629 = vrot.lane.b32.xlu0 %v1396_v10, %s2433_s24  ;;  %v3234_v6 = vpop.permute.xlu1 %1933 }
 0x377   :  { %1571 = vrot.lane.b32.xlu1 %v2257_v7, %s2432_s2 }
 0x378   :  { %1569 = vrot.lane.b32.xlu0 %v1125_v8, %s2432_s2  ;;  %v2260_v11 = vpop.f32.mrb[30].mxu1 }
 0x379   :  { %v1135_v12 = vpop.f32.mrb[31].mxu1 }
 0x37a   :  { %v2285_v14 = vpop.f32.mrb[28].mxu0 }
 0x37b   :  { %v1406_v18 = vpop.f32.mrb[29].mxu0  ;;  %1635 = vrot.lane.b32.xlu1 %v2285_v14, %s2433_s24 }
 0x37c   :  { %1633 = vrot.lane.b32.xlu0 %v1406_v18, %s2433_s24 }
 0x37f   :  { %1575 = vrot.lane.b32.xlu1 %v2260_v11, %s2432_s2 }
 0x380   :  { %1573 = vrot.lane.b32.xlu0 %v1135_v12, %s2432_s2  ;;  %v2263_v33 = vpop.f32.mrb[32].mxu1 }
 0x381   :  { %v1145_v22 = vpop.f32.mrb[33].mxu1 }
 0x382   :  { %v2288_v23 = vpop.f32.mrb[30].mxu0 }
 0x383   :  { %v1416_v25 = vpop.f32.mrb[31].mxu0  ;;  %1639 = vrot.lane.b32.xlu1 %v2288_v23, %s2433_s24 }
 0x384   :  { %1637 = vrot.lane.b32.xlu0 %v1416_v25, %s2433_s24  ;;  %v1466_v25 = vld [vmem:[%s3571_s4 + $0x8] sm:$0xff] }
 0x387   :  { %1579 = vrot.lane.b32.xlu1 %v2263_v33, %s2432_s2 }
 0x388   :  { %1577 = vrot.lane.b32.xlu0 %v1145_v22, %s2432_s2  ;;  %v2266_v24 = vpop.f32.mrb[34].mxu1 }
 0x389   :  { %v1155_v30 = vpop.f32.mrb[35].mxu1 }
 0x38a   :  { %v2291_v32 = vpop.f32.mrb[32].mxu0 }
 0x38b   :  { %v1426_v35 = vpop.f32.mrb[33].mxu0  ;;  %1643 = vrot.lane.b32.xlu1 %v2291_v32, %s2433_s24 }
 0x38c   :  { %1641 = vrot.lane.b32.xlu0 %v1426_v35, %s2433_s24  ;;  %v1465_v35 = vld [vmem:[%s3571_s4] sm:$0xff] }
 0x38f   :  { %1583 = vrot.lane.b32.xlu1 %v2266_v24, %s2432_s2 }
 0x390   :  { %1581 = vrot.lane.b32.xlu0 %v1155_v30, %s2432_s2  ;;  %v2269_v43 = vpop.f32.mrb[36].mxu1 }
 0x391   :  { %v1165_v61 = vpop.f32.mrb[37].mxu1 }
 0x392   :  { %v2294_v47 = vpop.f32.mrb[34].mxu0 }
 0x393   :  { %v1436_v36 = vpop.f32.mrb[35].mxu0  ;;  %1647 = vrot.lane.b32.xlu1 %v2294_v47, %s2433_s24 }
 0x394   :  { %1645 = vrot.lane.b32.xlu0 %v1436_v36, %s2433_s24 }
 0x397   :  { %1587 = vrot.lane.b32.xlu1 %v2269_v43, %s2432_s2 }
 0x398   :  { %1585 = vrot.lane.b32.xlu0 %v1165_v61, %s2432_s2  ;;  %v2272_v41 = vpop.f32.mrb[38].mxu1 }
 0x399   :  { %v1175_v52 = vpop.f32.mrb[39].mxu1 }
 0x39a   :  { %v2297_v53 = vpop.f32.mrb[36].mxu0 }
 0x39b   :  { %v1446_v54 = vpop.f32.mrb[37].mxu0  ;;  %1651 = vrot.lane.b32.xlu1 %v2297_v53, %s2433_s24 }
 0x39c   :  { %1649 = vrot.lane.b32.xlu0 %v1446_v54, %s2433_s24  ;;  %v1468_v54 = vld [vmem:[%s3571_s4 + $0x18] sm:$0xff] }
 0x39e   :  { %v1498_v49 = vpop.permute.xlu0 %1497 }
 0x39f   :  { %1591 = vrot.lane.b32.xlu1 %v2272_v41, %s2432_s2  ;;  %v1674_v24 = vsel %vm1673_vm6, %v3046_v57, %v1498_v49 }
 0x3a0   :  { %1589 = vrot.lane.b32.xlu0 %v1175_v52, %s2432_s2 }
 0x3a2   :  { %v2300_v3 = vpop.f32.mrb[38].mxu0 }
 0x3a3   :  { %v1456_v48 = vpop.f32.mrb[39].mxu0  ;;  %1655 = vrot.lane.b32.xlu1 %v2300_v3, %s2433_s24 }
 0x3a4   :  { %1653 = vrot.lane.b32.xlu0 %v1456_v48, %s2433_s24 }
 0x3a5   :  { %v1504_v16 = vpop.permute.xlu0 %1503 }
 0x3a6   :  { %v1677_v53 = vsel %vm1673_vm6, %v3048_v58, %v1504_v16 }
 0x3a7   :  { %1943 = vperm.xlu1 %2356, %v2940_v63   ;;  %v1500_v63 = vpop.permute.xlu1 %1499 }
 0x3a8   :  { %1948 = vperm.xlu0 %2355, %v2947_v45   ;;  %v1675_v23 = vsel %vm1673_vm6, %v3044_v55, %v1500_v63  ;;  %v1467_v63 = vld [vmem:[%s3571_s4 + $0x10] sm:$0xff] }
 0x3a9   :  { %v1502_v50 = vpop.permute.xlu0 %1501 }
 0x3aa   :  { %v1676_v49 = vsel %vm1673_vm6, %v3050_v0, %v1502_v50 }
 0x3ad   :  { %v1508_v1 = vpop.permute.xlu0 %1507 }
 0x3b1   :  { %v1506_v17 = vpop.permute.xlu0 %1505 }
 0x3b5   :  { %v3232_v5 = vpop.permute.xlu0 %1511 }
 0x3b9   :  { %v3236_v7 = vpop.permute.xlu0 %1509 }
 0x3bd   :  { %v3238_v8 = vpop.permute.xlu1 %1515 }
 0x3be   :  { %v3240_v45 = vpop.permute.xlu0 %1513 }
 0x3c5   :  { %v3242_v9 = vpop.permute.xlu1 %1519 }
 0x3c6   :  { %v3244_v10 = vpop.permute.xlu0 %1517 }
 0x3cd   :  { %v3246_v11 = vpop.permute.xlu1 %1523 }
 0x3ce   :  { %v3248_v12 = vpop.permute.xlu0 %1521 }
 0x3d5   :  { %v3250_v14 = vpop.permute.xlu1 %1527 }
 0x3d6   :  { %v3252_v18 = vpop.permute.xlu0 %1525 }
 0x3d9   :  { %v1564_v33 = vpop.permute.xlu1 %1563 }
 0x3da   :  { %v1562_v22 = vpop.permute.xlu0 %1561  ;;  %v1691_v30 = vsel %vm116_vm10, %v1675_v23, %v1564_v33 }
 0x3db   :  { %v1690_v43 = vsel %vm116_vm10, %v1674_v24, %v1562_v22 }
 0x3dd   :  { %v1628_v32 = vpop.permute.xlu1 %1627 }
 0x3de   :  { %v1708_v61 = vsel %vm1706_vm7, %v1691_v30, %v1628_v32  ;;  %v1626_v47 = vpop.permute.xlu0 %1625 }
 0x3df   :  { %v1724_v55 = vadd.f32 %v1708_v61, %v1466_v25  ;;  %v1707_v36 = vsel %vm1706_vm7, %v1690_v43, %v1626_v47  ;;  %v1678_v43 = vsel %vm1673_vm6, %v3056_v38, %v1506_v17 }
 0x3e0   :  { %v1723_v41 = vadd.f32 %v1707_v36, %v1465_v35 }
 0x3e1   :  { %1741 = vst.msk [vmem:[%s3571_s4 + $0x8] sm:$0xff] %vm23_vm5, %v1724_v55  ;;  %v1568_v57 = vpop.permute.xlu1 %1567  ;;  %v1469_v55 = vld [vmem:[%s3571_s4 + $0x20] sm:$0xff] }
 0x3e2   :  { %1740 = vst.msk [vmem:[%s3571_s4] sm:$0xff] %vm23_vm5, %v1723_v41  ;;  %v1566_v52 = vpop.permute.xlu0 %1565  ;;  %v1693_v3 = vsel %vm116_vm10, %v1677_v53, %v1568_v57 }
 0x3e3   :  { %v1692_v33 = vsel %vm116_vm10, %v1676_v49, %v1566_v52 }
 0x3e5   :  { %v1632_v48 = vpop.permute.xlu1 %1631 }
 0x3e6   :  { %v1710_v22 = vsel %vm1706_vm7, %v1693_v3, %v1632_v48  ;;  %v1630_v23 = vpop.permute.xlu0 %1629  ;;  %v1680_v48 = vsel %vm1673_vm6, %v3062_v28, %v3236_v7 }
 0x3e7   :  { %v1726_v58 = vadd.f32 %v1710_v22, %v1468_v54  ;;  %v1709_v16 = vsel %vm1706_vm7, %v1692_v33, %v1630_v23 }
 0x3e8   :  { %v1856_v25 = vld [vmem:[%s3571_s4 + $0x8] sm:$0xff]  ;;  %v1725_v0 = vadd.f32 %v1709_v16, %v1467_v63 }
 0x3e9   :  { %v1952_v50 = vmul.f32 %v3212_v26, %v1856_v25  ;;  %v1855_v24 = vld [vmem:[%s3571_s4] sm:$0xff]  ;;  %1743 = vst.msk [vmem:[%s3571_s4 + $0x18] sm:$0xff] %vm23_vm5, %v1726_v58  ;;  %v1572_v30 = vpop.permute.xlu1 %1571  ;;  %v1679_v26 = vsel %vm1673_vm6, %v3054_v37, %v1508_v1 }
 0x3ea   :  { %v1951_v32 = vmul.f32 %v3182_v13, %v1855_v24  ;;  %1742 = vst.msk [vmem:[%s3571_s4 + $0x10] sm:$0xff] %vm23_vm5, %v1725_v0  ;;  %v1570_v35 = vpop.permute.xlu0 %1569  ;;  %v1470_v13 = vld [vmem:[%s3571_s4 + $0x28] sm:$0xff]  ;;  %v1695_v61 = vsel %vm116_vm10, %v1679_v26, %v1572_v30 }
 0x3eb   :  { %1968 = vst.msk [vmem:[%s3571_s4 + $0x8] sm:$0xff] %vm23_vm5, %v1952_v50  ;;  %v1694_v37 = vsel %vm116_vm10, %v1678_v43, %v1570_v35 }
 0x3ec   :  { %1967 = vst.msk [vmem:[%s3571_s4] sm:$0xff] %vm23_vm5, %v1951_v32  ;;  %v1682_v32 = vsel %vm1673_vm6, %v3068_v62, %v3240_v45 }
 0x3ed   :  { %v1636_v47 = vpop.permute.xlu1 %1635 }
 0x3ee   :  { %v1712_v1 = vsel %vm1706_vm7, %v1695_v61, %v1636_v47  ;;  %v1634_v36 = vpop.permute.xlu0 %1633 }
 0x3ef   :  { %v1728_v41 = vadd.f32 %v1712_v1, %v1470_v13  ;;  %v1711_v57 = vsel %vm1706_vm7, %v1694_v37, %v1634_v36 }
 0x3f0   :  { %v1858_v52 = vld [vmem:[%s3571_s4 + $0x18] sm:$0xff]  ;;  %v1727_v38 = vadd.f32 %v1711_v57, %v1469_v55  ;;  %v1684_v57 = vsel %vm1673_vm6, %v3074_v46, %v3244_v10 }
 0x3f1   :  { %v1954_v17 = vmul.f32 %v3187_v21, %v1858_v52  ;;  %v1857_v53 = vld [vmem:[%s3571_s4 + $0x10] sm:$0xff]  ;;  %1745 = vst.msk [vmem:[%s3571_s4 + $0x28] sm:$0xff] %vm23_vm5, %v1728_v41  ;;  %v1576_v54 = vpop.permute.xlu1 %1575  ;;  %v1681_v21 = vsel %vm1673_vm6, %v3060_v42, %v3232_v5 }
 0x3f2   :  { %v1953_v49 = vmul.f32 %v3218_v60, %v1857_v53  ;;  %1744 = vst.msk [vmem:[%s3571_s4 + $0x20] sm:$0xff] %vm23_vm5, %v1727_v38  ;;  %v1574_v3 = vpop.permute.xlu0 %1573  ;;  %v1472_v60 = vld [vmem:[%s3571_s4 + $0x38] sm:$0xff]  ;;  %v1697_v63 = vsel %vm116_vm10, %v1681_v21, %v1576_v54  ;;  %v1471_v42 = vld [vmem:[%s3571_s4 + $0x30] sm:$0xff] }
 0x3f3   :  { %1970 = vst.msk [vmem:[%s3571_s4 + $0x18] sm:$0xff] %vm23_vm5, %v1954_v17  ;;  %v1696_v5 = vsel %vm116_vm10, %v1680_v48, %v1574_v3 }
 0x3f4   :  { %1969 = vst.msk [vmem:[%s3571_s4 + $0x10] sm:$0xff] %vm23_vm5, %v1953_v49 }
 0x3f5   :  { %v1640_v33 = vpop.permute.xlu1 %1639 }
 0x3f6   :  { %v1714_v22 = vsel %vm1706_vm7, %v1697_v63, %v1640_v33  ;;  %v1638_v23 = vpop.permute.xlu0 %1637  ;;  %v1686_v33 = vsel %vm1673_vm6, %v3080_v15, %v3248_v12 }
 0x3f7   :  { %v1730_v58 = vadd.f32 %v1714_v22, %v1472_v60  ;;  %v1713_v16 = vsel %vm1706_vm7, %v1696_v5, %v1638_v23 }
 0x3f8   :  { %v1860_v25 = vld [vmem:[%s3571_s4 + $0x28] sm:$0xff]  ;;  %v1729_v28 = vadd.f32 %v1713_v16, %v1471_v42 }
 0x3f9   :  { %v1956_v7 = vmul.f32 %v3192_v29, %v1860_v25  ;;  %v1859_v0 = vld [vmem:[%s3571_s4 + $0x20] sm:$0xff]  ;;  %1747 = vst.msk [vmem:[%s3571_s4 + $0x38] sm:$0xff] %vm23_vm5, %v1730_v58  ;;  %v1580_v50 = vpop.permute.xlu1 %1579  ;;  %v1683_v29 = vsel %vm1673_vm6, %v3066_v59, %v3238_v8 }
 0x3fa   :  { %v1955_v24 = vmul.f32 %v3224_v44, %v1859_v0  ;;  %1746 = vst.msk [vmem:[%s3571_s4 + $0x30] sm:$0xff] %vm23_vm5, %v1729_v28  ;;  %v1578_v30 = vpop.permute.xlu0 %1577  ;;  %v1474_v44 = vld [vmem:[%s3571_s4 + $0x48] sm:$0xff]  ;;  %v1699_v35 = vsel %vm116_vm10, %v1683_v29, %v1580_v50  ;;  %v1473_v59 = vld [vmem:[%s3571_s4 + $0x40] sm:$0xff] }
 0x3fb   :  { %1972 = vst.msk [vmem:[%s3571_s4 + $0x28] sm:$0xff] %vm23_vm5, %v1956_v7  ;;  %v1698_v8 = vsel %vm116_vm10, %v1682_v32, %v1578_v30 }
 0x3fc   :  { %1971 = vst.msk [vmem:[%s3571_s4 + $0x20] sm:$0xff] %vm23_vm5, %v1955_v24  ;;  %v1688_v24 = vsel %vm1673_vm6, %v3166_v27, %v3252_v18 }
 0x3fd   :  { %v1644_v26 = vpop.permute.xlu1 %1643 }
 0x3fe   :  { %v1716_v13 = vsel %vm1706_vm7, %v1699_v35, %v1644_v26  ;;  %v1642_v43 = vpop.permute.xlu0 %1641 }
 0x3ff   :  { %v1732_v61 = vadd.f32 %v1716_v13, %v1474_v44  ;;  %v1715_v47 = vsel %vm1706_vm7, %v1698_v8, %v1642_v43 }
 0x400   :  { %v1862_v55 = vld [vmem:[%s3571_s4 + $0x38] sm:$0xff]  ;;  %v1731_v62 = vadd.f32 %v1715_v47, %v1473_v59 }
 0x401   :  { %v1958_v45 = vmul.f32 %v3197_v34, %v1862_v55  ;;  %v1861_v37 = vld [vmem:[%s3571_s4 + $0x30] sm:$0xff]  ;;  %1749 = vst.msk [vmem:[%s3571_s4 + $0x48] sm:$0xff] %vm23_vm5, %v1732_v61  ;;  %v1584_v1 = vpop.permute.xlu1 %1583  ;;  %v1685_v34 = vsel %vm1673_vm6, %v3072_v51, %v3242_v9 }
 0x402   :  { %v1957_v36 = vmul.f32 %v3226_v39, %v1861_v37  ;;  %1748 = vst.msk [vmem:[%s3571_s4 + $0x40] sm:$0xff] %vm23_vm5, %v1731_v62  ;;  %v1582_v41 = vpop.permute.xlu0 %1581  ;;  %v1476_v39 = vld [vmem:[%s3571_s4 + $0x58] sm:$0xff]  ;;  %v1701_v52 = vsel %vm116_vm10, %v1685_v34, %v1584_v1  ;;  %v1475_v51 = vld [vmem:[%s3571_s4 + $0x50] sm:$0xff] }
 0x403   :  { %1974 = vst.msk [vmem:[%s3571_s4 + $0x38] sm:$0xff] %vm23_vm5, %v1958_v45  ;;  %v1700_v9 = vsel %vm116_vm10, %v1684_v57, %v1582_v41 }
 0x404   :  { %1973 = vst.msk [vmem:[%s3571_s4 + $0x30] sm:$0xff] %vm23_vm5, %v1957_v36 }
 0x405   :  { %v1648_v38 = vpop.permute.xlu1 %1647 }
 0x406   :  { %v1718_v17 = vsel %vm1706_vm7, %v1701_v52, %v1648_v38  ;;  %v1646_v53 = vpop.permute.xlu0 %1645 }
 0x407   :  { %v1734_v54 = vadd.f32 %v1718_v17, %v1476_v39  ;;  %v1717_v49 = vsel %vm1706_vm7, %v1700_v9, %v1646_v53 }
 0x408   :  { %v1864_v3 = vld [vmem:[%s3571_s4 + $0x48] sm:$0xff]  ;;  %v1733_v46 = vadd.f32 %v1717_v49, %v1475_v51 }
 0x409   :  { %v1960_v10 = vmul.f32 %v3202_v40, %v1864_v3  ;;  %v1863_v21 = vld [vmem:[%s3571_s4 + $0x40] sm:$0xff]  ;;  %1751 = vst.msk [vmem:[%s3571_s4 + $0x58] sm:$0xff] %vm23_vm5, %v1734_v54  ;;  %v1588_v60 = vpop.permute.xlu1 %1587  ;;  %v1687_v40 = vsel %vm1673_vm6, %v3078_v19, %v3246_v11 }
 0x40a   :  { %v1959_v48 = vmul.f32 %v3228_v2, %v1863_v21  ;;  %1750 = vst.msk [vmem:[%s3571_s4 + $0x50] sm:$0xff] %vm23_vm5, %v1733_v46  ;;  %v1586_v63 = vpop.permute.xlu0 %1585  ;;  %v1478_v2 = vld [vmem:[%s3571_s4 + $0x68] sm:$0xff]  ;;  %v1703_v42 = vsel %vm116_vm10, %v1687_v40, %v1588_v60  ;;  %v1477_v19 = vld [vmem:[%s3571_s4 + $0x60] sm:$0xff] }
 0x40b   :  { %1976 = vst.msk [vmem:[%s3571_s4 + $0x48] sm:$0xff] %vm23_vm5, %v1960_v10  ;;  %v1702_v11 = vsel %vm116_vm10, %v1686_v33, %v1586_v63 }
 0x40c   :  { %1975 = vst.msk [vmem:[%s3571_s4 + $0x40] sm:$0xff] %vm23_vm5, %v1959_v48 }
 0x40d   :  { %v1652_v5 = vpop.permute.xlu1 %1651 }
 0x40e   :  { %v1720_v22 = vsel %vm1706_vm7, %v1703_v42, %v1652_v5  ;;  %v1650_v23 = vpop.permute.xlu0 %1649 }
 0x40f   :  { %v1736_v58 = vadd.f32 %v1720_v22, %v1478_v2  ;;  %v1719_v16 = vsel %vm1706_vm7, %v1702_v11, %v1650_v23 }
 0x410   :  { %v1866_v25 = vld [vmem:[%s3571_s4 + $0x58] sm:$0xff]  ;;  %v1735_v15 = vadd.f32 %v1719_v16, %v1477_v19 }
 0x411   :  { %v1962_v12 = vmul.f32 %v3207_v56, %v1866_v25  ;;  %v1865_v28 = vld [vmem:[%s3571_s4 + $0x50] sm:$0xff]  ;;  %1753 = vst.msk [vmem:[%s3571_s4 + $0x68] sm:$0xff] %vm23_vm5, %v1736_v58  ;;  %v1592_v7 = vpop.permute.xlu1 %1591  ;;  %v1689_v56 = vsel %vm1673_vm6, %v3084_v20, %v3250_v14 }
 0x412   :  { %v1961_v0 = vmul.f32 %v3230_v4, %v1865_v28  ;;  %1752 = vst.msk [vmem:[%s3571_s4 + $0x60] sm:$0xff] %vm23_vm5, %v1735_v15  ;;  %v1590_v50 = vpop.permute.xlu0 %1589  ;;  %v1480_v4 = vld [vmem:[%s3571_s4 + $0x78] sm:$0xff]  ;;  %v1705_v30 = vsel %vm116_vm10, %v1689_v56, %v1592_v7  ;;  %v1479_v20 = vld [vmem:[%s3571_s4 + $0x70] sm:$0xff] }
 0x413   :  { %1978 = vst.msk [vmem:[%s3571_s4 + $0x58] sm:$0xff] %vm23_vm5, %v1962_v12  ;;  %v1704_v14 = vsel %vm116_vm10, %v1688_v24, %v1590_v50 }
 0x414   :  { %1977 = vst.msk [vmem:[%s3571_s4 + $0x50] sm:$0xff] %vm23_vm5, %v1961_v0 }
 0x415   :  { %v1656_v29 = vpop.permute.xlu1 %1655 }
 0x416   :  { %v1722_v44 = vsel %vm1706_vm7, %v1705_v30, %v1656_v29  ;;  %v1654_v32 = vpop.permute.xlu0 %1653 }
 0x417   :  { %v1738_v35 = vadd.f32 %v1722_v44, %v1480_v4  ;;  %v1721_v26 = vsel %vm1706_vm7, %v1704_v14, %v1654_v32 }
 0x418   :  { %v1868_v59 = vld [vmem:[%s3571_s4 + $0x68] sm:$0xff]  ;;  %v1737_v27 = vadd.f32 %v1721_v26, %v1479_v20 }
 0x419   :  { %v1964_v18 = vmul.f32 %v3214_v31, %v1868_v59  ;;  %v1867_v8 = vld [vmem:[%s3571_s4 + $0x60] sm:$0xff]  ;;  %1755 = vst.msk [vmem:[%s3571_s4 + $0x78] sm:$0xff] %vm23_vm5, %v1738_v35 }
 0x41a   :  { %v1963_v13 = vmul.f32 %v3234_v6, %v1867_v8  ;;  %1754 = vst.msk [vmem:[%s3571_s4 + $0x70] sm:$0xff] %vm23_vm5, %v1737_v27 }
 0x41b   :  { %1980 = vst.msk [vmem:[%s3571_s4 + $0x68] sm:$0xff] %vm23_vm5, %v1964_v18 }
 0x41c   :  { %1979 = vst.msk [vmem:[%s3571_s4 + $0x60] sm:$0xff] %vm23_vm5, %v1963_v13 }
 0x420   :  { %v1870_v61 = vld [vmem:[%s3571_s4 + $0x78] sm:$0xff] }
 0x421   :  { %v1869_v6 = vld [vmem:[%s3571_s4 + $0x70] sm:$0xff] }
 0x426   :  { %v1944_v31 = vpop.permute.xlu1 %1943 }
 0x427   :  { %v1965_v43 = vmul.f32 %v1944_v31, %v1869_v6  ;;  %v1949_v47 = vpop.permute.xlu0 %1948 }
 0x428   :  { %v1966_v55 = vmul.f32 %v1949_v47, %v1870_v61 }
 0x429   :  { %1981 = vst.msk [vmem:[%s3571_s4 + $0x70] sm:$0xff] %vm23_vm5, %v1965_v43 }
 0x42a   :  { %1982 = vst.msk [vmem:[%s3571_s4 + $0x78] sm:$0xff] %vm23_vm5, %v1966_v55 }

</bundles_post_ra>
